<compile_context>
chip_gen: v7x
topology: tpu7x:2x2x1
jax: 0.10.0
libtpu: 0.0.40
codegen_flags: <defaults>
</compile_context>

<pallas_src>
import numpy as np
import jax
import jax.numpy as jnp
from jax import lax
from jax.experimental import pallas as pl
from jax.experimental.pallas import tpu as pltpu

NUM_FILTERS = 32
NUM_LAYERS = 2                      # HeadCNN(num_layers=2, num_filters=32, flatten=True)
IN_SHAPE = (NUM_FILTERS, 16, 16)    # (C, H, W) -- first conv needs Cin == num_filters
BATCH = 2


def _tensorcores_per_chip():
    """1 TensorCore/chip on v5e/v6e, 2 on v7x.  Only used to pick the grid layout."""
    try:
        kind = jax.devices()[0].device_kind.lower()
    except Exception:
        return 1
    return 2 if ("v7" in kind or "7x" in kind) else 1


# ----------------------------- fused Pallas kernel -----------------------------
def make_head_cnn_call(n, c, h, w, num_layers, dtype=jnp.float32):
    hw = h * w
    ho, wo = h - 2 * num_layers, w - 2 * num_layers
    out_cols = ho * wo
    # Full-width/roll invariant: a valid output column p = y*W+x of layer l+1 only reads
    # columns (y+ky)*W + (x+kx) <= (H-1)*W + (W-1) = hw-1 of layer l, which are themselves
    # valid columns of layer l -- so the wrap-garbage columns never propagate.  This needs
    # the valid window to stay non-empty at every layer:
    assert h > 2 * num_layers and w > 2 * num_layers, "valid window collapses; roll taps invalid"
    offsets = tuple(ky * w + kx for ky in range(3) for kx in range(3))

    # 0/1 selection matrix: compacts the valid (y < ho, x < wo) columns of the last layer's
    # full-width slab to y*wo + x order (== torch NCHW flatten order).  Multiplying the
    # finite garbage columns by 0 is exact; finiteness holds because inputs/weights are
    # finite and ReLU/conv keep them finite (would break only if Inf/NaN ever entered).
    q = np.arange(out_cols)
    src = (q // wo) * w + (q % wo)
    sel = np.zeros((hw, out_cols), np.float32)
    sel[src, q] = 1.0
    sel = jnp.asarray(sel)

    # Grid layout per generation: v7x -> one image per grid step (parallel across 2 TCs);
    # v5e/v6e -> all images in one step (single TC, avoid per-step pipeline overhead).
    imgs_per_step = 1 if (_tensorcores_per_chip() >= 2 and n > 1) else n
    assert n % imgs_per_step == 0
    num_steps = n // imgs_per_step

    def kernel(*refs):
        x_ref = refs[0]
        wb_refs = refs[1:1 + 2 * num_layers]
        s_ref = refs[1 + 2 * num_layers]
        o_ref = refs[2 + 2 * num_layers]

        for b in range(imgs_per_step):
            act = x_ref[b]                                   # (C, H*W), channel-major
            for l in range(num_layers):
                wt_ref = wb_refs[2 * l]                      # (9, Cout, Cin), per-tap weights
                b_ref = wb_refs[2 * l + 1]                   # (Cout, 1)
                a = jnp.maximum(act, 0.0)                    # ReLU precedes each conv
                acc = None
                for t, off in enumerate(offsets):
                    # Tap t: output column p reads input column p + off  ->  roll left by
                    # off (XLU lane rotation, full-vreg, no masked slices).
                    a_t = a if off == 0 else pltpu.roll(a, hw - off, axis=1)
                    part = jnp.dot(wt_ref[t], a_t, preferred_element_type=jnp.float32)
                    acc = part if acc is None else acc + part
                act = acc + b_ref[...]
            # Crop the valid window + channel-major flatten via the constant 0/1 matrix.
            o_ref[b] = jnp.dot(act, s_ref[...],
                               preferred_element_type=jnp.float32).astype(o_ref.dtype)

    in_specs = [pl.BlockSpec((imgs_per_step, c, hw), lambda i: (i, 0, 0))]
    for _ in range(num_layers):
        in_specs.append(pl.BlockSpec((9, c, c), lambda i: (0, 0, 0)))    # weights (resident)
        in_specs.append(pl.BlockSpec((c, 1), lambda i: (0, 0)))          # bias    (resident)
    in_specs.append(pl.BlockSpec((hw, out_cols), lambda i: (0, 0)))      # sel     (resident)

    call = pl.pallas_call(
        kernel,
        out_shape=jax.ShapeDtypeStruct((n, c, out_cols), dtype),
        grid=(num_steps,),
        in_specs=in_specs,
        out_specs=pl.BlockSpec((imgs_per_step, c, out_cols), lambda i: (i, 0, 0)),
        compiler_params=pltpu.CompilerParams(dimension_semantics=("parallel",)),
    )
    return call, sel


def build_forward(n, c, h, w, num_layers):
    call, sel = make_head_cnn_call(n, c, h, w, num_layers)

    @jax.jit
    def forward(x_nchw, prepped_params):
        args = [x_nchw.reshape(n, c, h * w)]             # contiguous-dims reshape: free
        for wstack, bcol in prepped_params:
            args.extend((wstack, bcol))
        args.append(sel)
        out = call(*args)                                # (N, C, Ho*Wo)
        return out.reshape(n, -1)                        # free -> (N, C*Ho*Wo)

    return forward


# ------------------------- parameter init (orthogonal, relu gain) -------------------------
def orthogonal_conv_weight(key, cout, cin, kh, kw, gain):
    # mimics nn.init.orthogonal_ on a (cout, cin, kh, kw) tensor with gain=sqrt(2)
    rows, cols = cout, cin * kh * kw
    flat = jax.random.normal(key, (max(rows, cols), min(rows, cols)), dtype=jnp.float32)
    q, r = jnp.linalg.qr(flat)
    d = jnp.diagonal(r)
    q = q * jnp.where(d == 0, 1.0, jnp.sign(d))[None, :]     # guard sign(0)
    if rows < cols:
        q = q.T
    return (gain * q[:rows, :cols]).reshape(cout, cin, kh, kw)   # OIHW (torch layout)


def init_params(key):
    params = []
    gain = float(np.sqrt(2.0))                                   # calculate_gain('relu')
    for _ in range(NUM_LAYERS):
        key, sub = jax.random.split(key)
        w = orthogonal_conv_weight(sub, NUM_FILTERS, NUM_FILTERS, 3, 3, gain)
        b = jnp.zeros((NUM_FILTERS,), jnp.float32)               # bias filled with 0.0
        params.append((w, b))
    return params


def prepare_params(params_oihw):
    """OIHW conv weights -> per-tap (9, Cout, Cin) matmul weights, tap order = ky*3 + kx."""
    prepped = []
    for w, b in params_oihw:
        cout, cin, kh, kw = w.shape
        wstack = jnp.transpose(w, (2, 3, 0, 1)).reshape(kh * kw, cout, cin)
        prepped.append((wstack, b.reshape(cout, 1)))
    return prepped


# ------------------------- pure-JAX reference -------------------------
def head_cnn_reference(x_nchw, params_oihw):
    x = x_nchw
    for w, b in params_oihw:
        x = jnp.maximum(x, 0.0)
        x = lax.conv_general_dilated(
            x, w, window_strides=(1, 1), padding="VALID",
            dimension_numbers=("NCHW", "OIHW", "NCHW"))
        x = x + b[None, :, None, None]
    return x.reshape(x.shape[0], -1)


if __name__ == "__main__":
    key = jax.random.PRNGKey(0)
    kx, kp = jax.random.split(key)
    x = jax.random.normal(kx, (BATCH,) + IN_SHAPE, dtype=jnp.float32)   # NCHW input
    params = init_params(kp)
    prepped = prepare_params(params)

    forward = build_forward(BATCH, IN_SHAPE[0], IN_SHAPE[1], IN_SHAPE[2], NUM_LAYERS)
    out = jax.block_until_ready(forward(x, prepped))

    ref = jax.block_until_ready(head_cnn_reference(x, params))
    expected_dim = NUM_FILTERS * (IN_SHAPE[1] - 2 * NUM_LAYERS) * (IN_SHAPE[2] - 2 * NUM_LAYERS)
    assert out.shape == (BATCH, expected_dim), out.shape
    assert jnp.allclose(out, ref, atol=1e-4, rtol=1e-4), float(jnp.max(jnp.abs(out - ref)))

    print("KERNEL_OK")
</pallas_src>

<mosaic_0001>
module attributes {stable_mosaic.version = 11 : i64} {
  func.func @kernel(%arg0: i32, %arg1: memref<2x32x256xf32, #tpu.memory_space<vmem>>, %arg2: memref<9x32x32xf32, #tpu.memory_space<vmem>>, %arg3: memref<32x1xf32, #tpu.memory_space<vmem>>, %arg4: memref<9x32x32xf32, #tpu.memory_space<vmem>>, %arg5: memref<32x1xf32, #tpu.memory_space<vmem>>, %arg6: memref<256x144xf32, #tpu.memory_space<vmem>>, %arg7: memref<2x32x144xf32, #tpu.memory_space<vmem>>) attributes {dimension_semantics = [#tpu.dimension_semantics<parallel>], iteration_bounds = array<i64: 1>, scalar_prefetch = 0 : i64, scratch_operands = 0 : i64, tpu.core_type = #tpu.core_type<tc>, window_params = [{transform_indices = @transform_0, window_bounds = array<i64: 2, 32, 256>}, {pipeline_mode = #tpu.pipeline_mode<synchronous>, transform_indices = @transform_1, window_bounds = array<i64: 9, 32, 32>}, {pipeline_mode = #tpu.pipeline_mode<synchronous>, transform_indices = @transform_2, window_bounds = array<i64: 32, 1>}, {pipeline_mode = #tpu.pipeline_mode<synchronous>, transform_indices = @transform_3, window_bounds = array<i64: 9, 32, 32>}, {pipeline_mode = #tpu.pipeline_mode<synchronous>, transform_indices = @transform_4, window_bounds = array<i64: 32, 1>}, {pipeline_mode = #tpu.pipeline_mode<synchronous>, transform_indices = @transform_5, window_bounds = array<i64: 256, 144>}, {transform_indices = @transform_6, window_bounds = array<i64: 2, 32, 144>}]} {
    %c0 = arith.constant 0 : index
    %c0_0 = arith.constant 0 : index
    %c0_1 = arith.constant 0 : index
    %0 = vector.load %arg1[%c0, %c0_0, %c0_1] : memref<2x32x256xf32, #tpu.memory_space<vmem>>, vector<1x32x256xf32>
    %1 = vector.shape_cast %0 : vector<1x32x256xf32> to vector<32x256xf32>
    %cst = arith.constant 0.000000e+00 : f32
    %2 = vector.broadcast %cst : f32 to vector<32x256xf32>
    %3 = arith.maximumf %1, %2 : vector<32x256xf32>
    %c0_2 = arith.constant 0 : index
    %c0_3 = arith.constant 0 : index
    %c0_4 = arith.constant 0 : index
    %4 = vector.load %arg2[%c0_2, %c0_3, %c0_4] : memref<9x32x32xf32, #tpu.memory_space<vmem>>, vector<1x32x32xf32>
    %5 = vector.shape_cast %4 : vector<1x32x32xf32> to vector<32x32xf32>
    %cst_5 = arith.constant dense<0.000000e+00> : vector<32x256xf32>
    %6 = tpu.matmul %5, %3, %cst_5 {dimension_numbers = #tpu.dot_dimension_numbers<[1], [0], [0], [1], [0, 0, 1, 1], [], []>} : vector<32x32xf32>, vector<32x256xf32>, vector<32x256xf32> -> vector<32x256xf32>
    %c255_i32 = arith.constant 255 : i32
    %7 = tpu.dynamic_rotate %3 by %c255_i32 dim 1 : vector<32x256xf32>, i32 -> vector<32x256xf32>
    %c1 = arith.constant 1 : index
    %c0_6 = arith.constant 0 : index
    %c0_7 = arith.constant 0 : index
    %8 = vector.load %arg2[%c1, %c0_6, %c0_7] : memref<9x32x32xf32, #tpu.memory_space<vmem>>, vector<1x32x32xf32>
    %9 = vector.shape_cast %8 : vector<1x32x32xf32> to vector<32x32xf32>
    %cst_8 = arith.constant dense<0.000000e+00> : vector<32x256xf32>
    %10 = tpu.matmul %9, %7, %cst_8 {dimension_numbers = #tpu.dot_dimension_numbers<[1], [0], [0], [1], [0, 0, 1, 1], [], []>} : vector<32x32xf32>, vector<32x256xf32>, vector<32x256xf32> -> vector<32x256xf32>
    %11 = arith.addf %6, %10 : vector<32x256xf32>
    %c254_i32 = arith.constant 254 : i32
    %12 = tpu.dynamic_rotate %3 by %c254_i32 dim 1 : vector<32x256xf32>, i32 -> vector<32x256xf32>
    %c2 = arith.constant 2 : index
    %c0_9 = arith.constant 0 : index
    %c0_10 = arith.constant 0 : index
    %13 = vector.load %arg2[%c2, %c0_9, %c0_10] : memref<9x32x32xf32, #tpu.memory_space<vmem>>, vector<1x32x32xf32>
    %14 = vector.shape_cast %13 : vector<1x32x32xf32> to vector<32x32xf32>
    %cst_11 = arith.constant dense<0.000000e+00> : vector<32x256xf32>
    %15 = tpu.matmul %14, %12, %cst_11 {dimension_numbers = #tpu.dot_dimension_numbers<[1], [0], [0], [1], [0, 0, 1, 1], [], []>} : vector<32x32xf32>, vector<32x256xf32>, vector<32x256xf32> -> vector<32x256xf32>
    %16 = arith.addf %11, %15 : vector<32x256xf32>
    %c240_i32 = arith.constant 240 : i32
    %17 = tpu.dynamic_rotate %3 by %c240_i32 dim 1 : vector<32x256xf32>, i32 -> vector<32x256xf32>
    %c3 = arith.constant 3 : index
    %c0_12 = arith.constant 0 : index
    %c0_13 = arith.constant 0 : index
    %18 = vector.load %arg2[%c3, %c0_12, %c0_13] : memref<9x32x32xf32, #tpu.memory_space<vmem>>, vector<1x32x32xf32>
    %19 = vector.shape_cast %18 : vector<1x32x32xf32> to vector<32x32xf32>
    %cst_14 = arith.constant dense<0.000000e+00> : vector<32x256xf32>
    %20 = tpu.matmul %19, %17, %cst_14 {dimension_numbers = #tpu.dot_dimension_numbers<[1], [0], [0], [1], [0, 0, 1, 1], [], []>} : vector<32x32xf32>, vector<32x256xf32>, vector<32x256xf32> -> vector<32x256xf32>
    %21 = arith.addf %16, %20 : vector<32x256xf32>
    %c239_i32 = arith.constant 239 : i32
    %22 = tpu.dynamic_rotate %3 by %c239_i32 dim 1 : vector<32x256xf32>, i32 -> vector<32x256xf32>
    %c4 = arith.constant 4 : index
    %c0_15 = arith.constant 0 : index
    %c0_16 = arith.constant 0 : index
    %23 = vector.load %arg2[%c4, %c0_15, %c0_16] : memref<9x32x32xf32, #tpu.memory_space<vmem>>, vector<1x32x32xf32>
    %24 = vector.shape_cast %23 : vector<1x32x32xf32> to vector<32x32xf32>
    %cst_17 = arith.constant dense<0.000000e+00> : vector<32x256xf32>
    %25 = tpu.matmul %24, %22, %cst_17 {dimension_numbers = #tpu.dot_dimension_numbers<[1], [0], [0], [1], [0, 0, 1, 1], [], []>} : vector<32x32xf32>, vector<32x256xf32>, vector<32x256xf32> -> vector<32x256xf32>
    %26 = arith.addf %21, %25 : vector<32x256xf32>
    %c238_i32 = arith.constant 238 : i32
    %27 = tpu.dynamic_rotate %3 by %c238_i32 dim 1 : vector<32x256xf32>, i32 -> vector<32x256xf32>
    %c5 = arith.constant 5 : index
    %c0_18 = arith.constant 0 : index
    %c0_19 = arith.constant 0 : index
    %28 = vector.load %arg2[%c5, %c0_18, %c0_19] : memref<9x32x32xf32, #tpu.memory_space<vmem>>, vector<1x32x32xf32>
    %29 = vector.shape_cast %28 : vector<1x32x32xf32> to vector<32x32xf32>
    %cst_20 = arith.constant dense<0.000000e+00> : vector<32x256xf32>
    %30 = tpu.matmul %29, %27, %cst_20 {dimension_numbers = #tpu.dot_dimension_numbers<[1], [0], [0], [1], [0, 0, 1, 1], [], []>} : vector<32x32xf32>, vector<32x256xf32>, vector<32x256xf32> -> vector<32x256xf32>
    %31 = arith.addf %26, %30 : vector<32x256xf32>
    %c224_i32 = arith.constant 224 : i32
    %32 = tpu.dynamic_rotate %3 by %c224_i32 dim 1 : vector<32x256xf32>, i32 -> vector<32x256xf32>
    %c6 = arith.constant 6 : index
    %c0_21 = arith.constant 0 : index
    %c0_22 = arith.constant 0 : index
    %33 = vector.load %arg2[%c6, %c0_21, %c0_22] : memref<9x32x32xf32, #tpu.memory_space<vmem>>, vector<1x32x32xf32>
    %34 = vector.shape_cast %33 : vector<1x32x32xf32> to vector<32x32xf32>
    %cst_23 = arith.constant dense<0.000000e+00> : vector<32x256xf32>
    %35 = tpu.matmul %34, %32, %cst_23 {dimension_numbers = #tpu.dot_dimension_numbers<[1], [0], [0], [1], [0, 0, 1, 1], [], []>} : vector<32x32xf32>, vector<32x256xf32>, vector<32x256xf32> -> vector<32x256xf32>
    %36 = arith.addf %31, %35 : vector<32x256xf32>
    %c223_i32 = arith.constant 223 : i32
    %37 = tpu.dynamic_rotate %3 by %c223_i32 dim 1 : vector<32x256xf32>, i32 -> vector<32x256xf32>
    %c7 = arith.constant 7 : index
    %c0_24 = arith.constant 0 : index
    %c0_25 = arith.constant 0 : index
    %38 = vector.load %arg2[%c7, %c0_24, %c0_25] : memref<9x32x32xf32, #tpu.memory_space<vmem>>, vector<1x32x32xf32>
    %39 = vector.shape_cast %38 : vector<1x32x32xf32> to vector<32x32xf32>
    %cst_26 = arith.constant dense<0.000000e+00> : vector<32x256xf32>
    %40 = tpu.matmul %39, %37, %cst_26 {dimension_numbers = #tpu.dot_dimension_numbers<[1], [0], [0], [1], [0, 0, 1, 1], [], []>} : vector<32x32xf32>, vector<32x256xf32>, vector<32x256xf32> -> vector<32x256xf32>
    %41 = arith.addf %36, %40 : vector<32x256xf32>
    %c222_i32 = arith.constant 222 : i32
    %42 = tpu.dynamic_rotate %3 by %c222_i32 dim 1 : vector<32x256xf32>, i32 -> vector<32x256xf32>
    %c8 = arith.constant 8 : index
    %c0_27 = arith.constant 0 : index
    %c0_28 = arith.constant 0 : index
    %43 = vector.load %arg2[%c8, %c0_27, %c0_28] : memref<9x32x32xf32, #tpu.memory_space<vmem>>, vector<1x32x32xf32>
    %44 = vector.shape_cast %43 : vector<1x32x32xf32> to vector<32x32xf32>
    %cst_29 = arith.constant dense<0.000000e+00> : vector<32x256xf32>
    %45 = tpu.matmul %44, %42, %cst_29 {dimension_numbers = #tpu.dot_dimension_numbers<[1], [0], [0], [1], [0, 0, 1, 1], [], []>} : vector<32x32xf32>, vector<32x256xf32>, vector<32x256xf32> -> vector<32x256xf32>
    %46 = arith.addf %41, %45 : vector<32x256xf32>
    %c0_30 = arith.constant 0 : index
    %c0_31 = arith.constant 0 : index
    %47 = vector.load %arg3[%c0_30, %c0_31] : memref<32x1xf32, #tpu.memory_space<vmem>>, vector<32x1xf32>
    %48 = vector.broadcast %47 : vector<32x1xf32> to vector<32x256xf32>
    %49 = arith.addf %46, %48 : vector<32x256xf32>
    %cst_32 = arith.constant 0.000000e+00 : f32
    %50 = vector.broadcast %cst_32 : f32 to vector<32x256xf32>
    %51 = arith.maximumf %49, %50 : vector<32x256xf32>
    %c0_33 = arith.constant 0 : index
    %c0_34 = arith.constant 0 : index
    %c0_35 = arith.constant 0 : index
    %52 = vector.load %arg4[%c0_33, %c0_34, %c0_35] : memref<9x32x32xf32, #tpu.memory_space<vmem>>, vector<1x32x32xf32>
    %53 = vector.shape_cast %52 : vector<1x32x32xf32> to vector<32x32xf32>
    %cst_36 = arith.constant dense<0.000000e+00> : vector<32x256xf32>
    %54 = tpu.matmul %53, %51, %cst_36 {dimension_numbers = #tpu.dot_dimension_numbers<[1], [0], [0], [1], [0, 0, 1, 1], [], []>} : vector<32x32xf32>, vector<32x256xf32>, vector<32x256xf32> -> vector<32x256xf32>
    %c255_i32_37 = arith.constant 255 : i32
    %55 = tpu.dynamic_rotate %51 by %c255_i32_37 dim 1 : vector<32x256xf32>, i32 -> vector<32x256xf32>
    %c1_38 = arith.constant 1 : index
    %c0_39 = arith.constant 0 : index
    %c0_40 = arith.constant 0 : index
    %56 = vector.load %arg4[%c1_38, %c0_39, %c0_40] : memref<9x32x32xf32, #tpu.memory_space<vmem>>, vector<1x32x32xf32>
    %57 = vector.shape_cast %56 : vector<1x32x32xf32> to vector<32x32xf32>
    %cst_41 = arith.constant dense<0.000000e+00> : vector<32x256xf32>
    %58 = tpu.matmul %57, %55, %cst_41 {dimension_numbers = #tpu.dot_dimension_numbers<[1], [0], [0], [1], [0, 0, 1, 1], [], []>} : vector<32x32xf32>, vector<32x256xf32>, vector<32x256xf32> -> vector<32x256xf32>
    %59 = arith.addf %54, %58 : vector<32x256xf32>
    %c254_i32_42 = arith.constant 254 : i32
    %60 = tpu.dynamic_rotate %51 by %c254_i32_42 dim 1 : vector<32x256xf32>, i32 -> vector<32x256xf32>
    %c2_43 = arith.constant 2 : index
    %c0_44 = arith.constant 0 : index
    %c0_45 = arith.constant 0 : index
    %61 = vector.load %arg4[%c2_43, %c0_44, %c0_45] : memref<9x32x32xf32, #tpu.memory_space<vmem>>, vector<1x32x32xf32>
    %62 = vector.shape_cast %61 : vector<1x32x32xf32> to vector<32x32xf32>
    %cst_46 = arith.constant dense<0.000000e+00> : vector<32x256xf32>
    %63 = tpu.matmul %62, %60, %cst_46 {dimension_numbers = #tpu.dot_dimension_numbers<[1], [0], [0], [1], [0, 0, 1, 1], [], []>} : vector<32x32xf32>, vector<32x256xf32>, vector<32x256xf32> -> vector<32x256xf32>
    %64 = arith.addf %59, %63 : vector<32x256xf32>
    %c240_i32_47 = arith.constant 240 : i32
    %65 = tpu.dynamic_rotate %51 by %c240_i32_47 dim 1 : vector<32x256xf32>, i32 -> vector<32x256xf32>
    %c3_48 = arith.constant 3 : index
    %c0_49 = arith.constant 0 : index
    %c0_50 = arith.constant 0 : index
    %66 = vector.load %arg4[%c3_48, %c0_49, %c0_50] : memref<9x32x32xf32, #tpu.memory_space<vmem>>, vector<1x32x32xf32>
    %67 = vector.shape_cast %66 : vector<1x32x32xf32> to vector<32x32xf32>
    %cst_51 = arith.constant dense<0.000000e+00> : vector<32x256xf32>
    %68 = tpu.matmul %67, %65, %cst_51 {dimension_numbers = #tpu.dot_dimension_numbers<[1], [0], [0], [1], [0, 0, 1, 1], [], []>} : vector<32x32xf32>, vector<32x256xf32>, vector<32x256xf32> -> vector<32x256xf32>
    %69 = arith.addf %64, %68 : vector<32x256xf32>
    %c239_i32_52 = arith.constant 239 : i32
    %70 = tpu.dynamic_rotate %51 by %c239_i32_52 dim 1 : vector<32x256xf32>, i32 -> vector<32x256xf32>
    %c4_53 = arith.constant 4 : index
    %c0_54 = arith.constant 0 : index
    %c0_55 = arith.constant 0 : index
    %71 = vector.load %arg4[%c4_53, %c0_54, %c0_55] : memref<9x32x32xf32, #tpu.memory_space<vmem>>, vector<1x32x32xf32>
    %72 = vector.shape_cast %71 : vector<1x32x32xf32> to vector<32x32xf32>
    %cst_56 = arith.constant dense<0.000000e+00> : vector<32x256xf32>
    %73 = tpu.matmul %72, %70, %cst_56 {dimension_numbers = #tpu.dot_dimension_numbers<[1], [0], [0], [1], [0, 0, 1, 1], [], []>} : vector<32x32xf32>, vector<32x256xf32>, vector<32x256xf32> -> vector<32x256xf32>
    %74 = arith.addf %69, %73 : vector<32x256xf32>
    %c238_i32_57 = arith.constant 238 : i32
    %75 = tpu.dynamic_rotate %51 by %c238_i32_57 dim 1 : vector<32x256xf32>, i32 -> vector<32x256xf32>
    %c5_58 = arith.constant 5 : index
    %c0_59 = arith.constant 0 : index
    %c0_60 = arith.constant 0 : index
    %76 = vector.load %arg4[%c5_58, %c0_59, %c0_60] : memref<9x32x32xf32, #tpu.memory_space<vmem>>, vector<1x32x32xf32>
    %77 = vector.shape_cast %76 : vector<1x32x32xf32> to vector<32x32xf32>
    %cst_61 = arith.constant dense<0.000000e+00> : vector<32x256xf32>
    %78 = tpu.matmul %77, %75, %cst_61 {dimension_numbers = #tpu.dot_dimension_numbers<[1], [0], [0], [1], [0, 0, 1, 1], [], []>} : vector<32x32xf32>, vector<32x256xf32>, vector<32x256xf32> -> vector<32x256xf32>
    %79 = arith.addf %74, %78 : vector<32x256xf32>
    %c224_i32_62 = arith.constant 224 : i32
    %80 = tpu.dynamic_rotate %51 by %c224_i32_62 dim 1 : vector<32x256xf32>, i32 -> vector<32x256xf32>
    %c6_63 = arith.constant 6 : index
    %c0_64 = arith.constant 0 : index
    %c0_65 = arith.constant 0 : index
    %81 = vector.load %arg4[%c6_63, %c0_64, %c0_65] : memref<9x32x32xf32, #tpu.memory_space<vmem>>, vector<1x32x32xf32>
    %82 = vector.shape_cast %81 : vector<1x32x32xf32> to vector<32x32xf32>
    %cst_66 = arith.constant dense<0.000000e+00> : vector<32x256xf32>
    %83 = tpu.matmul %82, %80, %cst_66 {dimension_numbers = #tpu.dot_dimension_numbers<[1], [0], [0], [1], [0, 0, 1, 1], [], []>} : vector<32x32xf32>, vector<32x256xf32>, vector<32x256xf32> -> vector<32x256xf32>
    %84 = arith.addf %79, %83 : vector<32x256xf32>
    %c223_i32_67 = arith.constant 223 : i32
    %85 = tpu.dynamic_rotate %51 by %c223_i32_67 dim 1 : vector<32x256xf32>, i32 -> vector<32x256xf32>
    %c7_68 = arith.constant 7 : index
    %c0_69 = arith.constant 0 : index
    %c0_70 = arith.constant 0 : index
    %86 = vector.load %arg4[%c7_68, %c0_69, %c0_70] : memref<9x32x32xf32, #tpu.memory_space<vmem>>, vector<1x32x32xf32>
    %87 = vector.shape_cast %86 : vector<1x32x32xf32> to vector<32x32xf32>
    %cst_71 = arith.constant dense<0.000000e+00> : vector<32x256xf32>
    %88 = tpu.matmul %87, %85, %cst_71 {dimension_numbers = #tpu.dot_dimension_numbers<[1], [0], [0], [1], [0, 0, 1, 1], [], []>} : vector<32x32xf32>, vector<32x256xf32>, vector<32x256xf32> -> vector<32x256xf32>
    %89 = arith.addf %84, %88 : vector<32x256xf32>
    %c222_i32_72 = arith.constant 222 : i32
    %90 = tpu.dynamic_rotate %51 by %c222_i32_72 dim 1 : vector<32x256xf32>, i32 -> vector<32x256xf32>
    %c8_73 = arith.constant 8 : index
    %c0_74 = arith.constant 0 : index
    %c0_75 = arith.constant 0 : index
    %91 = vector.load %arg4[%c8_73, %c0_74, %c0_75] : memref<9x32x32xf32, #tpu.memory_space<vmem>>, vector<1x32x32xf32>
    %92 = vector.shape_cast %91 : vector<1x32x32xf32> to vector<32x32xf32>
    %cst_76 = arith.constant dense<0.000000e+00> : vector<32x256xf32>
    %93 = tpu.matmul %92, %90, %cst_76 {dimension_numbers = #tpu.dot_dimension_numbers<[1], [0], [0], [1], [0, 0, 1, 1], [], []>} : vector<32x32xf32>, vector<32x256xf32>, vector<32x256xf32> -> vector<32x256xf32>
    %94 = arith.addf %89, %93 : vector<32x256xf32>
    %c0_77 = arith.constant 0 : index
    %c0_78 = arith.constant 0 : index
    %95 = vector.load %arg5[%c0_77, %c0_78] : memref<32x1xf32, #tpu.memory_space<vmem>>, vector<32x1xf32>
    %96 = vector.broadcast %95 : vector<32x1xf32> to vector<32x256xf32>
    %97 = arith.addf %94, %96 : vector<32x256xf32>
    %c0_79 = arith.constant 0 : index
    %c0_80 = arith.constant 0 : index
    %98 = vector.load %arg6[%c0_79, %c0_80] : memref<256x144xf32, #tpu.memory_space<vmem>>, vector<256x144xf32>
    %cst_81 = arith.constant dense<0.000000e+00> : vector<32x144xf32>
    %99 = tpu.matmul %97, %98, %cst_81 {dimension_numbers = #tpu.dot_dimension_numbers<[1], [0], [0], [1], [0, 0, 1, 1], [], []>} : vector<32x256xf32>, vector<256x144xf32>, vector<32x144xf32> -> vector<32x144xf32>
    %c0_82 = arith.constant 0 : index
    %c0_83 = arith.constant 0 : index
    %c0_84 = arith.constant 0 : index
    %100 = vector.load %arg7[%c0_82, %c0_83, %c0_84] : memref<2x32x144xf32, #tpu.memory_space<vmem>>, vector<1x32x144xf32>
    %101 = vector.shape_cast %100 : vector<1x32x144xf32> to vector<32x144xf32>
    %102 = vector.shape_cast %99 : vector<32x144xf32> to vector<1x32x144xf32>
    tpu.vector_store %arg7[%c0_82, %c0_83, %c0_84], %102 {strides = array<i32>} : memref<2x32x144xf32, #tpu.memory_space<vmem>>, vector<1x32x144xf32>,
    %c1_85 = arith.constant 1 : index
    %c0_86 = arith.constant 0 : index
    %c0_87 = arith.constant 0 : index
    %103 = vector.load %arg1[%c1_85, %c0_86, %c0_87] : memref<2x32x256xf32, #tpu.memory_space<vmem>>, vector<1x32x256xf32>
    %104 = vector.shape_cast %103 : vector<1x32x256xf32> to vector<32x256xf32>
    %cst_88 = arith.constant 0.000000e+00 : f32
    %105 = vector.broadcast %cst_88 : f32 to vector<32x256xf32>
    %106 = arith.maximumf %104, %105 : vector<32x256xf32>
    %c0_89 = arith.constant 0 : index
    %c0_90 = arith.constant 0 : index
    %c0_91 = arith.constant 0 : index
    %107 = vector.load %arg2[%c0_89, %c0_90, %c0_91] : memref<9x32x32xf32, #tpu.memory_space<vmem>>, vector<1x32x32xf32>
    %108 = vector.shape_cast %107 : vector<1x32x32xf32> to vector<32x32xf32>
    %cst_92 = arith.constant dense<0.000000e+00> : vector<32x256xf32>
    %109 = tpu.matmul %108, %106, %cst_92 {dimension_numbers = #tpu.dot_dimension_numbers<[1], [0], [0], [1], [0, 0, 1, 1], [], []>} : vector<32x32xf32>, vector<32x256xf32>, vector<32x256xf32> -> vector<32x256xf32>
    %c255_i32_93 = arith.constant 255 : i32
    %110 = tpu.dynamic_rotate %106 by %c255_i32_93 dim 1 : vector<32x256xf32>, i32 -> vector<32x256xf32>
    %c1_94 = arith.constant 1 : index
    %c0_95 = arith.constant 0 : index
    %c0_96 = arith.constant 0 : index
    %111 = vector.load %arg2[%c1_94, %c0_95, %c0_96] : memref<9x32x32xf32, #tpu.memory_space<vmem>>, vector<1x32x32xf32>
    %112 = vector.shape_cast %111 : vector<1x32x32xf32> to vector<32x32xf32>
    %cst_97 = arith.constant dense<0.000000e+00> : vector<32x256xf32>
    %113 = tpu.matmul %112, %110, %cst_97 {dimension_numbers = #tpu.dot_dimension_numbers<[1], [0], [0], [1], [0, 0, 1, 1], [], []>} : vector<32x32xf32>, vector<32x256xf32>, vector<32x256xf32> -> vector<32x256xf32>
    %114 = arith.addf %109, %113 : vector<32x256xf32>
    %c254_i32_98 = arith.constant 254 : i32
    %115 = tpu.dynamic_rotate %106 by %c254_i32_98 dim 1 : vector<32x256xf32>, i32 -> vector<32x256xf32>
    %c2_99 = arith.constant 2 : index
    %c0_100 = arith.constant 0 : index
    %c0_101 = arith.constant 0 : index
    %116 = vector.load %arg2[%c2_99, %c0_100, %c0_101] : memref<9x32x32xf32, #tpu.memory_space<vmem>>, vector<1x32x32xf32>
    %117 = vector.shape_cast %116 : vector<1x32x32xf32> to vector<32x32xf32>
    %cst_102 = arith.constant dense<0.000000e+00> : vector<32x256xf32>
    %118 = tpu.matmul %117, %115, %cst_102 {dimension_numbers = #tpu.dot_dimension_numbers<[1], [0], [0], [1], [0, 0, 1, 1], [], []>} : vector<32x32xf32>, vector<32x256xf32>, vector<32x256xf32> -> vector<32x256xf32>
    %119 = arith.addf %114, %118 : vector<32x256xf32>
    %c240_i32_103 = arith.constant 240 : i32
    %120 = tpu.dynamic_rotate %106 by %c240_i32_103 dim 1 : vector<32x256xf32>, i32 -> vector<32x256xf32>
    %c3_104 = arith.constant 3 : index
    %c0_105 = arith.constant 0 : index
    %c0_106 = arith.constant 0 : index
    %121 = vector.load %arg2[%c3_104, %c0_105, %c0_106] : memref<9x32x32xf32, #tpu.memory_space<vmem>>, vector<1x32x32xf32>
    %122 = vector.shape_cast %121 : vector<1x32x32xf32> to vector<32x32xf32>
    %cst_107 = arith.constant dense<0.000000e+00> : vector<32x256xf32>
    %123 = tpu.matmul %122, %120, %cst_107 {dimension_numbers = #tpu.dot_dimension_numbers<[1], [0], [0], [1], [0, 0, 1, 1], [], []>} : vector<32x32xf32>, vector<32x256xf32>, vector<32x256xf32> -> vector<32x256xf32>
    %124 = arith.addf %119, %123 : vector<32x256xf32>
    %c239_i32_108 = arith.constant 239 : i32
    %125 = tpu.dynamic_rotate %106 by %c239_i32_108 dim 1 : vector<32x256xf32>, i32 -> vector<32x256xf32>
    %c4_109 = arith.constant 4 : index
    %c0_110 = arith.constant 0 : index
    %c0_111 = arith.constant 0 : index
    %126 = vector.load %arg2[%c4_109, %c0_110, %c0_111] : memref<9x32x32xf32, #tpu.memory_space<vmem>>, vector<1x32x32xf32>
    %127 = vector.shape_cast %126 : vector<1x32x32xf32> to vector<32x32xf32>
    %cst_112 = arith.constant dense<0.000000e+00> : vector<32x256xf32>
    %128 = tpu.matmul %127, %125, %cst_112 {dimension_numbers = #tpu.dot_dimension_numbers<[1], [0], [0], [1], [0, 0, 1, 1], [], []>} : vector<32x32xf32>, vector<32x256xf32>, vector<32x256xf32> -> vector<32x256xf32>
    %129 = arith.addf %124, %128 : vector<32x256xf32>
    %c238_i32_113 = arith.constant 238 : i32
    %130 = tpu.dynamic_rotate %106 by %c238_i32_113 dim 1 : vector<32x256xf32>, i32 -> vector<32x256xf32>
    %c5_114 = arith.constant 5 : index
    %c0_115 = arith.constant 0 : index
    %c0_116 = arith.constant 0 : index
    %131 = vector.load %arg2[%c5_114, %c0_115, %c0_116] : memref<9x32x32xf32, #tpu.memory_space<vmem>>, vector<1x32x32xf32>
    %132 = vector.shape_cast %131 : vector<1x32x32xf32> to vector<32x32xf32>
    %cst_117 = arith.constant dense<0.000000e+00> : vector<32x256xf32>
    %133 = tpu.matmul %132, %130, %cst_117 {dimension_numbers = #tpu.dot_dimension_numbers<[1], [0], [0], [1], [0, 0, 1, 1], [], []>} : vector<32x32xf32>, vector<32x256xf32>, vector<32x256xf32> -> vector<32x256xf32>
    %134 = arith.addf %129, %133 : vector<32x256xf32>
    %c224_i32_118 = arith.constant 224 : i32
    %135 = tpu.dynamic_rotate %106 by %c224_i32_118 dim 1 : vector<32x256xf32>, i32 -> vector<32x256xf32>
    %c6_119 = arith.constant 6 : index
    %c0_120 = arith.constant 0 : index
    %c0_121 = arith.constant 0 : index
    %136 = vector.load %arg2[%c6_119, %c0_120, %c0_121] : memref<9x32x32xf32, #tpu.memory_space<vmem>>, vector<1x32x32xf32>
    %137 = vector.shape_cast %136 : vector<1x32x32xf32> to vector<32x32xf32>
    %cst_122 = arith.constant dense<0.000000e+00> : vector<32x256xf32>
    %138 = tpu.matmul %137, %135, %cst_122 {dimension_numbers = #tpu.dot_dimension_numbers<[1], [0], [0], [1], [0, 0, 1, 1], [], []>} : vector<32x32xf32>, vector<32x256xf32>, vector<32x256xf32> -> vector<32x256xf32>
    %139 = arith.addf %134, %138 : vector<32x256xf32>
    %c223_i32_123 = arith.constant 223 : i32
    %140 = tpu.dynamic_rotate %106 by %c223_i32_123 dim 1 : vector<32x256xf32>, i32 -> vector<32x256xf32>
    %c7_124 = arith.constant 7 : index
    %c0_125 = arith.constant 0 : index
    %c0_126 = arith.constant 0 : index
    %141 = vector.load %arg2[%c7_124, %c0_125, %c0_126] : memref<9x32x32xf32, #tpu.memory_space<vmem>>, vector<1x32x32xf32>
    %142 = vector.shape_cast %141 : vector<1x32x32xf32> to vector<32x32xf32>
    %cst_127 = arith.constant dense<0.000000e+00> : vector<32x256xf32>
    %143 = tpu.matmul %142, %140, %cst_127 {dimension_numbers = #tpu.dot_dimension_numbers<[1], [0], [0], [1], [0, 0, 1, 1], [], []>} : vector<32x32xf32>, vector<32x256xf32>, vector<32x256xf32> -> vector<32x256xf32>
    %144 = arith.addf %139, %143 : vector<32x256xf32>
    %c222_i32_128 = arith.constant 222 : i32
    %145 = tpu.dynamic_rotate %106 by %c222_i32_128 dim 1 : vector<32x256xf32>, i32 -> vector<32x256xf32>
    %c8_129 = arith.constant 8 : index
    %c0_130 = arith.constant 0 : index
    %c0_131 = arith.constant 0 : index
    %146 = vector.load %arg2[%c8_129, %c0_130, %c0_131] : memref<9x32x32xf32, #tpu.memory_space<vmem>>, vector<1x32x32xf32>
    %147 = vector.shape_cast %146 : vector<1x32x32xf32> to vector<32x32xf32>
    %cst_132 = arith.constant dense<0.000000e+00> : vector<32x256xf32>
    %148 = tpu.matmul %147, %145, %cst_132 {dimension_numbers = #tpu.dot_dimension_numbers<[1], [0], [0], [1], [0, 0, 1, 1], [], []>} : vector<32x32xf32>, vector<32x256xf32>, vector<32x256xf32> -> vector<32x256xf32>
    %149 = arith.addf %144, %148 : vector<32x256xf32>
    %c0_133 = arith.constant 0 : index
    %c0_134 = arith.constant 0 : index
    %150 = vector.load %arg3[%c0_133, %c0_134] : memref<32x1xf32, #tpu.memory_space<vmem>>, vector<32x1xf32>
    %151 = vector.broadcast %150 : vector<32x1xf32> to vector<32x256xf32>
    %152 = arith.addf %149, %151 : vector<32x256xf32>
    %cst_135 = arith.constant 0.000000e+00 : f32
    %153 = vector.broadcast %cst_135 : f32 to vector<32x256xf32>
    %154 = arith.maximumf %152, %153 : vector<32x256xf32>
    %c0_136 = arith.constant 0 : index
    %c0_137 = arith.constant 0 : index
    %c0_138 = arith.constant 0 : index
    %155 = vector.load %arg4[%c0_136, %c0_137, %c0_138] : memref<9x32x32xf32, #tpu.memory_space<vmem>>, vector<1x32x32xf32>
    %156 = vector.shape_cast %155 : vector<1x32x32xf32> to vector<32x32xf32>
    %cst_139 = arith.constant dense<0.000000e+00> : vector<32x256xf32>
    %157 = tpu.matmul %156, %154, %cst_139 {dimension_numbers = #tpu.dot_dimension_numbers<[1], [0], [0], [1], [0, 0, 1, 1], [], []>} : vector<32x32xf32>, vector<32x256xf32>, vector<32x256xf32> -> vector<32x256xf32>
    %c255_i32_140 = arith.constant 255 : i32
    %158 = tpu.dynamic_rotate %154 by %c255_i32_140 dim 1 : vector<32x256xf32>, i32 -> vector<32x256xf32>
    %c1_141 = arith.constant 1 : index
    %c0_142 = arith.constant 0 : index
    %c0_143 = arith.constant 0 : index
    %159 = vector.load %arg4[%c1_141, %c0_142, %c0_143] : memref<9x32x32xf32, #tpu.memory_space<vmem>>, vector<1x32x32xf32>
    %160 = vector.shape_cast %159 : vector<1x32x32xf32> to vector<32x32xf32>
    %cst_144 = arith.constant dense<0.000000e+00> : vector<32x256xf32>
    %161 = tpu.matmul %160, %158, %cst_144 {dimension_numbers = #tpu.dot_dimension_numbers<[1], [0], [0], [1], [0, 0, 1, 1], [], []>} : vector<32x32xf32>, vector<32x256xf32>, vector<32x256xf32> -> vector<32x256xf32>
    %162 = arith.addf %157, %161 : vector<32x256xf32>
    %c254_i32_145 = arith.constant 254 : i32
    %163 = tpu.dynamic_rotate %154 by %c254_i32_145 dim 1 : vector<32x256xf32>, i32 -> vector<32x256xf32>
    %c2_146 = arith.constant 2 : index
    %c0_147 = arith.constant 0 : index
    %c0_148 = arith.constant 0 : index
    %164 = vector.load %arg4[%c2_146, %c0_147, %c0_148] : memref<9x32x32xf32, #tpu.memory_space<vmem>>, vector<1x32x32xf32>
    %165 = vector.shape_cast %164 : vector<1x32x32xf32> to vector<32x32xf32>
    %cst_149 = arith.constant dense<0.000000e+00> : vector<32x256xf32>
    %166 = tpu.matmul %165, %163, %cst_149 {dimension_numbers = #tpu.dot_dimension_numbers<[1], [0], [0], [1], [0, 0, 1, 1], [], []>} : vector<32x32xf32>, vector<32x256xf32>, vector<32x256xf32> -> vector<32x256xf32>
    %167 = arith.addf %162, %166 : vector<32x256xf32>
    %c240_i32_150 = arith.constant 240 : i32
    %168 = tpu.dynamic_rotate %154 by %c240_i32_150 dim 1 : vector<32x256xf32>, i32 -> vector<32x256xf32>
    %c3_151 = arith.constant 3 : index
    %c0_152 = arith.constant 0 : index
    %c0_153 = arith.constant 0 : index
    %169 = vector.load %arg4[%c3_151, %c0_152, %c0_153] : memref<9x32x32xf32, #tpu.memory_space<vmem>>, vector<1x32x32xf32>
    %170 = vector.shape_cast %169 : vector<1x32x32xf32> to vector<32x32xf32>
    %cst_154 = arith.constant dense<0.000000e+00> : vector<32x256xf32>
    %171 = tpu.matmul %170, %168, %cst_154 {dimension_numbers = #tpu.dot_dimension_numbers<[1], [0], [0], [1], [0, 0, 1, 1], [], []>} : vector<32x32xf32>, vector<32x256xf32>, vector<32x256xf32> -> vector<32x256xf32>
    %172 = arith.addf %167, %171 : vector<32x256xf32>
    %c239_i32_155 = arith.constant 239 : i32
    %173 = tpu.dynamic_rotate %154 by %c239_i32_155 dim 1 : vector<32x256xf32>, i32 -> vector<32x256xf32>
    %c4_156 = arith.constant 4 : index
    %c0_157 = arith.constant 0 : index
    %c0_158 = arith.constant 0 : index
    %174 = vector.load %arg4[%c4_156, %c0_157, %c0_158] : memref<9x32x32xf32, #tpu.memory_space<vmem>>, vector<1x32x32xf32>
    %175 = vector.shape_cast %174 : vector<1x32x32xf32> to vector<32x32xf32>
    %cst_159 = arith.constant dense<0.000000e+00> : vector<32x256xf32>
    %176 = tpu.matmul %175, %173, %cst_159 {dimension_numbers = #tpu.dot_dimension_numbers<[1], [0], [0], [1], [0, 0, 1, 1], [], []>} : vector<32x32xf32>, vector<32x256xf32>, vector<32x256xf32> -> vector<32x256xf32>
    %177 = arith.addf %172, %176 : vector<32x256xf32>
    %c238_i32_160 = arith.constant 238 : i32
    %178 = tpu.dynamic_rotate %154 by %c238_i32_160 dim 1 : vector<32x256xf32>, i32 -> vector<32x256xf32>
    %c5_161 = arith.constant 5 : index
    %c0_162 = arith.constant 0 : index
    %c0_163 = arith.constant 0 : index
    %179 = vector.load %arg4[%c5_161, %c0_162, %c0_163] : memref<9x32x32xf32, #tpu.memory_space<vmem>>, vector<1x32x32xf32>
    %180 = vector.shape_cast %179 : vector<1x32x32xf32> to vector<32x32xf32>
    %cst_164 = arith.constant dense<0.000000e+00> : vector<32x256xf32>
    %181 = tpu.matmul %180, %178, %cst_164 {dimension_numbers = #tpu.dot_dimension_numbers<[1], [0], [0], [1], [0, 0, 1, 1], [], []>} : vector<32x32xf32>, vector<32x256xf32>, vector<32x256xf32> -> vector<32x256xf32>
    %182 = arith.addf %177, %181 : vector<32x256xf32>
    %c224_i32_165 = arith.constant 224 : i32
    %183 = tpu.dynamic_rotate %154 by %c224_i32_165 dim 1 : vector<32x256xf32>, i32 -> vector<32x256xf32>
    %c6_166 = arith.constant 6 : index
    %c0_167 = arith.constant 0 : index
    %c0_168 = arith.constant 0 : index
    %184 = vector.load %arg4[%c6_166, %c0_167, %c0_168] : memref<9x32x32xf32, #tpu.memory_space<vmem>>, vector<1x32x32xf32>
    %185 = vector.shape_cast %184 : vector<1x32x32xf32> to vector<32x32xf32>
    %cst_169 = arith.constant dense<0.000000e+00> : vector<32x256xf32>
    %186 = tpu.matmul %185, %183, %cst_169 {dimension_numbers = #tpu.dot_dimension_numbers<[1], [0], [0], [1], [0, 0, 1, 1], [], []>} : vector<32x32xf32>, vector<32x256xf32>, vector<32x256xf32> -> vector<32x256xf32>
    %187 = arith.addf %182, %186 : vector<32x256xf32>
    %c223_i32_170 = arith.constant 223 : i32
    %188 = tpu.dynamic_rotate %154 by %c223_i32_170 dim 1 : vector<32x256xf32>, i32 -> vector<32x256xf32>
    %c7_171 = arith.constant 7 : index
    %c0_172 = arith.constant 0 : index
    %c0_173 = arith.constant 0 : index
    %189 = vector.load %arg4[%c7_171, %c0_172, %c0_173] : memref<9x32x32xf32, #tpu.memory_space<vmem>>, vector<1x32x32xf32>
    %190 = vector.shape_cast %189 : vector<1x32x32xf32> to vector<32x32xf32>
    %cst_174 = arith.constant dense<0.000000e+00> : vector<32x256xf32>
    %191 = tpu.matmul %190, %188, %cst_174 {dimension_numbers = #tpu.dot_dimension_numbers<[1], [0], [0], [1], [0, 0, 1, 1], [], []>} : vector<32x32xf32>, vector<32x256xf32>, vector<32x256xf32> -> vector<32x256xf32>
    %192 = arith.addf %187, %191 : vector<32x256xf32>
    %c222_i32_175 = arith.constant 222 : i32
    %193 = tpu.dynamic_rotate %154 by %c222_i32_175 dim 1 : vector<32x256xf32>, i32 -> vector<32x256xf32>
    %c8_176 = arith.constant 8 : index
    %c0_177 = arith.constant 0 : index
    %c0_178 = arith.constant 0 : index
    %194 = vector.load %arg4[%c8_176, %c0_177, %c0_178] : memref<9x32x32xf32, #tpu.memory_space<vmem>>, vector<1x32x32xf32>
    %195 = vector.shape_cast %194 : vector<1x32x32xf32> to vector<32x32xf32>
    %cst_179 = arith.constant dense<0.000000e+00> : vector<32x256xf32>
    %196 = tpu.matmul %195, %193, %cst_179 {dimension_numbers = #tpu.dot_dimension_numbers<[1], [0], [0], [1], [0, 0, 1, 1], [], []>} : vector<32x32xf32>, vector<32x256xf32>, vector<32x256xf32> -> vector<32x256xf32>
    %197 = arith.addf %192, %196 : vector<32x256xf32>
    %c0_180 = arith.constant 0 : index
    %c0_181 = arith.constant 0 : index
    %198 = vector.load %arg5[%c0_180, %c0_181] : memref<32x1xf32, #tpu.memory_space<vmem>>, vector<32x1xf32>
    %199 = vector.broadcast %198 : vector<32x1xf32> to vector<32x256xf32>
    %200 = arith.addf %197, %199 : vector<32x256xf32>
    %c0_182 = arith.constant 0 : index
    %c0_183 = arith.constant 0 : index
    %201 = vector.load %arg6[%c0_182, %c0_183] : memref<256x144xf32, #tpu.memory_space<vmem>>, vector<256x144xf32>
    %cst_184 = arith.constant dense<0.000000e+00> : vector<32x144xf32>
    %202 = tpu.matmul %200, %201, %cst_184 {dimension_numbers = #tpu.dot_dimension_numbers<[1], [0], [0], [1], [0, 0, 1, 1], [], []>} : vector<32x256xf32>, vector<256x144xf32>, vector<32x144xf32> -> vector<32x144xf32>
    %c1_185 = arith.constant 1 : index
    %c0_186 = arith.constant 0 : index
    %c0_187 = arith.constant 0 : index
    %203 = vector.load %arg7[%c1_185, %c0_186, %c0_187] : memref<2x32x144xf32, #tpu.memory_space<vmem>>, vector<1x32x144xf32>
    %204 = vector.shape_cast %203 : vector<1x32x144xf32> to vector<32x144xf32>
    %205 = vector.shape_cast %202 : vector<32x144xf32> to vector<1x32x144xf32>
    tpu.vector_store %arg7[%c1_185, %c0_186, %c0_187], %205 {strides = array<i32>} : memref<2x32x144xf32, #tpu.memory_space<vmem>>, vector<1x32x144xf32>,
    return
  }
  func.func @transform_0(%arg0: i32) -> (i32, i32, i32) {
    %c0_i32 = arith.constant 0 : i32
    %c0_i32_0 = arith.constant 0 : i32
    %c0_i32_1 = arith.constant 0 : i32
    return %arg0, %c0_i32, %c0_i32_0 : i32, i32, i32
  }
  func.func @transform_1(%arg0: i32) -> (i32, i32, i32) {
    %c0_i32 = arith.constant 0 : i32
    %c0_i32_0 = arith.constant 0 : i32
    %c0_i32_1 = arith.constant 0 : i32
    %c0_i32_2 = arith.constant 0 : i32
    return %c0_i32, %c0_i32_0, %c0_i32_1 : i32, i32, i32
  }
  func.func @transform_2(%arg0: i32) -> (i32, i32) {
    %c0_i32 = arith.constant 0 : i32
    %c0_i32_0 = arith.constant 0 : i32
    %c0_i32_1 = arith.constant 0 : i32
    return %c0_i32, %c0_i32_0 : i32, i32
  }
  func.func @transform_3(%arg0: i32) -> (i32, i32, i32) {
    %c0_i32 = arith.constant 0 : i32
    %c0_i32_0 = arith.constant 0 : i32
    %c0_i32_1 = arith.constant 0 : i32
    %c0_i32_2 = arith.constant 0 : i32
    return %c0_i32, %c0_i32_0, %c0_i32_1 : i32, i32, i32
  }
  func.func @transform_4(%arg0: i32) -> (i32, i32) {
    %c0_i32 = arith.constant 0 : i32
    %c0_i32_0 = arith.constant 0 : i32
    %c0_i32_1 = arith.constant 0 : i32
    return %c0_i32, %c0_i32_0 : i32, i32
  }
  func.func @transform_5(%arg0: i32) -> (i32, i32) {
    %c0_i32 = arith.constant 0 : i32
    %c0_i32_0 = arith.constant 0 : i32
    %c0_i32_1 = arith.constant 0 : i32
    return %c0_i32, %c0_i32_0 : i32, i32
  }
  func.func @transform_6(%arg0: i32) -> (i32, i32, i32) {
    %c0_i32 = arith.constant 0 : i32
    %c0_i32_0 = arith.constant 0 : i32
    %c0_i32_1 = arith.constant 0 : i32
    return %arg0, %c0_i32, %c0_i32_0 : i32, i32, i32
  }
}

</mosaic_0001>

<bundles_post_ra>
// kernel: forward.1
= control target key start
LH: loop header
LB: loop body
LE: loop exit
PB: predicated region body
PF: predicated region fallthrough
CT: control target
= control target key end

     0   :  { %11 = vsyncpa [#allocation3], 0  ;;  %s8644_s0 = inlined_call_operand.vmem [shape: f32[2,32,256], index: 0, kind: input, shape index: {}]   ;;  %s8645_s1 = inlined_call_operand.hbm [shape: f32[9,32,32], index: 1, kind: input, shape index: {}]   ;;  %s8646_s2 = inlined_call_operand.vmem [shape: f32[32,1], index: 2, kind: input, shape index: {}]   ;;  %s8647_s3 = inlined_call_operand.hbm [shape: f32[9,32,32], index: 3, kind: input, shape index: {}]   ;;  %s8648_s4 = inlined_call_operand.vmem [shape: f32[32,1], index: 4, kind: input, shape index: {}]   ;;  %s8649_s5 = inlined_call_operand.vmem [shape: f32[256,144], index: 5, kind: input, shape index: {}]   ;;  %s8650_s6 = inlined_call_operand.vmem [shape: f32[2,32,144], index: 6, kind: output, shape index: {}]  }
   0x1   :  { %12 = vsyncpa [#allocation5], 0  ;;  %s6893_s21 = smov [#allocation2]   ;;  %s6845_s25 = scalar_lea.hbm %s8645_s1, 4608 }
   0x2   :  { %s20_s22 = sshll.u32 %s6893_s21, 4  ;;  %p6846_p0 = scmp.ne.s32.totalorder %s8645_s1, %s6845_s25  ;;  %s21_s22 = int_to_ptr.vmem [resolvable:$true] %s20_s22 }
   0x3   :  { %p6849_p1 = scmp.lt.u32.totalorder %s6845_s25, %s8645_s1 }
   0x5   :  { %p6851_p2 = pnand %p6849_p1, %p6846_p0 }
   0x7   :  { %6854 = shalt.err (!%p6851_p2)
}
   0x8   :  { %s6855_s30 = scalar_lea.vmem %s21_s22, 4608  ;;  %p6860_p4 = scmp.lt.s32.totalorder %s21_s22, %s21_s22 }
   0x9   :  { %p6856_p3 = scmp.ne.s32.totalorder %s21_s22, %s6855_s30  ;;  %p6861_p5 = scmp.lt.s32.totalorder %s6855_s30, %s6855_s30 }
   0xb   :  { %p6862_p6 = por %p6861_p5, %p6860_p4 }
   0xd   :  { %p6863_p7 = pnand %p6862_p6, %p6856_p3 }
   0xf   :  { %6866 = shalt.err (!%p6863_p7)
}
  0x10   :  { %s6894_s7 = smov 128   ;;  %s6895_s8 = smov 8  }
  0x11   :  { %26 = dma.hbm_to_vmem [thread:$0]  %s8645_s1, 4608, %s21_s22, [#allocation3], %s6894_s7, %s6894_s7, %s6895_s8  }
  0x12   :  { %s6896_s11 = smov [#allocation4]   ;;  %s6867_s15 = scalar_lea.hbm %s8647_s3, 4608 }
  0x13   :  { %s34_s12 = sshll.u32 %s6896_s11, 4  ;;  %p6868_p8 = scmp.ne.s32.totalorder %s8647_s3, %s6867_s15  ;;  %s35_s12 = int_to_ptr.vmem [resolvable:$true] %s34_s12 }
  0x14   :  { %p6871_p9 = scmp.lt.u32.totalorder %s6867_s15, %s8647_s3 }
  0x16   :  { %p6873_p10 = pnand %p6871_p9, %p6868_p8 }
  0x18   :  { %6876 = shalt.err (!%p6873_p10)
}
  0x19   :  { %s6877_s20 = scalar_lea.vmem %s35_s12, 4608  ;;  %p6882_p12 = scmp.lt.s32.totalorder %s35_s12, %s35_s12 }
  0x1a   :  { %p6878_p11 = scmp.ne.s32.totalorder %s35_s12, %s6877_s20  ;;  %p6883_p13 = scmp.lt.s32.totalorder %s6877_s20, %s6877_s20 }
  0x1c   :  { %p6884_p0 = por %p6883_p13, %p6882_p12 }
  0x1e   :  { %p6885_p1 = pnand %p6884_p0, %p6878_p11 }
  0x20   :  { %6888 = shalt.err (!%p6885_p1)
}
  0x21   :  { %40 = dma.hbm_to_vmem [thread:$0]  %s8647_s3, 4608, %s35_s12, [#allocation5], %s6894_s7, %s6894_s7, %s6895_s8  }
  0x22   :  { %6889 = dma.done.wait [#allocation3], 4608  }
  0x23   :  { %6890 = vsyncadd [#allocation3], 4294962688 }
  0x24   :  { %6891 = dma.done.wait [#allocation5], 4608  }
  0x25   :  { %6892 = vsyncadd [#allocation5], 4294962688  ;;  %v55_v0 = vld [vmem:[%s8644_s0 + $0x20] sm:$0xff]  ;;  %v57_v1 = vld [vmem:[%s8644_s0 + $0x30] sm:$0xff]  ;;  %s6897_s13 = smov 127   ;;  %v6898_v20 = vmov 0.0   ;;  %v87_v25 = vlaneseq }
  0x26   :  { %v51_v2 = vld [vmem:[%s8644_s0] sm:$0xff]  ;;  %v63_v3 = vmax.f32 %v55_v0, 0.0  ;;  %v65_v4 = vmax.f32 %v57_v1, 0.0  ;;  %v53_v5 = vld [vmem:[%s8644_s0 + $0x10] sm:$0xff]  ;;  %v56_v7 = vld [vmem:[%s8644_s0 + $0x28] sm:$0xff]  ;;  %180 = vmatprep.mubr.f32.mxu0 %v6898_v20  ;;  %1428 = vmatprep.mubr.f32.mxu1 %v6898_v20  ;;  %s6899_s14 = smov 126  }
  0x27   :  { %v59_v6 = vmax.f32 %v51_v2, 0.0  ;;  %v58_v8 = vld [vmem:[%s8644_s0 + $0x38] sm:$0xff]  ;;  %v61_v9 = vmax.f32 %v53_v5, 0.0  ;;  %v64_v10 = vmax.f32 %v56_v7, 0.0  ;;  %v52_v12 = vld [vmem:[%s8644_s0 + $0x8] sm:$0xff]  ;;  %s6900_s15 = smov 112  }
  0x28   :  { %v66_v11 = vmax.f32 %v58_v8, 0.0  ;;  %v54_v13 = vld [vmem:[%s8644_s0 + $0x18] sm:$0xff]  ;;  %v6213_v14 = vpack.i.bf16 %v65_v4, %v63_v3  ;;  %v60_v15 = vmax.f32 %v52_v12, 0.0  ;;  %v7007_v24 = vpack.c.bf16 %v65_v4, %v63_v3  ;;  %s6901_s16 = smov 111   ;;  %s6902_s17 = smov 110   ;;  %v99_v57 = vld [vmem:[#allocation2 + $0x20] sm:$0xff] }
  0x29   :  { %v62_v16 = vmax.f32 %v54_v13, 0.0  ;;  %v6203_v17 = vpack.i.bf16 %v61_v9, %v59_v6  ;;  %v7000_v22 = vpack.c.bf16 %v61_v9, %v59_v6  ;;  %s6903_s18 = smov 96   ;;  %s6904_s19 = smov 95   ;;  %v7032_v27 = vand.u32 127, %v87_v25  ;;  %v100_v60 = vld [vmem:[#allocation2 + $0x28] sm:$0xff]  ;;  %v101_v0 = vld [vmem:[#allocation2 + $0x30] sm:$0xff] }
  0x2a   :  { %6214 = vrot.lane.b32.xlu1 %v6213_v14, %s6897_s13  ;;  %v6218_v18 = vpack.i.bf16 %v66_v11, %v64_v10  ;;  %v7004_v23 = vpack.c.bf16 %v66_v11, %v64_v10  ;;  %s6905_s20 = smov 94   ;;  %vm103_vm2 = vcmask 261120   ;;  %v102_v7 = vld [vmem:[#allocation2 + $0x38] sm:$0xff]  ;;  %vm2706_vm9 = vcmask 130048  }
  0x2b   :  { %6204 = vrot.lane.b32.xlu0 %v6203_v17, %s6897_s13  ;;  %v6208_v19 = vpack.i.bf16 %v62_v16, %v60_v15  ;;  %v6998_v21 = vpack.c.bf16 %v62_v16, %v60_v15  ;;  %vm89_vm0 = vcmp.lt.s32.totalorder %v7032_v27, 127  ;;  %vm322_vm1 = vcmp.lt.s32.totalorder %v7032_v27, 126  ;;  %v7079_v16 = vld [vmem:[%s8646_s2] sm:$0xff] }
  0x2c   :  { %vm461_vm3 = vcmp.lt.s32.totalorder %v7032_v27, 112  ;;  %vm600_vm4 = vcmp.lt.s32.totalorder %v7032_v27, 111  ;;  %vm739_vm5 = vcmp.lt.s32.totalorder %v7032_v27, 110  ;;  %vm878_vm6 = vcmp.lt.s32.totalorder %v7032_v27, 96 }
  0x2d   :  { %vm1017_vm7 = vcmp.lt.s32.totalorder %v7032_v27, 95  ;;  %vm1156_vm8 = vcmp.lt.s32.totalorder %v7032_v27, 94  ;;  %v4910_v27 = vld [vmem:[#allocation4 + $0xf8] sm:$0xff] }
  0x2e   :  { %6219 = vrot.lane.b32.xlu1 %v6218_v18, %s6897_s13 }
  0x2f   :  { %6209 = vrot.lane.b32.xlu0 %v6208_v19, %s6897_s13 }
  0x32   :  { %6229 = vrot.lane.b32.xlu1 %v6208_v19, %s6899_s14 }
  0x33   :  { %6224 = vrot.lane.b32.xlu0 %v6203_v17, %s6899_s14 }
  0x36   :  { %6239 = vrot.lane.b32.xlu1 %v6218_v18, %s6899_s14 }
  0x37   :  { %6234 = vrot.lane.b32.xlu0 %v6213_v14, %s6899_s14 }
  0x3a   :  { %6249 = vrot.lane.b32.xlu1 %v6208_v19, %s6900_s15 }
  0x3b   :  { %6244 = vrot.lane.b32.xlu0 %v6203_v17, %s6900_s15 }
  0x3e   :  { %6259 = vrot.lane.b32.xlu1 %v6218_v18, %s6900_s15 }
  0x3f   :  { %6254 = vrot.lane.b32.xlu0 %v6213_v14, %s6900_s15 }
  0x42   :  { %6269 = vrot.lane.b32.xlu1 %v6208_v19, %s6901_s16 }
  0x43   :  { %6264 = vrot.lane.b32.xlu0 %v6203_v17, %s6901_s16 }
  0x46   :  { %6279 = vrot.lane.b32.xlu1 %v6218_v18, %s6901_s16 }
  0x47   :  { %6274 = vrot.lane.b32.xlu0 %v6213_v14, %s6901_s16 }
  0x4a   :  { %6289 = vrot.lane.b32.xlu1 %v6208_v19, %s6902_s17 }
  0x4b   :  { %6284 = vrot.lane.b32.xlu0 %v6203_v17, %s6902_s17 }
  0x4e   :  { %6299 = vrot.lane.b32.xlu1 %v6218_v18, %s6902_s17 }
  0x4f   :  { %6294 = vrot.lane.b32.xlu0 %v6213_v14, %s6902_s17 }
  0x52   :  { %6309 = vrot.lane.b32.xlu1 %v6208_v19, %s6903_s18 }
  0x53   :  { %6304 = vrot.lane.b32.xlu0 %v6203_v17, %s6903_s18 }
  0x56   :  { %6319 = vrot.lane.b32.xlu1 %v6218_v18, %s6903_s18 }
  0x57   :  { %6314 = vrot.lane.b32.xlu0 %v6213_v14, %s6903_s18 }
  0x5a   :  { %6329 = vrot.lane.b32.xlu1 %v6208_v19, %s6904_s19 }
  0x5b   :  { %6324 = vrot.lane.b32.xlu0 %v6203_v17, %s6904_s19 }
  0x5e   :  { %6339 = vrot.lane.b32.xlu1 %v6218_v18, %s6904_s19 }
  0x5f   :  { %6334 = vrot.lane.b32.xlu0 %v6213_v14, %s6904_s19 }
  0x62   :  { %6349 = vrot.lane.b32.xlu1 %v6208_v19, %s6905_s20 }
  0x63   :  { %6344 = vrot.lane.b32.xlu0 %v6203_v17, %s6905_s20  ;;  %v7084_v17 = vld [vmem:[%s8646_s2 + $0x8] sm:$0xff] }
  0x66   :  { %6359 = vrot.lane.b32.xlu1 %v6218_v18, %s6905_s20  ;;  %v67_v18 = vld [vmem:[#allocation2] sm:$0xff] }
  0x67   :  { %6354 = vrot.lane.b32.xlu0 %v6213_v14, %s6905_s20 }
  0x9c   :  { %v6215_v26 = vpop.permute.xlu1 %6214 }
  0x9d   :  { %v6205_v28 = vpop.permute.xlu0 %6204  ;;  %v6217_v29 = vunpack.i.h.bf16 %v6215_v26  ;;  %v6216_v30 = vunpack.i.l.bf16 %v6215_v26 }
  0x9e   :  { %v6207_v35 = vunpack.i.h.bf16 %v6205_v28  ;;  %v6206_v36 = vunpack.i.l.bf16 %v6205_v28  ;;  %v7101_v28 = vld [vmem:[%s8646_s2 + $0x10] sm:$0xff] }
  0xa0   :  { %v6220_v31 = vpop.permute.xlu1 %6219 }
  0xa1   :  { %v6222_v32 = vunpack.i.h.bf16 %v6220_v31  ;;  %v6221_v33 = vunpack.i.l.bf16 %v6220_v31  ;;  %v6210_v34 = vpop.permute.xlu0 %6209 }
  0xa2   :  { %v6212_v37 = vunpack.i.h.bf16 %v6210_v34  ;;  %v6211_v38 = vunpack.i.l.bf16 %v6210_v34 }
  0xa3   :  { %v96_v39 = vsel %vm89_vm0, %v6221_v33, %v6216_v30  ;;  %v97_v40 = vsel %vm89_vm0, %v6222_v32, %v6217_v29  ;;  %v92_v47 = vsel %vm89_vm0, %v6216_v30, %v6221_v33  ;;  %v93_v48 = vsel %vm89_vm0, %v6217_v29, %v6222_v32  ;;  %v7106_v29 = vld [vmem:[%s8646_s2 + $0x18] sm:$0xff]  ;;  %v68_v30 = vld [vmem:[#allocation2 + $0x8] sm:$0xff] }
  0xa4   :  { %v94_v41 = vsel %vm89_vm0, %v6211_v38, %v6206_v36  ;;  %v95_v42 = vsel %vm89_vm0, %v6212_v37, %v6207_v35  ;;  %v90_v43 = vsel %vm89_vm0, %v6206_v36, %v6211_v38  ;;  %v91_v44 = vsel %vm89_vm0, %v6207_v35, %v6212_v37  ;;  %v6230_v50 = vpop.permute.xlu1 %6229  ;;  %v69_v35 = vld [vmem:[#allocation2 + $0x10] sm:$0xff] }
  0xa5   :  { %v5517_v45 = vpack.c.bf16 %v95_v42, %v94_v41  ;;  %v5519_v46 = vpack.c.bf16 %v91_v44, %v90_v43  ;;  %v5521_v49 = vpack.c.bf16 %v97_v40, %v96_v39  ;;  %v6225_v51 = vpop.permute.xlu0 %6224  ;;  %v5523_v52 = vpack.c.bf16 %v93_v48, %v92_v47  ;;  %v70_v42 = vld [vmem:[#allocation2 + $0x18] sm:$0xff] }
  0xa6   :  { %v6232_v53 = vunpack.i.h.bf16 %v6230_v50  ;;  %v6231_v54 = vunpack.i.l.bf16 %v6230_v50  ;;  %v6227_v55 = vunpack.i.h.bf16 %v6225_v51  ;;  %v6226_v56 = vunpack.i.l.bf16 %v6225_v51  ;;  %v332_v51 = vld [vmem:[#allocation2 + $0x40] sm:$0xff] }
  0xa7   :  { %5518 = vmatprep.subr.bf16.mxu0 %v5517_v45 }
  0xa8   :  { %5520 = vmatpush1.bf16.msra.mxu0 %v5519_v46  ;;  %v327_v58 = vsel %vm322_vm1, %v6231_v54, %v6226_v56  ;;  %v328_v59 = vsel %vm322_vm1, %v6232_v53, %v6227_v55  ;;  %v6240_v62 = vpop.permute.xlu1 %6239  ;;  %v324_v8 = vsel %vm322_vm1, %v6227_v55, %v6232_v53  ;;  %v323_v9 = vsel %vm322_vm1, %v6226_v56, %v6231_v54 }
  0xa9   :  { %5522 = vmatprep.subr.bf16.mxu0 %v5521_v49  ;;  %v5533_v61 = vpack.c.bf16 %v328_v59, %v327_v58  ;;  %v6235_v63 = vpop.permute.xlu0 %6234  ;;  %v6242_v1 = vunpack.i.h.bf16 %v6240_v62  ;;  %v6241_v2 = vunpack.i.l.bf16 %v6240_v62  ;;  %v5535_v19 = vpack.c.bf16 %v324_v8, %v323_v9  ;;  %v333_v58 = vld [vmem:[#allocation2 + $0x48] sm:$0xff] }
  0xaa   :  { %v6237_v3 = vunpack.i.h.bf16 %v6235_v63  ;;  %v6236_v4 = vunpack.i.l.bf16 %v6235_v63  ;;  %v334_v63 = vld [vmem:[#allocation2 + $0x50] sm:$0xff] }
  0xac   :  { %5524 = vmatpush1.bf16.msra.mxu0 %v5523_v52  ;;  %v6250_v5 = vpop.permute.xlu1 %6249  ;;  %v329_v10 = vsel %vm322_vm1, %v6241_v2, %v6236_v4  ;;  %v330_v11 = vsel %vm322_vm1, %v6242_v1, %v6237_v3 }
  0xad   :  { %5526 = vmatprep.subr.bf16.mxu0 %v6998_v21  ;;  %v6245_v6 = vpop.permute.xlu0 %6244  ;;  %v6252_v12 = vunpack.i.h.bf16 %v6250_v5  ;;  %v6251_v13 = vunpack.i.l.bf16 %v6250_v5  ;;  %v326_v21 = vsel %vm322_vm1, %v6237_v3, %v6242_v1 }
  0xae   :  { %v6247_v14 = vunpack.i.h.bf16 %v6245_v6  ;;  %v6246_v15 = vunpack.i.l.bf16 %v6245_v6  ;;  %v335_v6 = vld [vmem:[#allocation2 + $0x58] sm:$0xff] }
  0xaf   :  { %5357 = vmatmul.mubr.msk.f32.vlgmr.msra.gmra.mrb[0].mxu0 %vm103_vm2, %v99_v57 }
  0xb0   :  { %186 = vmatprep.mubr.f32.mxu0 %v6898_v20  ;;  %5528 = vmatpush1.bf16.msra.mxu0 %v7000_v22  ;;  %v325_v22 = vsel %vm322_vm1, %v6236_v4, %v6241_v2  ;;  %v466_v25 = vsel %vm461_vm3, %v6251_v13, %v6246_v15  ;;  %v467_v26 = vsel %vm461_vm3, %v6252_v12, %v6247_v14  ;;  %v6260_v33 = vpop.permute.xlu1 %6259 }
  0xb1   :  { %5530 = vmatprep.subr.bf16.mxu0 %v7004_v23  ;;  %v5537_v23 = vpack.c.bf16 %v330_v11, %v329_v10  ;;  %v5539_v31 = vpack.c.bf16 %v326_v21, %v325_v22  ;;  %v5541_v32 = vpack.c.bf16 %v467_v26, %v466_v25  ;;  %v6255_v34 = vpop.permute.xlu0 %6254  ;;  %v6262_v36 = vunpack.i.h.bf16 %v6260_v33  ;;  %v472_v25 = vld [vmem:[#allocation2 + $0x68] sm:$0xff] }
  0xb2   :  { %v6261_v37 = vunpack.i.l.bf16 %v6260_v33  ;;  %v6257_v38 = vunpack.i.h.bf16 %v6255_v34  ;;  %v6256_v39 = vunpack.i.l.bf16 %v6255_v34  ;;  %v463_v43 = vsel %vm461_vm3, %v6247_v14, %v6252_v12  ;;  %v473_v33 = vld [vmem:[#allocation2 + $0x70] sm:$0xff] }
  0xb3   :  { %5358 = vmatmul.mubr.msk.f32.gmra.mrb[2].mxu0 %vm103_vm2, %v100_v60  ;;  %v462_v44 = vsel %vm461_vm3, %v6246_v15, %v6251_v13  ;;  %v471_v15 = vld [vmem:[#allocation2 + $0x60] sm:$0xff] }
  0xb4   :  { %192 = vmatprep.mubr.f32.mxu0 %v6898_v20  ;;  %5532 = vmatpush1.bf16.msra.mxu0 %v7007_v24  ;;  %v6906_v24 = vmov 0   ;;  %v6270_v40 = vpop.permute.xlu1 %6269  ;;  %v468_v45 = vsel %vm461_vm3, %v6261_v37, %v6256_v39  ;;  %v469_v46 = vsel %vm461_vm3, %v6262_v36, %v6257_v38  ;;  %v5543_v52 = vpack.c.bf16 %v463_v43, %v462_v44 }
  0xb5   :  { %5534 = vmatprep.subr.bf16.mxu0 %v5533_v61  ;;  %6363 = vset.pattern.permute.xlu0 %v6906_v24  ;;  %v6265_v41 = vpop.permute.xlu0 %6264  ;;  %v6272_v47 = vunpack.i.h.bf16 %v6270_v40  ;;  %v6271_v48 = vunpack.i.l.bf16 %v6270_v40  ;;  %v465_v53 = vsel %vm461_vm3, %v6257_v38, %v6262_v36  ;;  %v464_v54 = vsel %vm461_vm3, %v6256_v39, %v6261_v37  ;;  %v474_v40 = vld [vmem:[#allocation2 + $0x78] sm:$0xff] }
  0xb6   :  { %6364 = vset.pattern.permute.xlu1 %v6906_v24  ;;  %1285 = vperm.xlu0 %6363, %v7079_v16   ;;  %v6267_v49 = vunpack.i.h.bf16 %v6265_v41  ;;  %v6266_v50 = vunpack.i.l.bf16 %v6265_v41  ;;  %v5545_v55 = vpack.c.bf16 %v469_v46, %v468_v45  ;;  %v5547_v59 = vpack.c.bf16 %v465_v53, %v464_v54 }
  0xb7   :  { %5359 = vmatmul.mubr.msk.f32.gmra.mrb[4].mxu0 %vm103_vm2, %v101_v0  ;;  %1290 = vperm.xlu1 %6364, %v7084_v17  }
  0xb8   :  { %198 = vmatprep.mubr.f32.mxu0 %v6898_v20  ;;  %v605_v56 = vsel %vm600_vm4, %v6271_v48, %v6266_v50  ;;  %v606_v57 = vsel %vm600_vm4, %v6272_v47, %v6267_v49  ;;  %v6280_v61 = vpop.permute.xlu1 %6279  ;;  %v601_v8 = vsel %vm600_vm4, %v6266_v50, %v6271_v48 }
  0xb9   :  { %v5549_v60 = vpack.c.bf16 %v606_v57, %v605_v56  ;;  %v6275_v62 = vpop.permute.xlu0 %6274  ;;  %v6282_v0 = vunpack.i.h.bf16 %v6280_v61  ;;  %v6281_v1 = vunpack.i.l.bf16 %v6280_v61  ;;  %v611_v56 = vld [vmem:[#allocation2 + $0x88] sm:$0xff]  ;;  %v612_v61 = vld [vmem:[#allocation2 + $0x90] sm:$0xff] }
  0xba   :  { %1300 = vperm.xlu0 %6363, %v7106_v29   ;;  %v6277_v2 = vunpack.i.h.bf16 %v6275_v62  ;;  %v6276_v3 = vunpack.i.l.bf16 %v6275_v62 }
  0xbb   :  { %5360 = vmatmul.mubr.msk.f32.gmra.mrb[6].mxu0 %vm103_vm2, %v102_v7  ;;  %1295 = vperm.xlu1 %6364, %v7101_v28   ;;  %v602_v7 = vsel %vm600_vm4, %v6267_v49, %v6272_v47  ;;  %v610_v49 = vld [vmem:[#allocation2 + $0x80] sm:$0xff] }
  0xbc   :  { %281 = vmatprep.mubr.f32.mxu0 %v6898_v20  ;;  %v6290_v4 = vpop.permute.xlu1 %6289  ;;  %v607_v9 = vsel %vm600_vm4, %v6281_v1, %v6276_v3  ;;  %v608_v10 = vsel %vm600_vm4, %v6282_v0, %v6277_v2  ;;  %v603_v21 = vsel %vm600_vm4, %v6276_v3, %v6281_v1 }
  0xbd   :  { %v6285_v5 = vpop.permute.xlu0 %6284  ;;  %v6292_v11 = vunpack.i.h.bf16 %v6290_v4  ;;  %v6291_v12 = vunpack.i.l.bf16 %v6290_v4  ;;  %v5553_v22 = vpack.c.bf16 %v608_v10, %v607_v9  ;;  %v613_v4 = vld [vmem:[#allocation2 + $0x98] sm:$0xff] }
  0xbe   :  { %v6287_v13 = vunpack.i.h.bf16 %v6285_v5  ;;  %v6286_v14 = vunpack.i.l.bf16 %v6285_v5 }
  0xbf   :  { %5361 = vmatmul.mubr.msk.f32.vlgmr.msra.gmra.mrb[0].mxu0 %vm103_vm2, %v67_v18  ;;  %v5551_v18 = vpack.c.bf16 %v602_v7, %v601_v8 }
  0xc0   :  { %287 = vmatprep.mubr.f32.mxu0 %v6898_v20  ;;  %5536 = vmatpush1.bf16.msra.mxu0 %v5535_v19  ;;  %v604_v19 = vsel %vm600_vm4, %v6277_v2, %v6282_v0  ;;  %v745_v24 = vsel %vm739_vm5, %v6292_v11, %v6287_v13  ;;  %v741_v41 = vsel %vm739_vm5, %v6287_v13, %v6292_v11  ;;  %v749_v13 = vld [vmem:[#allocation2 + $0xa0] sm:$0xff] }
  0xc1   :  { %5538 = vmatprep.subr.bf16.mxu0 %v5537_v23  ;;  %v744_v23 = vsel %vm739_vm5, %v6291_v12, %v6286_v14  ;;  %v5555_v26 = vpack.c.bf16 %v604_v19, %v603_v21 }
  0xc3   :  { %5362 = vmatmul.mubr.msk.f32.gmra.mrb[2].mxu0 %vm103_vm2, %v68_v30  ;;  %v5557_v30 = vpack.c.bf16 %v745_v24, %v744_v23  ;;  %v750_v23 = vld [vmem:[#allocation2 + $0xa8] sm:$0xff] }
  0xc4   :  { %293 = vmatprep.mubr.f32.mxu0 %v6898_v20  ;;  %5540 = vmatpush1.bf16.msra.mxu0 %v5539_v31  ;;  %v6300_v31 = vpop.permute.xlu1 %6299 }
  0xc5   :  { %5542 = vmatprep.subr.bf16.mxu0 %v5541_v32  ;;  %v6295_v32 = vpop.permute.xlu0 %6294  ;;  %v6302_v34 = vunpack.i.h.bf16 %v6300_v31 }
  0xc6   :  { %v6297_v36 = vunpack.i.h.bf16 %v6295_v32  ;;  %v6296_v37 = vunpack.i.l.bf16 %v6295_v32 }
  0xc7   :  { %5363 = vmatmul.mubr.msk.f32.gmra.mrb[4].mxu0 %vm103_vm2, %v69_v35  ;;  %v6301_v35 = vunpack.i.l.bf16 %v6300_v31  ;;  %v751_v31 = vld [vmem:[#allocation2 + $0xb0] sm:$0xff] }
  0xc8   :  { %299 = vmatprep.mubr.f32.mxu0 %v6898_v20  ;;  %v6310_v38 = vpop.permute.xlu1 %6309  ;;  %v747_v44 = vsel %vm739_vm5, %v6302_v34, %v6297_v36 }
  0xc9   :  { %v6305_v39 = vpop.permute.xlu0 %6304  ;;  %v746_v43 = vsel %vm739_vm5, %v6301_v35, %v6296_v37  ;;  %v6312_v45 = vunpack.i.h.bf16 %v6310_v38  ;;  %v6311_v46 = vunpack.i.l.bf16 %v6310_v38  ;;  %v752_v38 = vld [vmem:[#allocation2 + $0xb8] sm:$0xff] }
  0xca   :  { %v6307_v47 = vunpack.i.h.bf16 %v6305_v39  ;;  %v6306_v48 = vunpack.i.l.bf16 %v6305_v39  ;;  %v5561_v53 = vpack.c.bf16 %v747_v44, %v746_v43 }
  0xcb   :  { %5364 = vmatmul.mubr.msk.f32.gmra.mrb[6].mxu0 %vm103_vm2, %v70_v42  ;;  %v740_v42 = vsel %vm739_vm5, %v6286_v14, %v6291_v12 }
  0xcc   :  { %412 = vmatprep.mubr.f32.mxu0 %v6898_v20  ;;  %v5559_v50 = vpack.c.bf16 %v741_v41, %v740_v42  ;;  %v883_v54 = vsel %vm878_vm6, %v6311_v46, %v6306_v48  ;;  %v880_v5 = vsel %vm878_vm6, %v6307_v47, %v6312_v45 }
  0xcf   :  { %5365 = vmatmul.mubr.msk.f32.vlgmr.msra.gmra.mrb[0].mxu0 %vm103_vm2, %v332_v51  ;;  %v743_v51 = vsel %vm739_vm5, %v6297_v36, %v6302_v34 }
  0xd0   :  { %418 = vmatprep.mubr.f32.mxu0 %v6898_v20  ;;  %5544 = vmatpush1.bf16.msra.mxu0 %v5543_v52  ;;  %v742_v52 = vsel %vm739_vm5, %v6296_v37, %v6301_v35 }
  0xd1   :  { %5546 = vmatprep.subr.bf16.mxu0 %v5545_v55  ;;  %v884_v55 = vsel %vm878_vm6, %v6312_v45, %v6307_v47  ;;  %v5563_v57 = vpack.c.bf16 %v743_v51, %v742_v52  ;;  %v888_v47 = vld [vmem:[#allocation2 + $0xc0] sm:$0xff] }
  0xd3   :  { %5366 = vmatmul.mubr.msk.f32.gmra.mrb[2].mxu0 %vm103_vm2, %v333_v58  ;;  %v5565_v58 = vpack.c.bf16 %v884_v55, %v883_v54  ;;  %v889_v54 = vld [vmem:[#allocation2 + $0xc8] sm:$0xff] }
  0xd4   :  { %424 = vmatprep.mubr.f32.mxu0 %v6898_v20  ;;  %5548 = vmatpush1.bf16.msra.mxu0 %v5547_v59  ;;  %v6320_v59 = vpop.permute.xlu1 %6319 }
  0xd5   :  { %5550 = vmatprep.subr.bf16.mxu0 %v5549_v60  ;;  %v6315_v60 = vpop.permute.xlu0 %6314  ;;  %v6322_v62 = vunpack.i.h.bf16 %v6320_v59 }
  0xd6   :  { %v6317_v0 = vunpack.i.h.bf16 %v6315_v60  ;;  %v6316_v1 = vunpack.i.l.bf16 %v6315_v60 }
  0xd7   :  { %5367 = vmatmul.mubr.msk.f32.gmra.mrb[4].mxu0 %vm103_vm2, %v334_v63  ;;  %v6321_v63 = vunpack.i.l.bf16 %v6320_v59  ;;  %v890_v59 = vld [vmem:[#allocation2 + $0xd0] sm:$0xff] }
  0xd8   :  { %430 = vmatprep.mubr.f32.mxu0 %v6898_v20  ;;  %v6330_v2 = vpop.permute.xlu1 %6329  ;;  %v886_v8 = vsel %vm878_vm6, %v6322_v62, %v6317_v0 }
  0xd9   :  { %v6325_v3 = vpop.permute.xlu0 %6324  ;;  %v885_v7 = vsel %vm878_vm6, %v6321_v63, %v6316_v1  ;;  %v6332_v9 = vunpack.i.h.bf16 %v6330_v2  ;;  %v6331_v10 = vunpack.i.l.bf16 %v6330_v2 }
  0xda   :  { %v6327_v11 = vunpack.i.h.bf16 %v6325_v3  ;;  %v6326_v12 = vunpack.i.l.bf16 %v6325_v3  ;;  %v5569_v19 = vpack.c.bf16 %v886_v8, %v885_v7 }
  0xdb   :  { %5368 = vmatmul.mubr.msk.f32.gmra.mrb[6].mxu0 %vm103_vm2, %v335_v6  ;;  %v879_v6 = vsel %vm878_vm6, %v6306_v48, %v6311_v46 }
  0xdc   :  { %551 = vmatprep.mubr.f32.mxu0 %v6898_v20  ;;  %v5567_v14 = vpack.c.bf16 %v880_v5, %v879_v6  ;;  %v1022_v21 = vsel %vm1017_vm7, %v6331_v10, %v6326_v12  ;;  %v1019_v39 = vsel %vm1017_vm7, %v6327_v11, %v6332_v9  ;;  %v1027_v5 = vld [vmem:[#allocation2 + $0xe0] sm:$0xff] }
  0xdf   :  { %5369 = vmatmul.mubr.msk.f32.vlgmr.msra.gmra.mrb[0].mxu0 %vm103_vm2, %v471_v15  ;;  %v882_v15 = vsel %vm878_vm6, %v6317_v0, %v6322_v62  ;;  %v891_v0 = vld [vmem:[#allocation2 + $0xd8] sm:$0xff] }
  0xe0   :  { %557 = vmatprep.mubr.f32.mxu0 %v6898_v20  ;;  %5552 = vmatpush1.bf16.msra.mxu0 %v5551_v18  ;;  %v881_v18 = vsel %vm878_vm6, %v6316_v1, %v6321_v63 }
  0xe1   :  { %5554 = vmatprep.subr.bf16.mxu0 %v5553_v22  ;;  %v1023_v22 = vsel %vm1017_vm7, %v6332_v9, %v6327_v11  ;;  %v5571_v24 = vpack.c.bf16 %v882_v15, %v881_v18  ;;  %v1167_v15 = vld [vmem:[#allocation2 + $0x108] sm:$0xff]  ;;  %v1168_v18 = vld [vmem:[#allocation2 + $0x110] sm:$0xff] }
  0xe3   :  { %5370 = vmatmul.mubr.msk.f32.gmra.mrb[2].mxu0 %vm103_vm2, %v472_v25  ;;  %v5573_v25 = vpack.c.bf16 %v1023_v22, %v1022_v21 }
  0xe4   :  { %563 = vmatprep.mubr.f32.mxu0 %v6898_v20  ;;  %5556 = vmatpush1.bf16.msra.mxu0 %v5555_v26  ;;  %v6340_v26 = vpop.permute.xlu1 %6339 }
  0xe5   :  { %5558 = vmatprep.subr.bf16.mxu0 %v5557_v30  ;;  %v6335_v30 = vpop.permute.xlu0 %6334  ;;  %v6342_v32 = vunpack.i.h.bf16 %v6340_v26 }
  0xe6   :  { %v6337_v34 = vunpack.i.h.bf16 %v6335_v30  ;;  %v6336_v35 = vunpack.i.l.bf16 %v6335_v30 }
  0xe7   :  { %5371 = vmatmul.mubr.msk.f32.gmra.mrb[4].mxu0 %vm103_vm2, %v473_v33  ;;  %v6341_v33 = vunpack.i.l.bf16 %v6340_v26 }
  0xe8   :  { %569 = vmatprep.mubr.f32.mxu0 %v6898_v20  ;;  %v6350_v36 = vpop.permute.xlu1 %6349  ;;  %v1025_v42 = vsel %vm1017_vm7, %v6342_v32, %v6337_v34 }
  0xe9   :  { %v6345_v37 = vpop.permute.xlu0 %6344  ;;  %v1024_v41 = vsel %vm1017_vm7, %v6341_v33, %v6336_v35  ;;  %v6352_v43 = vunpack.i.h.bf16 %v6350_v36  ;;  %v6351_v44 = vunpack.i.l.bf16 %v6350_v36 }
  0xea   :  { %v6347_v45 = vunpack.i.h.bf16 %v6345_v37  ;;  %v6346_v46 = vunpack.i.l.bf16 %v6345_v37  ;;  %v5577_v51 = vpack.c.bf16 %v1025_v42, %v1024_v41 }
  0xeb   :  { %5372 = vmatmul.mubr.msk.f32.gmra.mrb[6].mxu0 %vm103_vm2, %v474_v40  ;;  %v1018_v40 = vsel %vm1017_vm7, %v6326_v12, %v6331_v10  ;;  %v1028_v10 = vld [vmem:[#allocation2 + $0xe8] sm:$0xff]  ;;  %v1029_v12 = vld [vmem:[#allocation2 + $0xf0] sm:$0xff] }
  0xec   :  { %690 = vmatprep.mubr.f32.mxu0 %v6898_v20  ;;  %v5575_v48 = vpack.c.bf16 %v1019_v39, %v1018_v40  ;;  %v1161_v52 = vsel %vm1156_vm8, %v6351_v44, %v6346_v46  ;;  %v1158_v1 = vsel %vm1156_vm8, %v6347_v45, %v6352_v43  ;;  %v1157_v2 = vsel %vm1156_vm8, %v6346_v46, %v6351_v44 }
  0xed   :  { %v5583_v6 = vpack.c.bf16 %v1158_v1, %v1157_v2 }
  0xef   :  { %5373 = vmatmul.mubr.msk.f32.vlgmr.msra.gmra.mrb[0].mxu0 %vm103_vm2, %v610_v49  ;;  %v1021_v49 = vsel %vm1017_vm7, %v6337_v34, %v6342_v32 }
  0xf0   :  { %696 = vmatprep.mubr.f32.mxu0 %v6898_v20  ;;  %5560 = vmatpush1.bf16.msra.mxu0 %v5559_v50  ;;  %v1020_v50 = vsel %vm1017_vm7, %v6336_v35, %v6341_v33 }
  0xf1   :  { %5562 = vmatprep.subr.bf16.mxu0 %v5561_v53  ;;  %v1162_v53 = vsel %vm1156_vm8, %v6352_v43, %v6347_v45  ;;  %v5579_v55 = vpack.c.bf16 %v1021_v49, %v1020_v50 }
  0xf3   :  { %5374 = vmatmul.mubr.msk.f32.gmra.mrb[2].mxu0 %vm103_vm2, %v611_v56  ;;  %v5581_v56 = vpack.c.bf16 %v1162_v53, %v1161_v52 }
  0xf4   :  { %702 = vmatprep.mubr.f32.mxu0 %v6898_v20  ;;  %5564 = vmatpush1.bf16.msra.mxu0 %v5563_v57  ;;  %v6360_v57 = vpop.permute.xlu1 %6359 }
  0xf5   :  { %5566 = vmatprep.subr.bf16.mxu0 %v5565_v58  ;;  %v6355_v58 = vpop.permute.xlu0 %6354  ;;  %v6362_v60 = vunpack.i.h.bf16 %v6360_v57 }
  0xf6   :  { %v6357_v62 = vunpack.i.h.bf16 %v6355_v58  ;;  %v6356_v63 = vunpack.i.l.bf16 %v6355_v58 }
  0xf7   :  { %5375 = vmatmul.mubr.msk.f32.gmra.mrb[4].mxu0 %vm103_vm2, %v612_v61  ;;  %v6361_v61 = vunpack.i.l.bf16 %v6360_v57 }
  0xf8   :  { %708 = vmatprep.mubr.f32.mxu0 %v6898_v20  ;;  %v1160_v7 = vsel %vm1156_vm8, %v6357_v62, %v6362_v60 }
  0xf9   :  { %v1163_v3 = vsel %vm1156_vm8, %v6361_v61, %v6356_v63  ;;  %v1159_v8 = vsel %vm1156_vm8, %v6356_v63, %v6361_v61  ;;  %v7313_v61 = vld [vmem:[%s8644_s0 + $0x50] sm:$0xff]  ;;  %v7323_v63 = vld [vmem:[%s8644_s0 + $0x58] sm:$0xff] }
  0xfa   :  { %v5587_v11 = vpack.c.bf16 %v1160_v7, %v1159_v8  ;;  %v2725_v1 = vmax.f32 %v7313_v61, 0.0  ;;  %v7349_v7 = vld [vmem:[%s8644_s0 + $0x78] sm:$0xff] }
  0xfb   :  { %5376 = vmatmul.mubr.msk.f32.gmra.mrb[6].mxu0 %vm103_vm2, %v613_v4  ;;  %v1164_v4 = vsel %vm1156_vm8, %v6362_v60, %v6357_v62  ;;  %v7308_v60 = vld [vmem:[%s8644_s0 + $0x40] sm:$0xff]  ;;  %v7318_v62 = vld [vmem:[%s8644_s0 + $0x48] sm:$0xff] }
  0xfc   :  { %829 = vmatprep.mubr.f32.mxu0 %v6898_v20  ;;  %v5585_v9 = vpack.c.bf16 %v1164_v4, %v1163_v3  ;;  %v2724_v2 = vmax.f32 %v7318_v62, 0.0  ;;  %v2726_v3 = vmax.f32 %v7323_v63, 0.0  ;;  %v7334_v4 = vld [vmem:[%s8644_s0 + $0x60] sm:$0xff] }
  0xfd   :  { %v2759_v63 = vld [vmem:[#allocation2 + $0x20] sm:$0xff] }
  0xff   :  { %5377 = vmatmul.mubr.msk.f32.vlgmr.msra.gmra.mrb[0].mxu0 %vm103_vm2, %v749_v13  ;;  %v1030_v13 = vld [vmem:[#allocation2 + $0xf8] sm:$0xff] }
 0x100   :  { %835 = vmatprep.mubr.f32.mxu0 %v6898_v20  ;;  %5568 = vmatpush1.bf16.msra.mxu0 %v5567_v14  ;;  %v1166_v14 = vld [vmem:[#allocation2 + $0x100] sm:$0xff] }
 0x101   :  { %5570 = vmatprep.subr.bf16.mxu0 %v5569_v19  ;;  %v1169_v19 = vld [vmem:[#allocation2 + $0x118] sm:$0xff] }
 0x103   :  { %5378 = vmatmul.mubr.msk.f32.gmra.mrb[2].mxu0 %vm103_vm2, %v750_v23 }
 0x104   :  { %841 = vmatprep.mubr.f32.mxu0 %v6898_v20  ;;  %5572 = vmatpush1.bf16.msra.mxu0 %v5571_v24 }
 0x105   :  { %5574 = vmatprep.subr.bf16.mxu0 %v5573_v25 }
 0x107   :  { %5379 = vmatmul.mubr.msk.f32.gmra.mrb[4].mxu0 %vm103_vm2, %v751_v31 }
 0x108   :  { %847 = vmatprep.mubr.f32.mxu0 %v6898_v20 }
 0x10b   :  { %5380 = vmatmul.mubr.msk.f32.gmra.mrb[6].mxu0 %vm103_vm2, %v752_v38 }
 0x10c   :  { %968 = vmatprep.mubr.f32.mxu0 %v6898_v20 }
 0x10f   :  { %5381 = vmatmul.mubr.msk.f32.vlgmr.msra.gmra.mrb[0].mxu0 %vm103_vm2, %v888_v47 }
 0x110   :  { %974 = vmatprep.mubr.f32.mxu0 %v6898_v20  ;;  %5576 = vmatpush1.bf16.msra.mxu0 %v5575_v48 }
 0x111   :  { %5578 = vmatprep.subr.bf16.mxu0 %v5577_v51 }
 0x113   :  { %5382 = vmatmul.mubr.msk.f32.gmra.mrb[2].mxu0 %vm103_vm2, %v889_v54 }
 0x114   :  { %980 = vmatprep.mubr.f32.mxu0 %v6898_v20  ;;  %5580 = vmatpush1.bf16.msra.mxu0 %v5579_v55 }
 0x115   :  { %5582 = vmatprep.subr.bf16.mxu0 %v5581_v56 }
 0x117   :  { %5383 = vmatmul.mubr.msk.f32.gmra.mrb[4].mxu0 %vm103_vm2, %v890_v59 }
 0x118   :  { %986 = vmatprep.mubr.f32.mxu0 %v6898_v20 }
 0x11b   :  { %5384 = vmatmul.mubr.msk.f32.gmra.mrb[6].mxu0 %vm103_vm2, %v891_v0  ;;  %v2723_v0 = vmax.f32 %v7308_v60, 0.0 }
 0x11c   :  { %1107 = vmatprep.mubr.f32.mxu0 %v6898_v20 }
 0x11d   :  { %v6525_v8 = vpack.i.bf16 %v2725_v1, %v2723_v0 }
 0x11f   :  { %5385 = vmatmul.mubr.msk.f32.vlgmr.msra.gmra.mrb[0].mxu0 %vm103_vm2, %v1027_v5  ;;  %v7339_v5 = vld [vmem:[%s8644_s0 + $0x70] sm:$0xff] }
 0x120   :  { %1113 = vmatprep.mubr.f32.mxu0 %v6898_v20  ;;  %5584 = vmatpush1.bf16.msra.mxu0 %v5583_v6  ;;  %v7344_v6 = vld [vmem:[%s8644_s0 + $0x68] sm:$0xff] }
 0x121   :  { %5586 = vmatprep.subr.bf16.mxu0 %v5585_v9  ;;  %v2727_v9 = vmax.f32 %v7334_v4, 0.0  ;;  %v2555_v4 = vld [vmem:[%s8649_s5 + $0x18] sm:$0xff] }
 0x123   :  { %5386 = vmatmul.mubr.msk.f32.gmra.mrb[2].mxu0 %vm103_vm2, %v1028_v10  ;;  %v2729_v10 = vmax.f32 %v7339_v5, 0.0 }
 0x124   :  { %1119 = vmatprep.mubr.f32.mxu0 %v6898_v20  ;;  %5588 = vmatpush1.bf16.msra.mxu0 %v5587_v11  ;;  %v6530_v11 = vpack.i.bf16 %v2726_v3, %v2724_v2 }
 0x125   :  { %v5739_v60 = vpack.c.bf16 %v2729_v10, %v2727_v9 }
 0x127   :  { %5387 = vmatmul.mubr.msk.f32.gmra.mrb[4].mxu0 %vm103_vm2, %v1029_v12  ;;  %v2728_v12 = vmax.f32 %v7344_v6, 0.0  ;;  %v2761_v6 = vld [vmem:[#allocation2 + $0x30] sm:$0xff] }
 0x128   :  { %1125 = vmatprep.mubr.f32.mxu0 %v6898_v20 }
 0x12b   :  { %5388 = vmatmul.mubr.msk.f32.gmra.mrb[6].mxu0 %vm103_vm2, %v1030_v13  ;;  %v2730_v13 = vmax.f32 %v7349_v7, 0.0  ;;  %v2553_v7 = vld [vmem:[%s8649_s5 + $0x8] sm:$0xff] }
 0x12c   :  { %1246 = vmatprep.mubr.f32.mxu0 %v6898_v20 }
 0x12f   :  { %5389 = vmatmul.mubr.msk.f32.vlgmr.msra.gmra.mrb[0].mxu0 %vm103_vm2, %v1166_v14  ;;  %v6535_v14 = vpack.i.bf16 %v2729_v10, %v2727_v9  ;;  %v5661_v10 = vpack.c.bf16 %v2555_v4, %v2553_v7 }
 0x130   :  { %1252 = vmatprep.mubr.f32.mxu0 %v6898_v20 }
 0x131   :  { %5662 = vmatprep.subr.bf16.mxu0 %v5661_v10  ;;  %v2574_v10 = vld [vmem:[%s8649_s5 + $0xb0] sm:$0xff] }
 0x133   :  { %5390 = vmatmul.mubr.msk.f32.gmra.mrb[2].mxu0 %vm103_vm2, %v1167_v15  ;;  %v6540_v15 = vpack.i.bf16 %v2730_v13, %v2728_v12 }
 0x134   :  { %1258 = vmatprep.mubr.f32.mxu0 %v6898_v20 }
 0x135   :  { %v1286_v21 = vpop.permute.xlu0 %1285 }
 0x136   :  { %v1291_v24 = vpop.permute.xlu1 %1290 }
 0x137   :  { %5391 = vmatmul.mubr.msk.f32.gmra.mrb[4].mxu0 %vm103_vm2, %v1168_v18 }
 0x138   :  { %1264 = vmatprep.mubr.f32.mxu0 %v6898_v20 }
 0x139   :  { %v1301_v46 = vpop.permute.xlu0 %1300 }
 0x13a   :  { %v1296_v38 = vpop.permute.xlu1 %1295 }
 0x13b   :  { %5392 = vmatmul.mubr.msk.f32.gmra.mrb[6].mxu0 %vm103_vm2, %v1169_v19 }
 0x202   :  { %v1248_v22 = vpop.f32.mrb[0].mxu0 }
 0x203   :  { %v1250_v23 = vpop.f32.mrb[1].mxu0  ;;  %v1303_v25 = vadd.f32 %v1286_v21, %v1248_v22 }
 0x204   :  { %v1304_v26 = vadd.f32 %v1286_v21, %v1250_v23 }
 0x205   :  { %v1311_v34 = vmax.f32 %v1303_v25, 0.0 }
 0x206   :  { %v1254_v30 = vpop.f32.mrb[2].mxu0  ;;  %v1312_v36 = vmax.f32 %v1304_v26, 0.0 }
 0x207   :  { %v1305_v31 = vadd.f32 %v1291_v24, %v1254_v30  ;;  %v1256_v32 = vpop.f32.mrb[3].mxu0 }
 0x208   :  { %v1306_v33 = vadd.f32 %v1291_v24, %v1256_v32 }
 0x209   :  { %v1313_v35 = vmax.f32 %v1305_v31, 0.0 }
 0x20a   :  { %v1314_v37 = vmax.f32 %v1306_v33, 0.0  ;;  %v1260_v39 = vpop.f32.mrb[4].mxu0 }
 0x20b   :  { %v1262_v40 = vpop.f32.mrb[5].mxu0  ;;  %v6365_v41 = vpack.i.bf16 %v1313_v35, %v1311_v34  ;;  %v7269_v42 = vpack.c.bf16 %v1313_v35, %v1311_v34  ;;  %v1307_v45 = vadd.f32 %v1296_v38, %v1260_v39 }
 0x20c   :  { %v6370_v43 = vpack.i.bf16 %v1314_v37, %v1312_v36  ;;  %v7271_v44 = vpack.c.bf16 %v1314_v37, %v1312_v36  ;;  %v1308_v47 = vadd.f32 %v1296_v38, %v1262_v40 }
 0x20d   :  { %6366 = vrot.lane.b32.xlu1 %v6365_v41, %s6897_s13  ;;  %v1315_v52 = vmax.f32 %v1307_v45, 0.0 }
 0x20e   :  { %6371 = vrot.lane.b32.xlu0 %v6370_v43, %s6897_s13  ;;  %v1266_v48 = vpop.f32.mrb[6].mxu0  ;;  %v1316_v54 = vmax.f32 %v1308_v47, 0.0 }
 0x20f   :  { %v1309_v49 = vadd.f32 %v1301_v46, %v1266_v48  ;;  %v1268_v50 = vpop.f32.mrb[7].mxu0 }
 0x210   :  { %v1310_v51 = vadd.f32 %v1301_v46, %v1268_v50 }
 0x211   :  { %v1317_v53 = vmax.f32 %v1309_v49, 0.0 }
 0x212   :  { %v1318_v55 = vmax.f32 %v1310_v51, 0.0 }
 0x213   :  { %v6375_v56 = vpack.i.bf16 %v1317_v53, %v1315_v52  ;;  %v7275_v57 = vpack.c.bf16 %v1317_v53, %v1315_v52 }
 0x214   :  { %v6380_v58 = vpack.i.bf16 %v1318_v55, %v1316_v54  ;;  %v7277_v59 = vpack.c.bf16 %v1318_v55, %v1316_v54  ;;  %v1348_v54 = vld [vmem:[#allocation4 + $0x20] sm:$0xff]  ;;  %v1349_v55 = vld [vmem:[#allocation4 + $0x28] sm:$0xff] }
 0x215   :  { %6376 = vrot.lane.b32.xlu1 %v6375_v56, %s6897_s13 }
 0x216   :  { %6381 = vrot.lane.b32.xlu0 %v6380_v58, %s6897_s13 }
 0x219   :  { %6386 = vrot.lane.b32.xlu1 %v6365_v41, %s6899_s14 }
 0x21a   :  { %6391 = vrot.lane.b32.xlu0 %v6370_v43, %s6899_s14 }
 0x21d   :  { %6396 = vrot.lane.b32.xlu1 %v6375_v56, %s6899_s14 }
 0x21e   :  { %6401 = vrot.lane.b32.xlu0 %v6380_v58, %s6899_s14 }
 0x221   :  { %6406 = vrot.lane.b32.xlu1 %v6365_v41, %s6900_s15 }
 0x222   :  { %6411 = vrot.lane.b32.xlu0 %v6370_v43, %s6900_s15 }
 0x225   :  { %6416 = vrot.lane.b32.xlu1 %v6375_v56, %s6900_s15 }
 0x226   :  { %6421 = vrot.lane.b32.xlu0 %v6380_v58, %s6900_s15 }
 0x229   :  { %6426 = vrot.lane.b32.xlu1 %v6365_v41, %s6901_s16 }
 0x22a   :  { %6431 = vrot.lane.b32.xlu0 %v6370_v43, %s6901_s16 }
 0x22d   :  { %6436 = vrot.lane.b32.xlu1 %v6375_v56, %s6901_s16 }
 0x22e   :  { %6441 = vrot.lane.b32.xlu0 %v6380_v58, %s6901_s16 }
 0x231   :  { %6446 = vrot.lane.b32.xlu1 %v6365_v41, %s6902_s17 }
 0x232   :  { %6451 = vrot.lane.b32.xlu0 %v6370_v43, %s6902_s17 }
 0x235   :  { %6456 = vrot.lane.b32.xlu1 %v6375_v56, %s6902_s17 }
 0x236   :  { %6461 = vrot.lane.b32.xlu0 %v6380_v58, %s6902_s17 }
 0x239   :  { %6466 = vrot.lane.b32.xlu1 %v6365_v41, %s6903_s18 }
 0x23a   :  { %6471 = vrot.lane.b32.xlu0 %v6370_v43, %s6903_s18 }
 0x23d   :  { %6476 = vrot.lane.b32.xlu1 %v6375_v56, %s6903_s18 }
 0x23e   :  { %6481 = vrot.lane.b32.xlu0 %v6380_v58, %s6903_s18 }
 0x241   :  { %6486 = vrot.lane.b32.xlu1 %v6365_v41, %s6904_s19 }
 0x242   :  { %6491 = vrot.lane.b32.xlu0 %v6370_v43, %s6904_s19 }
 0x245   :  { %6496 = vrot.lane.b32.xlu1 %v6375_v56, %s6904_s19 }
 0x246   :  { %6501 = vrot.lane.b32.xlu0 %v6380_v58, %s6904_s19 }
 0x249   :  { %6506 = vrot.lane.b32.xlu1 %v6365_v41, %s6905_s20 }
 0x24a   :  { %6511 = vrot.lane.b32.xlu0 %v6370_v43, %s6905_s20 }
 0x24d   :  { %6516 = vrot.lane.b32.xlu1 %v6375_v56, %s6905_s20 }
 0x24e   :  { %6521 = vrot.lane.b32.xlu0 %v6380_v58, %s6905_s20 }
 0x251   :  { %6526 = vrot.lane.b32.xlu1 %v6525_v8, %s6897_s13 }
 0x252   :  { %6531 = vrot.lane.b32.xlu0 %v6530_v11, %s6897_s13 }
 0x255   :  { %6536 = vrot.lane.b32.xlu1 %v6535_v14, %s6897_s13 }
 0x256   :  { %6541 = vrot.lane.b32.xlu0 %v6540_v15, %s6897_s13 }
 0x259   :  { %6546 = vrot.lane.b32.xlu1 %v6525_v8, %s6899_s14 }
 0x25a   :  { %6551 = vrot.lane.b32.xlu0 %v6530_v11, %s6899_s14 }
 0x25d   :  { %6556 = vrot.lane.b32.xlu1 %v6535_v14, %s6899_s14 }
 0x25e   :  { %6561 = vrot.lane.b32.xlu0 %v6540_v15, %s6899_s14 }
 0x261   :  { %6566 = vrot.lane.b32.xlu1 %v6525_v8, %s6900_s15 }
 0x262   :  { %6571 = vrot.lane.b32.xlu0 %v6530_v11, %s6900_s15 }
 0x265   :  { %6576 = vrot.lane.b32.xlu1 %v6535_v14, %s6900_s15 }
 0x266   :  { %6581 = vrot.lane.b32.xlu0 %v6540_v15, %s6900_s15 }
 0x269   :  { %6586 = vrot.lane.b32.xlu1 %v6525_v8, %s6901_s16 }
 0x26a   :  { %6591 = vrot.lane.b32.xlu0 %v6530_v11, %s6901_s16 }
 0x26d   :  { %6596 = vrot.lane.b32.xlu1 %v6535_v14, %s6901_s16 }
 0x26e   :  { %6601 = vrot.lane.b32.xlu0 %v6540_v15, %s6901_s16 }
 0x271   :  { %6606 = vrot.lane.b32.xlu1 %v6525_v8, %s6902_s17 }
 0x272   :  { %6611 = vrot.lane.b32.xlu0 %v6530_v11, %s6902_s17 }
 0x275   :  { %6616 = vrot.lane.b32.xlu1 %v6535_v14, %s6902_s17 }
 0x276   :  { %6621 = vrot.lane.b32.xlu0 %v6540_v15, %s6902_s17 }
 0x279   :  { %6626 = vrot.lane.b32.xlu1 %v6525_v8, %s6903_s18 }
 0x27a   :  { %6631 = vrot.lane.b32.xlu0 %v6530_v11, %s6903_s18 }
 0x27d   :  { %6636 = vrot.lane.b32.xlu1 %v6535_v14, %s6903_s18 }
 0x27e   :  { %6641 = vrot.lane.b32.xlu0 %v6540_v15, %s6903_s18 }
 0x27f   :  { %v6367_v18 = vpop.permute.xlu1 %6366 }
 0x280   :  { %v6369_v19 = vunpack.i.h.bf16 %v6367_v18  ;;  %v6368_v21 = vunpack.i.l.bf16 %v6367_v18  ;;  %v6372_v22 = vpop.permute.xlu0 %6371  ;;  %v2523_v18 = vld [vmem:[%s8648_s4 + $0x18] sm:$0xff] }
 0x281   :  { %v6374_v23 = vunpack.i.h.bf16 %v6372_v22  ;;  %v6373_v24 = vunpack.i.l.bf16 %v6372_v22  ;;  %6646 = vrot.lane.b32.xlu1 %v6525_v8, %s6904_s19 }
 0x282   :  { %6651 = vrot.lane.b32.xlu0 %v6530_v11, %s6904_s19 }
 0x283   :  { %v1343_v25 = vsel %vm89_vm0, %v6373_v24, %v6368_v21  ;;  %v1344_v26 = vsel %vm89_vm0, %v6374_v23, %v6369_v19  ;;  %v1339_v30 = vsel %vm89_vm0, %v6368_v21, %v6373_v24  ;;  %v1340_v31 = vsel %vm89_vm0, %v6369_v19, %v6374_v23  ;;  %v1351_v19 = vld [vmem:[#allocation4 + $0x38] sm:$0xff] }
 0x284   :  { %v5589_v32 = vpack.c.bf16 %v1344_v26, %v1343_v25  ;;  %v5591_v33 = vpack.c.bf16 %v1340_v31, %v1339_v30 }
 0x285   :  { %6656 = vrot.lane.b32.xlu1 %v6535_v14, %s6904_s19 }
 0x286   :  { %5590 = vmatprep.subr.bf16.mxu1 %v5589_v32  ;;  %6661 = vrot.lane.b32.xlu0 %v6540_v15, %s6904_s19  ;;  %v1319_v32 = vld [vmem:[#allocation4] sm:$0xff] }
 0x287   :  { %5592 = vmatpush1.bf16.msra.mxu1 %v5591_v33  ;;  %v6377_v34 = vpop.permute.xlu1 %6376 }
 0x288   :  { %v6379_v35 = vunpack.i.h.bf16 %v6377_v34  ;;  %v6378_v36 = vunpack.i.l.bf16 %v6377_v34  ;;  %v6382_v37 = vpop.permute.xlu0 %6381 }
 0x289   :  { %v6384_v38 = vunpack.i.h.bf16 %v6382_v37  ;;  %v6383_v39 = vunpack.i.l.bf16 %v6382_v37  ;;  %6666 = vrot.lane.b32.xlu1 %v6525_v8, %s6905_s20  ;;  %v1350_v8 = vld [vmem:[#allocation4 + $0x30] sm:$0xff] }
 0x28a   :  { %6671 = vrot.lane.b32.xlu0 %v6530_v11, %s6905_s20  ;;  %v2522_v11 = vld [vmem:[%s8648_s4 + $0x10] sm:$0xff] }
 0x28b   :  { %v1345_v40 = vsel %vm89_vm0, %v6383_v39, %v6378_v36  ;;  %v1346_v41 = vsel %vm89_vm0, %v6384_v38, %v6379_v35  ;;  %v1341_v43 = vsel %vm89_vm0, %v6378_v36, %v6383_v39  ;;  %v1342_v45 = vsel %vm89_vm0, %v6379_v35, %v6384_v38  ;;  %v6387_v46 = vpop.permute.xlu1 %6386  ;;  %v1320_v38 = vld [vmem:[#allocation4 + $0x8] sm:$0xff] }
 0x28c   :  { %v6392_v47 = vpop.permute.xlu0 %6391  ;;  %v5593_v48 = vpack.c.bf16 %v1346_v41, %v1345_v40  ;;  %v5595_v49 = vpack.c.bf16 %v1342_v45, %v1341_v43  ;;  %v6389_v50 = vunpack.i.h.bf16 %v6387_v46  ;;  %v6388_v51 = vunpack.i.l.bf16 %v6387_v46 }
 0x28d   :  { %6676 = vrot.lane.b32.xlu1 %v6535_v14, %s6905_s20  ;;  %v6394_v52 = vunpack.i.h.bf16 %v6392_v47  ;;  %v6393_v53 = vunpack.i.l.bf16 %v6392_v47  ;;  %v1321_v47 = vld [vmem:[#allocation4 + $0x10] sm:$0xff] }
 0x28e   :  { %6681 = vrot.lane.b32.xlu0 %v6540_v15, %s6905_s20  ;;  %5594 = vmatprep.subr.bf16.mxu1 %v5593_v48 }
 0x28f   :  { %5596 = vmatpush1.bf16.msra.mxu1 %v5595_v49  ;;  %v1574_v56 = vsel %vm322_vm1, %v6393_v53, %v6388_v51  ;;  %v1575_v58 = vsel %vm322_vm1, %v6394_v52, %v6389_v50  ;;  %v1571_v22 = vsel %vm322_vm1, %v6389_v50, %v6394_v52  ;;  %v1570_v23 = vsel %vm322_vm1, %v6388_v51, %v6393_v53  ;;  %v1322_v52 = vld [vmem:[#allocation4 + $0x18] sm:$0xff] }
 0x290   :  { %5598 = vmatprep.subr.bf16.mxu1 %v7271_v44  ;;  %v6397_v44 = vpop.permute.xlu1 %6396  ;;  %v5607_v34 = vpack.c.bf16 %v1571_v22, %v1570_v23 }
 0x291   :  { %3930 = vperm.xlu1 %6364, %v7079_v16   ;;  %v6402_v16 = vpop.permute.xlu0 %6401  ;;  %v6399_v14 = vunpack.i.h.bf16 %v6397_v44 }
 0x292   :  { %3935 = vperm.xlu0 %6363, %v7084_v17   ;;  %5393 = vmatmul.mubr.msk.f32.vlgmr.msra.gmra.mrb[0].mxu1 %vm103_vm2, %v1348_v54  ;;  %v5605_v17 = vpack.c.bf16 %v1575_v58, %v1574_v56 }
 0x293   :  { %5600 = vmatpush1.bf16.msra.mxu1 %v7269_v42  ;;  %1434 = vmatprep.mubr.f32.mxu1 %v6898_v20  ;;  %v2520_v42 = vld [vmem:[%s8648_s4] sm:$0xff] }
 0x294   :  { %5602 = vmatprep.subr.bf16.mxu1 %v7277_v59  ;;  %v2521_v59 = vld [vmem:[%s8648_s4 + $0x8] sm:$0xff]  ;;  %v6407_v15 = vpop.permute.xlu1 %6406 }
 0x295   :  { %3940 = vperm.xlu1 %6364, %v7101_v28   ;;  %v6398_v28 = vunpack.i.l.bf16 %v6397_v44  ;;  %v6412_v21 = vpop.permute.xlu0 %6411  ;;  %v6409_v24 = vunpack.i.h.bf16 %v6407_v15  ;;  %v6408_v26 = vunpack.i.l.bf16 %v6407_v15 }
 0x296   :  { %3945 = vperm.xlu0 %6363, %v7106_v29   ;;  %5394 = vmatmul.mubr.msk.f32.gmra.mrb[2].mxu1 %vm103_vm2, %v1349_v55  ;;  %v6403_v29 = vunpack.i.l.bf16 %v6402_v16  ;;  %v6414_v30 = vunpack.i.h.bf16 %v6412_v21  ;;  %v6413_v31 = vunpack.i.l.bf16 %v6412_v21 }
 0x297   :  { %5604 = vmatpush1.bf16.msra.mxu1 %v7275_v57  ;;  %1440 = vmatprep.mubr.f32.mxu1 %v6898_v20  ;;  %v6404_v57 = vunpack.i.h.bf16 %v6402_v16 }
 0x298   :  { %5606 = vmatprep.subr.bf16.mxu1 %v5605_v17  ;;  %v1576_v25 = vsel %vm322_vm1, %v6403_v29, %v6398_v28  ;;  %v1572_v36 = vsel %vm322_vm1, %v6398_v28, %v6403_v29  ;;  %v1712_v39 = vsel %vm461_vm3, %v6413_v31, %v6408_v26  ;;  %v1713_v40 = vsel %vm461_vm3, %v6414_v30, %v6409_v24  ;;  %v6417_v43 = vpop.permute.xlu1 %6416 }
 0x299   :  { %2526 = vperm.xlu1 %6364, %v2520_v42   ;;  %v1577_v33 = vsel %vm322_vm1, %v6404_v57, %v6399_v14  ;;  %v1573_v35 = vsel %vm322_vm1, %v6399_v14, %v6404_v57  ;;  %v6422_v45 = vpop.permute.xlu0 %6421  ;;  %v5613_v46 = vpack.c.bf16 %v1713_v40, %v1712_v39  ;;  %v6419_v48 = vunpack.i.h.bf16 %v6417_v43  ;;  %v1580_v57 = vld [vmem:[#allocation4 + $0x48] sm:$0xff] }
 0x29a   :  { %2531 = vperm.xlu0 %6363, %v2521_v59   ;;  %5395 = vmatmul.mubr.msk.f32.gmra.mrb[4].mxu1 %vm103_vm2, %v1350_v8  ;;  %v5609_v37 = vpack.c.bf16 %v1577_v33, %v1576_v25  ;;  %v5611_v41 = vpack.c.bf16 %v1573_v35, %v1572_v36  ;;  %v6418_v49 = vunpack.i.l.bf16 %v6417_v43  ;;  %v6424_v50 = vunpack.i.h.bf16 %v6422_v45  ;;  %v1579_v8 = vld [vmem:[#allocation4 + $0x40] sm:$0xff]  ;;  %v1582_v33 = vld [vmem:[#allocation4 + $0x58] sm:$0xff] }
 0x29b   :  { %1446 = vmatprep.mubr.f32.mxu1 %v6898_v20  ;;  %v6423_v51 = vunpack.i.l.bf16 %v6422_v45  ;;  %v1709_v55 = vsel %vm461_vm3, %v6409_v24, %v6414_v30  ;;  %v1708_v56 = vsel %vm461_vm3, %v6408_v26, %v6413_v31  ;;  %v1581_v24 = vld [vmem:[#allocation4 + $0x50] sm:$0xff]  ;;  %v1717_v43 = vld [vmem:[#allocation4 + $0x60] sm:$0xff] }
 0x29c   :  { %v6427_v53 = vpop.permute.xlu1 %6426  ;;  %v1715_v44 = vsel %vm461_vm3, %v6424_v50, %v6419_v48  ;;  %v5615_v28 = vpack.c.bf16 %v1709_v55, %v1708_v56  ;;  %v1711_v29 = vsel %vm461_vm3, %v6419_v48, %v6424_v50  ;;  %v1718_v50 = vld [vmem:[#allocation4 + $0x68] sm:$0xff] }
 0x29d   :  { %2536 = vperm.xlu1 %6364, %v2522_v11   ;;  %v6432_v54 = vpop.permute.xlu0 %6431  ;;  %v1714_v58 = vsel %vm461_vm3, %v6423_v51, %v6418_v49  ;;  %v6429_v16 = vunpack.i.h.bf16 %v6427_v53  ;;  %v6428_v17 = vunpack.i.l.bf16 %v6427_v53  ;;  %v1710_v11 = vsel %vm461_vm3, %v6418_v49, %v6423_v51 }
 0x29e   :  { %2541 = vperm.xlu0 %6363, %v2523_v18   ;;  %5396 = vmatmul.mubr.msk.f32.gmra.mrb[6].mxu1 %vm103_vm2, %v1351_v19  ;;  %v6434_v42 = vunpack.i.h.bf16 %v6432_v54  ;;  %v6433_v59 = vunpack.i.l.bf16 %v6432_v54  ;;  %v5617_v14 = vpack.c.bf16 %v1715_v44, %v1714_v58  ;;  %v5619_v19 = vpack.c.bf16 %v1711_v29, %v1710_v11  ;;  %v1719_v58 = vld [vmem:[#allocation4 + $0x70] sm:$0xff] }
 0x29f   :  { %1529 = vmatprep.mubr.f32.mxu1 %v6898_v20 }
 0x2a0   :  { %v1850_v15 = vsel %vm600_vm4, %v6433_v59, %v6428_v17  ;;  %v1851_v18 = vsel %vm600_vm4, %v6434_v42, %v6429_v16  ;;  %v6437_v21 = vpop.permute.xlu1 %6436  ;;  %v1847_v35 = vsel %vm600_vm4, %v6429_v16, %v6434_v42  ;;  %v1846_v36 = vsel %vm600_vm4, %v6428_v17, %v6433_v59  ;;  %v1720_v59 = vld [vmem:[#allocation4 + $0x78] sm:$0xff] }
 0x2a1   :  { %v6442_v22 = vpop.permute.xlu0 %6441  ;;  %v5621_v23 = vpack.c.bf16 %v1851_v18, %v1850_v15  ;;  %v6438_v25 = vunpack.i.l.bf16 %v6437_v21  ;;  %v6439_v30 = vunpack.i.h.bf16 %v6437_v21 }
 0x2a2   :  { %5397 = vmatmul.mubr.msk.f32.vlgmr.msra.gmra.mrb[0].mxu1 %vm103_vm2, %v1319_v32  ;;  %v6443_v26 = vunpack.i.l.bf16 %v6442_v22  ;;  %v6444_v31 = vunpack.i.h.bf16 %v6442_v22  ;;  %v1855_v22 = vld [vmem:[#allocation4 + $0x80] sm:$0xff] }
 0x2a3   :  { %5608 = vmatpush1.bf16.msra.mxu1 %v5607_v34  ;;  %1535 = vmatprep.mubr.f32.mxu1 %v6898_v20 }
 0x2a4   :  { %5610 = vmatprep.subr.bf16.mxu1 %v5609_v37  ;;  %v6447_v32 = vpop.permute.xlu1 %6446  ;;  %v1853_v45 = vsel %vm600_vm4, %v6444_v31, %v6439_v30  ;;  %v1848_v48 = vsel %vm600_vm4, %v6438_v25, %v6443_v26 }
 0x2a5   :  { %v6452_v34 = vpop.permute.xlu0 %6451  ;;  %v6449_v37 = vunpack.i.h.bf16 %v6447_v32  ;;  %v6448_v39 = vunpack.i.l.bf16 %v6447_v32 }
 0x2a6   :  { %5398 = vmatmul.mubr.msk.f32.gmra.mrb[2].mxu1 %vm103_vm2, %v1320_v38  ;;  %v1852_v38 = vsel %vm600_vm4, %v6443_v26, %v6438_v25  ;;  %v6454_v40 = vunpack.i.h.bf16 %v6452_v34 }
 0x2a7   :  { %5612 = vmatpush1.bf16.msra.mxu1 %v5611_v41  ;;  %1541 = vmatprep.mubr.f32.mxu1 %v6898_v20  ;;  %v6453_v41 = vunpack.i.l.bf16 %v6452_v34  ;;  %v5625_v49 = vpack.c.bf16 %v1853_v45, %v1852_v38  ;;  %v1858_v45 = vld [vmem:[#allocation4 + $0x98] sm:$0xff] }
 0x2a8   :  { %5614 = vmatprep.subr.bf16.mxu1 %v5613_v46  ;;  %v5623_v46 = vpack.c.bf16 %v1847_v35, %v1846_v36  ;;  %v6457_v54 = vpop.permute.xlu1 %6456  ;;  %v1985_v29 = vsel %vm739_vm5, %v6449_v37, %v6454_v40 }
 0x2a9   :  { %v1988_v51 = vsel %vm739_vm5, %v6453_v41, %v6448_v39  ;;  %v6462_v55 = vpop.permute.xlu0 %6461  ;;  %v6459_v44 = vunpack.i.h.bf16 %v6457_v54  ;;  %v6458_v16 = vunpack.i.l.bf16 %v6457_v54  ;;  %v1984_v11 = vsel %vm739_vm5, %v6448_v39, %v6453_v41  ;;  %v1993_v54 = vld [vmem:[#allocation4 + $0xa0] sm:$0xff] }
 0x2aa   :  { %5399 = vmatmul.mubr.msk.f32.gmra.mrb[4].mxu1 %vm103_vm2, %v1321_v47  ;;  %v1849_v47 = vsel %vm600_vm4, %v6439_v30, %v6444_v31  ;;  %v6464_v17 = vunpack.i.h.bf16 %v6462_v55  ;;  %v6463_v42 = vunpack.i.l.bf16 %v6462_v55  ;;  %v1856_v30 = vld [vmem:[#allocation4 + $0x88] sm:$0xff] }
 0x2ab   :  { %1547 = vmatprep.mubr.f32.mxu1 %v6898_v20  ;;  %v5627_v53 = vpack.c.bf16 %v1849_v47, %v1848_v48 }
 0x2ac   :  { %v1986_v25 = vsel %vm739_vm5, %v6458_v16, %v6463_v42 }
 0x2ae   :  { %5400 = vmatmul.mubr.msk.f32.gmra.mrb[6].mxu1 %vm103_vm2, %v1322_v52  ;;  %v1989_v52 = vsel %vm739_vm5, %v6454_v40, %v6449_v37  ;;  %v1857_v37 = vld [vmem:[#allocation4 + $0x90] sm:$0xff] }
 0x2af   :  { %1659 = vmatprep.mubr.f32.mxu1 %v6898_v20  ;;  %v5629_v56 = vpack.c.bf16 %v1989_v52, %v1988_v51 }
 0x2b2   :  { %5401 = vmatmul.mubr.msk.f32.vlgmr.msra.gmra.mrb[0].mxu1 %vm103_vm2, %v1579_v8  ;;  %v6467_v8 = vpop.permute.xlu1 %6466 }
 0x2b3   :  { %5616 = vmatpush1.bf16.msra.mxu1 %v5615_v28  ;;  %1665 = vmatprep.mubr.f32.mxu1 %v6898_v20  ;;  %v6472_v28 = vpop.permute.xlu0 %6471  ;;  %v6469_v15 = vunpack.i.h.bf16 %v6467_v8  ;;  %v6468_v18 = vunpack.i.l.bf16 %v6467_v8 }
 0x2b4   :  { %5618 = vmatprep.subr.bf16.mxu1 %v5617_v14  ;;  %v1990_v14 = vsel %vm739_vm5, %v6463_v42, %v6458_v16  ;;  %v6473_v21 = vunpack.i.l.bf16 %v6472_v28 }
 0x2b6   :  { %5402 = vmatmul.mubr.msk.f32.gmra.mrb[2].mxu1 %vm103_vm2, %v1580_v57  ;;  %v1991_v57 = vsel %vm739_vm5, %v6464_v17, %v6459_v44  ;;  %v2126_v31 = vsel %vm878_vm6, %v6473_v21, %v6468_v18  ;;  %v6477_v34 = vpop.permute.xlu1 %6476  ;;  %v2122_v48 = vsel %vm878_vm6, %v6468_v18, %v6473_v21  ;;  %v1996_v21 = vld [vmem:[#allocation4 + $0xb8] sm:$0xff] }
 0x2b7   :  { %5620 = vmatpush1.bf16.msra.mxu1 %v5619_v19  ;;  %1671 = vmatprep.mubr.f32.mxu1 %v6898_v20  ;;  %v6474_v19 = vunpack.i.h.bf16 %v6472_v28  ;;  %v5633_v26 = vpack.c.bf16 %v1991_v57, %v1990_v14  ;;  %v6482_v35 = vpop.permute.xlu0 %6481  ;;  %v6478_v38 = vunpack.i.l.bf16 %v6477_v34  ;;  %v6479_v40 = vunpack.i.h.bf16 %v6477_v34  ;;  %v1995_v14 = vld [vmem:[#allocation4 + $0xb0] sm:$0xff] }
 0x2b8   :  { %5622 = vmatprep.subr.bf16.mxu1 %v5621_v23  ;;  %v5631_v23 = vpack.c.bf16 %v1985_v29, %v1984_v11  ;;  %v6483_v39 = vunpack.i.l.bf16 %v6482_v35  ;;  %v6484_v41 = vunpack.i.h.bf16 %v6482_v35  ;;  %v2131_v35 = vld [vmem:[#allocation4 + $0xc0] sm:$0xff] }
 0x2b9   :  { %v2127_v32 = vsel %vm878_vm6, %v6474_v19, %v6469_v15  ;;  %v2123_v47 = vsel %vm878_vm6, %v6469_v15, %v6474_v19 }
 0x2ba   :  { %5403 = vmatmul.mubr.msk.f32.gmra.mrb[4].mxu1 %vm103_vm2, %v1581_v24  ;;  %v1987_v24 = vsel %vm739_vm5, %v6459_v44, %v6464_v17  ;;  %v5637_v36 = vpack.c.bf16 %v2127_v32, %v2126_v31  ;;  %v2129_v55 = vsel %vm878_vm6, %v6484_v41, %v6479_v40  ;;  %v2124_v44 = vsel %vm878_vm6, %v6478_v38, %v6483_v39  ;;  %v1994_v17 = vld [vmem:[#allocation4 + $0xa8] sm:$0xff] }
 0x2bb   :  { %1677 = vmatprep.mubr.f32.mxu1 %v6898_v20 }
 0x2be   :  { %5404 = vmatmul.mubr.msk.f32.gmra.mrb[6].mxu1 %vm103_vm2, %v1582_v33  ;;  %v5635_v33 = vpack.c.bf16 %v1987_v24, %v1986_v25 }
 0x2bf   :  { %1797 = vmatprep.mubr.f32.mxu1 %v6898_v20 }
 0x2c2   :  { %5405 = vmatmul.mubr.msk.f32.vlgmr.msra.gmra.mrb[0].mxu1 %vm103_vm2, %v1717_v43  ;;  %v6487_v43 = vpop.permute.xlu1 %6486 }
 0x2c3   :  { %5624 = vmatpush1.bf16.msra.mxu1 %v5623_v46  ;;  %1803 = vmatprep.mubr.f32.mxu1 %v6898_v20  ;;  %v6492_v46 = vpop.permute.xlu0 %6491  ;;  %v6488_v51 = vunpack.i.l.bf16 %v6487_v43 }
 0x2c4   :  { %5626 = vmatprep.subr.bf16.mxu1 %v5625_v49  ;;  %v6489_v49 = vunpack.i.h.bf16 %v6487_v43  ;;  %v6494_v52 = vunpack.i.h.bf16 %v6492_v46 }
 0x2c6   :  { %5406 = vmatmul.mubr.msk.f32.gmra.mrb[2].mxu1 %vm103_vm2, %v1718_v50  ;;  %v2128_v50 = vsel %vm878_vm6, %v6483_v39, %v6478_v38  ;;  %v6497_v28 = vpop.permute.xlu1 %6496  ;;  %v2261_v24 = vsel %vm1017_vm7, %v6489_v49, %v6494_v52 }
 0x2c7   :  { %5628 = vmatpush1.bf16.msra.mxu1 %v5627_v53  ;;  %1809 = vmatprep.mubr.f32.mxu1 %v6898_v20  ;;  %v6493_v53 = vunpack.i.l.bf16 %v6492_v46  ;;  %v5641_v16 = vpack.c.bf16 %v2129_v55, %v2128_v50  ;;  %v6502_v29 = vpop.permute.xlu0 %6501  ;;  %v6499_v57 = vunpack.i.h.bf16 %v6497_v28  ;;  %v6498_v15 = vunpack.i.l.bf16 %v6497_v28 }
 0x2c8   :  { %5630 = vmatprep.subr.bf16.mxu1 %v5629_v56  ;;  %v5639_v56 = vpack.c.bf16 %v2123_v47, %v2122_v48  ;;  %v6504_v18 = vunpack.i.h.bf16 %v6502_v29  ;;  %v6503_v19 = vunpack.i.l.bf16 %v6502_v29  ;;  %v2133_v47 = vld [vmem:[#allocation4 + $0xd0] sm:$0xff] }
 0x2c9   :  { %v2264_v42 = vsel %vm1017_vm7, %v6493_v53, %v6488_v51  ;;  %v2260_v25 = vsel %vm1017_vm7, %v6488_v51, %v6493_v53 }
 0x2ca   :  { %5407 = vmatmul.mubr.msk.f32.gmra.mrb[4].mxu1 %vm103_vm2, %v1719_v58  ;;  %v2125_v58 = vsel %vm878_vm6, %v6479_v40, %v6484_v41  ;;  %v2262_v38 = vsel %vm1017_vm7, %v6498_v15, %v6503_v19  ;;  %v2132_v40 = vld [vmem:[#allocation4 + $0xc8] sm:$0xff] }
 0x2cb   :  { %1815 = vmatprep.mubr.f32.mxu1 %v6898_v20  ;;  %v5643_v8 = vpack.c.bf16 %v2125_v58, %v2124_v44 }
 0x2ce   :  { %5408 = vmatmul.mubr.msk.f32.gmra.mrb[6].mxu1 %vm103_vm2, %v1720_v59  ;;  %v2265_v59 = vsel %vm1017_vm7, %v6494_v52, %v6489_v49 }
 0x2cf   :  { %1935 = vmatprep.mubr.f32.mxu1 %v6898_v20  ;;  %v5645_v11 = vpack.c.bf16 %v2265_v59, %v2264_v42 }
 0x2d2   :  { %5409 = vmatmul.mubr.msk.f32.vlgmr.msra.gmra.mrb[0].mxu1 %vm103_vm2, %v1855_v22  ;;  %v6507_v22 = vpop.permute.xlu1 %6506 }
 0x2d3   :  { %5632 = vmatpush1.bf16.msra.mxu1 %v5631_v23  ;;  %1941 = vmatprep.mubr.f32.mxu1 %v6898_v20  ;;  %v6512_v23 = vpop.permute.xlu0 %6511  ;;  %v6509_v31 = vunpack.i.h.bf16 %v6507_v22  ;;  %v6508_v32 = vunpack.i.l.bf16 %v6507_v22 }
 0x2d4   :  { %5634 = vmatprep.subr.bf16.mxu1 %v5633_v26  ;;  %v2266_v26 = vsel %vm1017_vm7, %v6503_v19, %v6498_v15  ;;  %v6513_v34 = vunpack.i.l.bf16 %v6512_v23 }
 0x2d6   :  { %5410 = vmatmul.mubr.msk.f32.gmra.mrb[2].mxu1 %vm103_vm2, %v1856_v30  ;;  %v2267_v30 = vsel %vm1017_vm7, %v6504_v18, %v6499_v57  ;;  %v2402_v41 = vsel %vm1156_vm8, %v6513_v34, %v6508_v32  ;;  %v6517_v48 = vpop.permute.xlu1 %6516  ;;  %v2398_v59 = vsel %vm1156_vm8, %v6508_v32, %v6513_v34  ;;  %v2272_v34 = vld [vmem:[#allocation4 + $0xf8] sm:$0xff] }
 0x2d7   :  { %5636 = vmatpush1.bf16.msra.mxu1 %v5635_v33  ;;  %1947 = vmatprep.mubr.f32.mxu1 %v6898_v20  ;;  %v6514_v33 = vunpack.i.h.bf16 %v6512_v23  ;;  %v5649_v39 = vpack.c.bf16 %v2267_v30, %v2266_v26  ;;  %v6522_v49 = vpop.permute.xlu0 %6521  ;;  %v6519_v50 = vunpack.i.h.bf16 %v6517_v48  ;;  %v6518_v51 = vunpack.i.l.bf16 %v6517_v48 }
 0x2d8   :  { %5638 = vmatprep.subr.bf16.mxu1 %v5637_v36  ;;  %v5647_v36 = vpack.c.bf16 %v2261_v24, %v2260_v25  ;;  %v6524_v52 = vunpack.i.h.bf16 %v6522_v49  ;;  %v6523_v53 = vunpack.i.l.bf16 %v6522_v49  ;;  %v2271_v24 = vld [vmem:[#allocation4 + $0xf0] sm:$0xff]  ;;  %v5733_v48 = vpack.c.bf16 %v2726_v3, %v2724_v2 }
 0x2d9   :  { %v2403_v43 = vsel %vm1156_vm8, %v6514_v33, %v6509_v31  ;;  %v2399_v42 = vsel %vm1156_vm8, %v6509_v31, %v6514_v33  ;;  %v2409_v49 = vld [vmem:[#allocation4 + $0x110] sm:$0xff]  ;;  %v5735_v2 = vpack.c.bf16 %v2725_v1, %v2723_v0  ;;  %v5737_v3 = vpack.c.bf16 %v2730_v13, %v2728_v12 }
 0x2da   :  { %5411 = vmatmul.mubr.msk.f32.gmra.mrb[4].mxu1 %vm103_vm2, %v1857_v37  ;;  %v2263_v37 = vsel %vm1017_vm7, %v6499_v57, %v6504_v18  ;;  %v5653_v46 = vpack.c.bf16 %v2403_v43, %v2402_v41  ;;  %v6527_v55 = vpop.permute.xlu1 %6526  ;;  %v2404_v28 = vsel %vm1156_vm8, %v6523_v53, %v6518_v51  ;;  %v2405_v29 = vsel %vm1156_vm8, %v6524_v52, %v6519_v50 }
 0x2db   :  { %1953 = vmatprep.mubr.f32.mxu1 %v6898_v20  ;;  %v6529_v58 = vunpack.i.h.bf16 %v6527_v55  ;;  %v6528_v44 = vunpack.i.l.bf16 %v6527_v55  ;;  %v2401_v15 = vsel %vm1156_vm8, %v6519_v50, %v6524_v52  ;;  %v2400_v18 = vsel %vm1156_vm8, %v6518_v51, %v6523_v53  ;;  %v2410_v50 = vld [vmem:[#allocation4 + $0x118] sm:$0xff] }
 0x2dc   :  { %v5657_v19 = vpack.c.bf16 %v2405_v29, %v2404_v28  ;;  %v5659_v23 = vpack.c.bf16 %v2401_v15, %v2400_v18  ;;  %v2762_v28 = vld [vmem:[#allocation2 + $0x38] sm:$0xff]  ;;  %v2557_v29 = vld [vmem:[%s8649_s5 + $0x28] sm:$0xff] }
 0x2de   :  { %5412 = vmatmul.mubr.msk.f32.gmra.mrb[6].mxu1 %vm103_vm2, %v1858_v45  ;;  %v5651_v45 = vpack.c.bf16 %v2263_v37, %v2262_v38  ;;  %v6537_v25 = vpop.permute.xlu1 %6536 }
 0x2df   :  { %2073 = vmatprep.mubr.f32.mxu1 %v6898_v20  ;;  %v6539_v30 = vunpack.i.h.bf16 %v6537_v25  ;;  %v6538_v31 = vunpack.i.l.bf16 %v6537_v25 }
 0x2e2   :  { %5413 = vmatmul.mubr.msk.f32.vlgmr.msra.gmra.mrb[0].mxu1 %vm103_vm2, %v1993_v54  ;;  %v2134_v54 = vld [vmem:[#allocation4 + $0xd8] sm:$0xff]  ;;  %v6547_v51 = vpop.permute.xlu1 %6546 }
 0x2e3   :  { %5640 = vmatpush1.bf16.msra.mxu1 %v5639_v56  ;;  %2079 = vmatprep.mubr.f32.mxu1 %v6898_v20  ;;  %v6532_v56 = vpop.permute.xlu0 %6531  ;;  %v6549_v53 = vunpack.i.h.bf16 %v6547_v51 }
 0x2e4   :  { %5642 = vmatprep.subr.bf16.mxu1 %v5641_v16  ;;  %v6534_v16 = vunpack.i.h.bf16 %v6532_v56 }
 0x2e6   :  { %5414 = vmatmul.mubr.msk.f32.gmra.mrb[2].mxu1 %vm103_vm2, %v1994_v17  ;;  %v6533_v17 = vunpack.i.l.bf16 %v6532_v56  ;;  %v2756_v57 = vsel %vm89_vm0, %v6534_v16, %v6529_v58  ;;  %v6557_v0 = vpop.permute.xlu1 %6556 }
 0x2e7   :  { %5644 = vmatpush1.bf16.msra.mxu1 %v5643_v8  ;;  %2085 = vmatprep.mubr.f32.mxu1 %v6898_v20  ;;  %v2269_v8 = vld [vmem:[#allocation4 + $0xe0] sm:$0xff]  ;;  %v6542_v26 = vpop.permute.xlu0 %6541  ;;  %v6558_v5 = vunpack.i.l.bf16 %v6557_v0  ;;  %v6559_v12 = vunpack.i.h.bf16 %v6557_v0  ;;  %v2733_v0 = vld [vmem:[#allocation2 + $0x10] sm:$0xff] }
 0x2e8   :  { %5646 = vmatprep.subr.bf16.mxu1 %v5645_v11  ;;  %v5655_v11 = vpack.c.bf16 %v2399_v42, %v2398_v59  ;;  %v6544_v32 = vunpack.i.h.bf16 %v6542_v26  ;;  %v6543_v33 = vunpack.i.l.bf16 %v6542_v26  ;;  %v2556_v26 = vld [vmem:[%s8649_s5 + $0x20] sm:$0xff] }
 0x2ea   :  { %5415 = vmatmul.mubr.msk.f32.gmra.mrb[4].mxu1 %vm103_vm2, %v1995_v14  ;;  %v2755_v14 = vsel %vm89_vm0, %v6533_v17, %v6528_v44  ;;  %v2757_v37 = vsel %vm89_vm0, %v6543_v33, %v6538_v31  ;;  %v2758_v38 = vsel %vm89_vm0, %v6544_v32, %v6539_v30  ;;  %v2754_v41 = vsel %vm89_vm0, %v6539_v30, %v6544_v32  ;;  %v2558_v30 = vld [vmem:[%s8649_s5 + $0x30] sm:$0xff]  ;;  %v2561_v32 = vld [vmem:[%s8649_s5 + $0x48] sm:$0xff] }
 0x2eb   :  { %2091 = vmatprep.mubr.f32.mxu1 %v6898_v20  ;;  %v5725_v22 = vpack.c.bf16 %v2756_v57, %v2755_v14  ;;  %v2753_v43 = vsel %vm89_vm0, %v6538_v31, %v6543_v33  ;;  %v6552_v52 = vpop.permute.xlu0 %6551  ;;  %v5667_v31 = vpack.c.bf16 %v2558_v30, %v2556_v26  ;;  %v2563_v33 = vld [vmem:[%s8649_s5 + $0x58] sm:$0xff]  ;;  %v2989_v26 = vld [vmem:[#allocation2 + $0x40] sm:$0xff] }
 0x2ec   :  { %v6554_v62 = vunpack.i.h.bf16 %v6552_v52  ;;  %v6553_v55 = vunpack.i.l.bf16 %v6552_v52  ;;  %v2571_v52 = vld [vmem:[%s8649_s5 + $0x98] sm:$0xff] }
 0x2ee   :  { %5416 = vmatmul.mubr.msk.f32.gmra.mrb[6].mxu1 %vm103_vm2, %v1996_v21  ;;  %v2270_v21 = vld [vmem:[#allocation4 + $0xe8] sm:$0xff]  ;;  %v2982_v59 = vsel %vm322_vm1, %v6549_v53, %v6554_v62 }
 0x2ef   :  { %2211 = vmatprep.mubr.f32.mxu1 %v6898_v20  ;;  %v6562_v1 = vpop.permute.xlu0 %6561 }
 0x2f0   :  { %v6563_v9 = vunpack.i.l.bf16 %v6562_v1  ;;  %v6564_v13 = vunpack.i.h.bf16 %v6562_v1 }
 0x2f2   :  { %5417 = vmatmul.mubr.msk.f32.vlgmr.msra.gmra.mrb[0].mxu1 %vm103_vm2, %v2131_v35  ;;  %v2752_v35 = vsel %vm89_vm0, %v6529_v58, %v6534_v16  ;;  %v2986_v58 = vsel %vm322_vm1, %v6554_v62, %v6549_v53  ;;  %v2552_v16 = vld [vmem:[%s8649_s5] sm:$0xff]  ;;  %v2987_v18 = vsel %vm322_vm1, %v6563_v9, %v6558_v5  ;;  %v2988_v25 = vsel %vm322_vm1, %v6564_v13, %v6559_v12 }
 0x2f3   :  { %5648 = vmatpush1.bf16.msra.mxu1 %v5647_v36  ;;  %2217 = vmatprep.mubr.f32.mxu1 %v6898_v20  ;;  %v2751_v36 = vsel %vm89_vm0, %v6528_v44, %v6533_v17  ;;  %v2760_v44 = vld [vmem:[#allocation2 + $0x28] sm:$0xff]  ;;  %v2554_v17 = vld [vmem:[%s8649_s5 + $0x10] sm:$0xff]  ;;  %v7692_v15 = vpop.permute.xlu0 %6571 }
 0x2f4   :  { %5650 = vmatprep.subr.bf16.mxu1 %v5649_v39  ;;  %v5727_v39 = vpack.c.bf16 %v2752_v35, %v2751_v36  ;;  %v5663_v42 = vpack.c.bf16 %v2554_v17, %v2552_v16  ;;  %v5669_v36 = vpack.c.bf16 %v2563_v33, %v2561_v32 }
 0x2f6   :  { %5418 = vmatmul.mubr.msk.f32.gmra.mrb[2].mxu1 %vm103_vm2, %v2132_v40  ;;  %v2407_v40 = vld [vmem:[#allocation4 + $0x100] sm:$0xff]  ;;  %5664 = vmatpush1.bf16.msra.mxu0 %v5663_v42 }
 0x2f7   :  { %5652 = vmatpush1.bf16.msra.mxu1 %v5651_v45  ;;  %2223 = vmatprep.mubr.f32.mxu1 %v6898_v20  ;;  %v5729_v45 = vpack.c.bf16 %v2758_v38, %v2757_v37  ;;  %v2562_v37 = vld [vmem:[%s8649_s5 + $0x50] sm:$0xff]  ;;  %v2565_v38 = vld [vmem:[%s8649_s5 + $0x68] sm:$0xff] }
 0x2f8   :  { %5654 = vmatprep.subr.bf16.mxu1 %v5653_v46  ;;  %v5731_v46 = vpack.c.bf16 %v2754_v41, %v2753_v43  ;;  %v2983_v41 = vsel %vm322_vm1, %v6558_v5, %v6563_v9  ;;  %v5745_v43 = vpack.c.bf16 %v2988_v25, %v2987_v18  ;;  %v2572_v9 = vld [vmem:[%s8649_s5 + $0xa0] sm:$0xff] }
 0x2fa   :  { %5419 = vmatmul.mubr.msk.f32.gmra.mrb[4].mxu1 %vm103_vm2, %v2133_v47  ;;  %v2408_v47 = vld [vmem:[#allocation4 + $0x108] sm:$0xff] }
 0x2fb   :  { %2229 = vmatprep.mubr.f32.mxu1 %v6898_v20 }
 0x2fe   :  { %5420 = vmatmul.mubr.msk.f32.gmra.mrb[6].mxu1 %vm103_vm2, %v2134_v54  ;;  %v6548_v54 = vunpack.i.l.bf16 %v6547_v51  ;;  %v2569_v51 = vld [vmem:[%s8649_s5 + $0x88] sm:$0xff] }
 0x2ff   :  { %2349 = vmatprep.mubr.f32.mxu1 %v6898_v20 }
 0x300   :  { %v2985_v56 = vsel %vm322_vm1, %v6553_v55, %v6548_v54  ;;  %v2981_v14 = vsel %vm322_vm1, %v6548_v54, %v6553_v55  ;;  %v2732_v54 = vld [vmem:[#allocation2 + $0x8] sm:$0xff] }
 0x301   :  { %v5741_v61 = vpack.c.bf16 %v2986_v58, %v2985_v56  ;;  %v5743_v35 = vpack.c.bf16 %v2982_v59, %v2981_v14  ;;  %v2570_v56 = vld [vmem:[%s8649_s5 + $0x90] sm:$0xff]  ;;  %v6582_v58 = vpop.permute.xlu0 %6581  ;;  %v2734_v59 = vld [vmem:[#allocation2 + $0x18] sm:$0xff] }
 0x302   :  { %5421 = vmatmul.mubr.msk.f32.vlgmr.msra.gmra.mrb[0].mxu1 %vm103_vm2, %v2269_v8  ;;  %v7680_v8 = vpop.permute.xlu1 %6566  ;;  %v6583_v7 = vunpack.i.l.bf16 %v6582_v58 }
 0x303   :  { %5656 = vmatpush1.bf16.msra.mxu1 %v5655_v11  ;;  %2355 = vmatprep.mubr.f32.mxu1 %v6898_v20  ;;  %v2559_v11 = vld [vmem:[%s8649_s5 + $0x38] sm:$0xff]  ;;  %v6569_v57 = vunpack.i.h.bf16 %v7680_v8 }
 0x304   :  { %5658 = vmatprep.subr.bf16.mxu1 %v5657_v19  ;;  %v5665_v19 = vpack.c.bf16 %v2559_v11, %v2557_v29 }
 0x305   :  { %v7800_v29 = vpop.permute.xlu0 %6591 }
 0x306   :  { %5422 = vmatmul.mubr.msk.f32.gmra.mrb[2].mxu1 %vm103_vm2, %v2270_v21  ;;  %v6568_v21 = vunpack.i.l.bf16 %v7680_v8  ;;  %5666 = vmatprep.subr.bf16.mxu0 %v5665_v19  ;;  %v5683_v8 = vpack.c.bf16 %v2574_v10, %v2572_v9  ;;  %v6593_v18 = vunpack.i.l.bf16 %v7800_v29 }
 0x307   :  { %5660 = vmatpush1.bf16.msra.mxu1 %v5659_v23  ;;  %2361 = vmatprep.mubr.f32.mxu1 %v6898_v20  ;;  %v6573_v23 = vunpack.i.l.bf16 %v7692_v15 }
 0x308   :  { %5726 = vmatprep.subr.bf16.mxu1 %v5725_v22  ;;  %v6574_v22 = vunpack.i.h.bf16 %v7692_v15  ;;  %5668 = vmatpush1.bf16.msra.mxu0 %v5667_v31  ;;  %v6594_v15 = vunpack.i.h.bf16 %v7800_v29  ;;  %v2597_v29 = vld [vmem:[%s8649_s5 + $0x168] sm:$0xff] }
 0x309   :  { %5670 = vmatprep.subr.bf16.mxu0 %v5669_v36  ;;  %v3118_v17 = vsel %vm461_vm3, %v6568_v21, %v6573_v23 }
 0x30a   :  { %5423 = vmatmul.mubr.msk.f32.gmra.mrb[4].mxu1 %vm103_vm2, %v2271_v24  ;;  %v2731_v24 = vld [vmem:[#allocation2] sm:$0xff]  ;;  %v3119_v16 = vsel %vm461_vm3, %v6569_v57, %v6574_v22 }
 0x30b   :  { %2367 = vmatprep.mubr.f32.mxu1 %v6898_v20  ;;  %v5751_v25 = vpack.c.bf16 %v3119_v16, %v3118_v17 }
 0x30e   :  { %5424 = vmatmul.mubr.msk.f32.gmra.mrb[6].mxu1 %vm103_vm2, %v2272_v34  ;;  %v2560_v34 = vld [vmem:[%s8649_s5 + $0x40] sm:$0xff] }
 0x30f   :  { %2487 = vmatprep.mubr.f32.mxu1 %v6898_v20 }
 0x312   :  { %5425 = vmatmul.mubr.msk.f32.vlgmr.msra.gmra.mrb[0].mxu1 %vm103_vm2, %v2407_v40  ;;  %v2984_v40 = vsel %vm322_vm1, %v6559_v12, %v6564_v13  ;;  %v2577_v12 = vld [vmem:[%s8649_s5 + $0xc8] sm:$0xff]  ;;  %v2579_v13 = vld [vmem:[%s8649_s5 + $0xd8] sm:$0xff] }
 0x313   :  { %2493 = vmatprep.mubr.f32.mxu1 %v6898_v20  ;;  %5728 = vmatpush1.bf16.msra.mxu1 %v5727_v39  ;;  %v2567_v39 = vld [vmem:[%s8649_s5 + $0x78] sm:$0xff]  ;;  %v5747_v53 = vpack.c.bf16 %v2984_v40, %v2983_v41  ;;  %v5685_v19 = vpack.c.bf16 %v2579_v13, %v2577_v12 }
 0x314   :  { %5730 = vmatprep.subr.bf16.mxu1 %v5729_v45  ;;  %v5671_v45 = vpack.c.bf16 %v2562_v37, %v2560_v34  ;;  %v2580_v37 = vld [vmem:[%s8649_s5 + $0xe0] sm:$0xff]  ;;  %v2587_v40 = vld [vmem:[%s8649_s5 + $0x118] sm:$0xff] }
 0x316   :  { %5426 = vmatmul.mubr.msk.f32.gmra.mrb[2].mxu1 %vm103_vm2, %v2408_v47  ;;  %v3123_v47 = vsel %vm461_vm3, %v6574_v22, %v6569_v57  ;;  %5672 = vmatpush1.bf16.msra.mxu0 %v5671_v45  ;;  %v2578_v22 = vld [vmem:[%s8649_s5 + $0xd0] sm:$0xff] }
 0x317   :  { %2499 = vmatprep.mubr.f32.mxu1 %v6898_v20  ;;  %5732 = vmatpush1.bf16.msra.mxu1 %v5731_v46  ;;  %v3122_v46 = vsel %vm461_vm3, %v6573_v23, %v6568_v21  ;;  %v2576_v21 = vld [vmem:[%s8649_s5 + $0xc0] sm:$0xff]  ;;  %v2581_v23 = vld [vmem:[%s8649_s5 + $0xe8] sm:$0xff] }
 0x318   :  { %5734 = vmatprep.subr.bf16.mxu1 %v5733_v48  ;;  %v5673_v48 = vpack.c.bf16 %v2567_v39, %v2565_v38  ;;  %v5749_v62 = vpack.c.bf16 %v3123_v47, %v3122_v46  ;;  %v5687_v33 = vpack.c.bf16 %v2578_v22, %v2576_v21  ;;  %v2582_v38 = vld [vmem:[%s8649_s5 + $0xf0] sm:$0xff]  ;;  %v2585_v39 = vld [vmem:[%s8649_s5 + $0x108] sm:$0xff] }
 0x319   :  { %v5691_v46 = vpack.c.bf16 %v2582_v38, %v2580_v37  ;;  %v2600_v37 = vld [vmem:[%s8649_s5 + $0x180] sm:$0xff]  ;;  %v2602_v38 = vld [vmem:[%s8649_s5 + $0x190] sm:$0xff] }
 0x31a   :  { %5427 = vmatmul.mubr.msk.f32.gmra.mrb[4].mxu1 %vm103_vm2, %v2409_v49  ;;  %v2564_v49 = vld [vmem:[%s8649_s5 + $0x60] sm:$0xff]  ;;  %5674 = vmatprep.subr.bf16.mxu0 %v5673_v48  ;;  %v5693_v48 = vpack.c.bf16 %v2587_v40, %v2585_v39  ;;  %v2605_v40 = vld [vmem:[%s8649_s5 + $0x1a8] sm:$0xff] }
 0x31b   :  { %2505 = vmatprep.mubr.f32.mxu1 %v6898_v20 }
 0x31e   :  { %5428 = vmatmul.mubr.msk.f32.gmra.mrb[6].mxu1 %vm103_vm2, %v2410_v50  ;;  %v2566_v50 = vld [vmem:[%s8649_s5 + $0x70] sm:$0xff] }
 0x31f   :  { %2839 = vmatprep.mubr.f32.mxu1 %v6898_v20  ;;  %v5675_v55 = vpack.c.bf16 %v2566_v50, %v2564_v49  ;;  %v2584_v49 = vld [vmem:[%s8649_s5 + $0x100] sm:$0xff]  ;;  %v2586_v50 = vld [vmem:[%s8649_s5 + $0x110] sm:$0xff] }
 0x321   :  { %5676 = vmatpush1.bf16.msra.mxu0 %v5675_v55 }
 0x322   :  { %5437 = vmatmul.mubr.msk.f32.vlgmr.msra.gmra.mrb[8].mxu1 %vm103_vm2, %v2759_v63  ;;  %v6577_v63 = vpop.permute.xlu1 %6576 }
 0x323   :  { %2845 = vmatprep.mubr.f32.mxu1 %v6898_v20  ;;  %5736 = vmatpush1.bf16.msra.mxu1 %v5735_v2  ;;  %v5677_v2 = vpack.c.bf16 %v2571_v52, %v2569_v51  ;;  %v6578_v1 = vunpack.i.l.bf16 %v6577_v63  ;;  %v6602_v51 = vpop.permute.xlu0 %6601  ;;  %v2589_v52 = vld [vmem:[%s8649_s5 + $0x128] sm:$0xff] }
 0x324   :  { %5738 = vmatprep.subr.bf16.mxu1 %v5737_v3  ;;  %v2568_v3 = vld [vmem:[%s8649_s5 + $0x80] sm:$0xff]  ;;  %v6603_v55 = vunpack.i.l.bf16 %v6602_v51 }
 0x325   :  { %v5679_v4 = vpack.c.bf16 %v2570_v56, %v2568_v3  ;;  %5678 = vmatprep.subr.bf16.mxu0 %v5677_v2  ;;  %v3124_v11 = vsel %vm461_vm3, %v6583_v7, %v6578_v1  ;;  %v3120_v31 = vsel %vm461_vm3, %v6578_v1, %v6583_v7  ;;  %v6604_v3 = vunpack.i.h.bf16 %v6602_v51  ;;  %v2992_v7 = vld [vmem:[#allocation2 + $0x58] sm:$0xff]  ;;  %v2604_v51 = vld [vmem:[%s8649_s5 + $0x1a0] sm:$0xff] }
 0x326   :  { %5438 = vmatmul.mubr.msk.f32.gmra.mrb[10].mxu1 %vm103_vm2, %v2760_v44  ;;  %v2573_v44 = vld [vmem:[%s8649_s5 + $0xa8] sm:$0xff]  ;;  %v7796_v42 = vpop.permute.xlu1 %6586 }
 0x327   :  { %2851 = vmatprep.mubr.f32.mxu1 %v6898_v20  ;;  %5740 = vmatpush1.bf16.msra.mxu1 %v5739_v60  ;;  %v2575_v60 = vld [vmem:[%s8649_s5 + $0xb8] sm:$0xff]  ;;  %v6588_v57 = vunpack.i.l.bf16 %v7796_v42  ;;  %v7889_v9 = vpop.permute.xlu0 %6611 }
 0x328   :  { %5742 = vmatprep.subr.bf16.mxu1 %v5741_v61  ;;  %v6579_v61 = vunpack.i.h.bf16 %v6577_v63  ;;  %v5681_v5 = vpack.c.bf16 %v2575_v60, %v2573_v44  ;;  %5680 = vmatpush1.bf16.msra.mxu0 %v5679_v4  ;;  %v5695_v63 = vpack.c.bf16 %v2586_v50, %v2584_v49  ;;  %v2590_v44 = vld [vmem:[%s8649_s5 + $0x130] sm:$0xff]  ;;  %v2593_v60 = vld [vmem:[%s8649_s5 + $0x148] sm:$0xff]  ;;  %v6614_v13 = vunpack.i.h.bf16 %v7889_v9 }
 0x329   :  { %v3259_v34 = vsel %vm600_vm4, %v6593_v18, %v6588_v57  ;;  %v3255_v1 = vsel %vm600_vm4, %v6588_v57, %v6593_v18  ;;  %v6613_v16 = vunpack.i.l.bf16 %v7889_v9  ;;  %v5711_v49 = vpack.c.bf16 %v2602_v38, %v2600_v37  ;;  %v3263_v9 = vld [vmem:[#allocation2 + $0x80] sm:$0xff] }
 0x32a   :  { %5439 = vmatmul.mubr.msk.f32.gmra.mrb[12].mxu1 %vm103_vm2, %v2761_v6  ;;  %v6584_v6 = vunpack.i.h.bf16 %v6582_v58  ;;  %5682 = vmatprep.subr.bf16.mxu0 %v5681_v5  ;;  %v6597_v47 = vpop.permute.xlu1 %6596  ;;  %v2588_v58 = vld [vmem:[%s8649_s5 + $0x120] sm:$0xff] }
 0x32b   :  { %2857 = vmatprep.mubr.f32.mxu1 %v6898_v20  ;;  %v6599_v2 = vunpack.i.h.bf16 %v6597_v47  ;;  %v5699_v12 = vpack.c.bf16 %v2590_v44, %v2588_v58  ;;  %v6622_v39 = vpop.permute.xlu0 %6621 }
 0x32c   :  { %v3125_v14 = vsel %vm461_vm3, %v6584_v6, %v6579_v61  ;;  %v3121_v30 = vsel %vm461_vm3, %v6579_v61, %v6584_v6  ;;  %5684 = vmatpush1.bf16.msra.mxu0 %v5683_v8  ;;  %v2595_v61 = vld [vmem:[%s8649_s5 + $0x158] sm:$0xff]  ;;  %v3126_v8 = vld [vmem:[#allocation2 + $0x60] sm:$0xff] }
 0x32d   :  { %v5753_v32 = vpack.c.bf16 %v3125_v14, %v3124_v11  ;;  %5686 = vmatprep.subr.bf16.mxu0 %v5685_v19  ;;  %v5755_v41 = vpack.c.bf16 %v3121_v30, %v3120_v31  ;;  %v3262_v17 = vsel %vm600_vm4, %v6604_v3, %v6599_v2  ;;  %v2599_v11 = vld [vmem:[%s8649_s5 + $0x178] sm:$0xff]  ;;  %v3258_v57 = vsel %vm600_vm4, %v6599_v2, %v6604_v3 }
 0x32e   :  { %5440 = vmatmul.mubr.msk.f32.gmra.mrb[14].mxu1 %vm103_vm2, %v2762_v28  ;;  %v6589_v28 = vunpack.i.h.bf16 %v7796_v42  ;;  %v7884_v6 = vpop.permute.xlu1 %6606  ;;  %v5701_v42 = vpack.c.bf16 %v2595_v61, %v2593_v60  ;;  %v2603_v30 = vld [vmem:[%s8649_s5 + $0x198] sm:$0xff] }
 0x32f   :  { %2940 = vmatprep.mubr.f32.mxu1 %v6898_v20  ;;  %v6609_v4 = vunpack.i.h.bf16 %v7884_v6  ;;  %v6608_v5 = vunpack.i.l.bf16 %v7884_v6  ;;  %v3129_v2 = vld [vmem:[#allocation2 + $0x78] sm:$0xff] }
 0x330   :  { %5688 = vmatpush1.bf16.msra.mxu0 %v5687_v33 }
 0x331   :  { %v3396_v21 = vsel %vm739_vm5, %v6613_v16, %v6608_v5  ;;  %v3397_v22 = vsel %vm739_vm5, %v6614_v13, %v6609_v4 }
 0x332   :  { %5441 = vmatmul.mubr.msk.f32.vlgmr.msra.gmra.mrb[8].mxu1 %vm103_vm2, %v2731_v24  ;;  %v2583_v24 = vld [vmem:[%s8649_s5 + $0xf8] sm:$0xff]  ;;  %v5765_v33 = vpack.c.bf16 %v3397_v22, %v3396_v21  ;;  %v3265_v22 = vld [vmem:[#allocation2 + $0x90] sm:$0xff] }
 0x333   :  { %2946 = vmatprep.mubr.f32.mxu1 %v6898_v20  ;;  %5744 = vmatpush1.bf16.msra.mxu1 %v5743_v35  ;;  %v3260_v35 = vsel %vm600_vm4, %v6594_v15, %v6589_v28  ;;  %v5689_v36 = vpack.c.bf16 %v2583_v24, %v2581_v23  ;;  %v5705_v23 = vpack.c.bf16 %v2599_v11, %v2597_v29  ;;  %v2596_v24 = vld [vmem:[%s8649_s5 + $0x160] sm:$0xff]  ;;  %v2613_v11 = vld [vmem:[%s8649_s5 + $0x1e8] sm:$0xff] }
 0x334   :  { %5746 = vmatprep.subr.bf16.mxu1 %v5745_v43  ;;  %v2990_v43 = vld [vmem:[#allocation2 + $0x48] sm:$0xff]  ;;  %v5757_v45 = vpack.c.bf16 %v3260_v35, %v3259_v34  ;;  %v6617_v35 = vpop.permute.xlu1 %6616 }
 0x335   :  { %5690 = vmatprep.subr.bf16.mxu0 %v5689_v36 }
 0x336   :  { %5442 = vmatmul.mubr.msk.f32.gmra.mrb[10].mxu1 %vm103_vm2, %v2732_v54  ;;  %v2991_v54 = vld [vmem:[#allocation2 + $0x50] sm:$0xff]  ;;  %5692 = vmatpush1.bf16.msra.mxu0 %v5691_v46  ;;  %v6618_v46 = vunpack.i.l.bf16 %v6617_v35 }
 0x337   :  { %2952 = vmatprep.mubr.f32.mxu1 %v6898_v20  ;;  %5748 = vmatpush1.bf16.msra.mxu1 %v5747_v53  ;;  %v2591_v53 = vld [vmem:[%s8649_s5 + $0x138] sm:$0xff] }
 0x338   :  { %5750 = vmatprep.subr.bf16.mxu1 %v5749_v62  ;;  %v6598_v62 = vunpack.i.l.bf16 %v6597_v47  ;;  %5694 = vmatprep.subr.bf16.mxu0 %v5693_v48  ;;  %v5697_v56 = vpack.c.bf16 %v2591_v53, %v2589_v52  ;;  %v6624_v47 = vunpack.i.h.bf16 %v6622_v39  ;;  %v6623_v48 = vunpack.i.l.bf16 %v6622_v39  ;;  %v2606_v52 = vld [vmem:[%s8649_s5 + $0x1b0] sm:$0xff]  ;;  %v2609_v53 = vld [vmem:[%s8649_s5 + $0x1c8] sm:$0xff] }
 0x339   :  { %v5715_v60 = vpack.c.bf16 %v2606_v52, %v2604_v51  ;;  %v3401_v51 = vld [vmem:[#allocation2 + $0xa8] sm:$0xff] }
 0x33a   :  { %5443 = vmatmul.mubr.msk.f32.gmra.mrb[12].mxu1 %vm103_vm2, %v2733_v0  ;;  %v3256_v0 = vsel %vm600_vm4, %v6589_v28, %v6594_v15  ;;  %v3261_v10 = vsel %vm600_vm4, %v6603_v55, %v6598_v62  ;;  %5696 = vmatpush1.bf16.msra.mxu0 %v5695_v63  ;;  %v2594_v28 = vld [vmem:[%s8649_s5 + $0x150] sm:$0xff]  ;;  %v3257_v15 = vsel %vm600_vm4, %v6598_v62, %v6603_v55  ;;  %v6627_v63 = vpop.permute.xlu1 %6626 }
 0x33b   :  { %2958 = vmatprep.mubr.f32.mxu1 %v6898_v20  ;;  %5698 = vmatprep.subr.bf16.mxu0 %v5697_v56  ;;  %v5759_v14 = vpack.c.bf16 %v3256_v0, %v3255_v1  ;;  %v5761_v18 = vpack.c.bf16 %v3262_v17, %v3261_v10  ;;  %v5763_v31 = vpack.c.bf16 %v3258_v57, %v3257_v15  ;;  %v6629_v3 = vunpack.i.h.bf16 %v6627_v63  ;;  %v6632_v56 = vpop.permute.xlu0 %6631  ;;  %v2612_v15 = vld [vmem:[%s8649_s5 + $0x1e0] sm:$0xff] }
 0x33c   :  { %v3393_v62 = vsel %vm739_vm5, %v6609_v4, %v6614_v13  ;;  %v3392_v55 = vsel %vm739_vm5, %v6608_v5, %v6613_v16  ;;  %v3398_v58 = vsel %vm739_vm5, %v6623_v48, %v6618_v46  ;;  %v6628_v61 = vunpack.i.l.bf16 %v6627_v63  ;;  %v2610_v4 = vld [vmem:[%s8649_s5 + $0x1d0] sm:$0xff] }
 0x33d   :  { %v6634_v0 = vunpack.i.h.bf16 %v6632_v56  ;;  %v6633_v1 = vunpack.i.l.bf16 %v6632_v56  ;;  %v5767_v5 = vpack.c.bf16 %v3393_v62, %v3392_v55  ;;  %v3402_v62 = vld [vmem:[#allocation2 + $0xb0] sm:$0xff] }
 0x33e   :  { %5444 = vmatmul.mubr.msk.f32.gmra.mrb[14].mxu1 %vm103_vm2, %v2734_v59  ;;  %v2592_v59 = vld [vmem:[%s8649_s5 + $0x140] sm:$0xff]  ;;  %5700 = vmatpush1.bf16.msra.mxu0 %v5699_v12  ;;  %v3394_v12 = vsel %vm739_vm5, %v6618_v46, %v6623_v48 }
 0x33f   :  { %3069 = vmatprep.mubr.f32.mxu1 %v6898_v20  ;;  %v5703_v19 = vpack.c.bf16 %v2594_v28, %v2592_v59  ;;  %5702 = vmatprep.subr.bf16.mxu0 %v5701_v42  ;;  %v3533_v17 = vsel %vm878_vm6, %v6633_v1, %v6628_v61  ;;  %v3534_v42 = vsel %vm878_vm6, %v6634_v0, %v6629_v3  ;;  %v3264_v28 = vld [vmem:[#allocation2 + $0x88] sm:$0xff] }
 0x340   :  { %v5773_v29 = vpack.c.bf16 %v3534_v42, %v3533_v17 }
 0x342   :  { %5445 = vmatmul.mubr.msk.f32.vlgmr.msra.gmra.mrb[8].mxu1 %vm103_vm2, %v2989_v26  ;;  %v2601_v26 = vld [vmem:[%s8649_s5 + $0x188] sm:$0xff]  ;;  %5704 = vmatpush1.bf16.msra.mxu0 %v5703_v19  ;;  %v6642_v19 = vpop.permute.xlu0 %6641 }
 0x343   :  { %3075 = vmatprep.mubr.f32.mxu1 %v6898_v20  ;;  %5752 = vmatpush1.bf16.msra.mxu1 %v5751_v25  ;;  %v2598_v25 = vld [vmem:[%s8649_s5 + $0x170] sm:$0xff]  ;;  %v5709_v36 = vpack.c.bf16 %v2603_v30, %v2601_v26  ;;  %v6643_v26 = vunpack.i.l.bf16 %v6642_v19 }
 0x344   :  { %5754 = vmatprep.subr.bf16.mxu1 %v5753_v32  ;;  %v3127_v32 = vld [vmem:[#allocation2 + $0x68] sm:$0xff]  ;;  %v5707_v34 = vpack.c.bf16 %v2598_v25, %v2596_v24  ;;  %5706 = vmatprep.subr.bf16.mxu0 %v5705_v23  ;;  %v6644_v25 = vunpack.i.h.bf16 %v6642_v19 }
 0x346   :  { %5446 = vmatmul.mubr.msk.f32.gmra.mrb[10].mxu1 %vm103_vm2, %v2990_v43  ;;  %v6619_v43 = vunpack.i.h.bf16 %v6617_v35  ;;  %5708 = vmatpush1.bf16.msra.mxu0 %v5707_v34 }
 0x347   :  { %3081 = vmatprep.mubr.f32.mxu1 %v6898_v20  ;;  %5756 = vmatpush1.bf16.msra.mxu1 %v5755_v41  ;;  %v2607_v41 = vld [vmem:[%s8649_s5 + $0x1b8] sm:$0xff] }
 0x348   :  { %5758 = vmatprep.subr.bf16.mxu1 %v5757_v45  ;;  %v3128_v45 = vld [vmem:[#allocation2 + $0x70] sm:$0xff]  ;;  %5710 = vmatprep.subr.bf16.mxu0 %v5709_v36  ;;  %v5713_v50 = vpack.c.bf16 %v2607_v41, %v2605_v40  ;;  %v3399_v44 = vsel %vm739_vm5, %v6624_v47, %v6619_v43  ;;  %v3395_v10 = vsel %vm739_vm5, %v6619_v43, %v6624_v47  ;;  %v6652_v36 = vpop.permute.xlu0 %6651  ;;  %v3400_v43 = vld [vmem:[#allocation2 + $0xa0] sm:$0xff] }
 0x349   :  { %v5769_v13 = vpack.c.bf16 %v3399_v44, %v3398_v58  ;;  %v5771_v59 = vpack.c.bf16 %v3395_v10, %v3394_v12  ;;  %v6654_v37 = vunpack.i.h.bf16 %v6652_v36  ;;  %v6653_v38 = vunpack.i.l.bf16 %v6652_v36  ;;  %v3403_v58 = vld [vmem:[#allocation2 + $0xb8] sm:$0xff]  ;;  %v3537_v10 = vld [vmem:[#allocation2 + $0xc0] sm:$0xff]  ;;  %v3676_v36 = vld [vmem:[#allocation2 + $0xf0] sm:$0xff] }
 0x34a   :  { %5447 = vmatmul.mubr.msk.f32.gmra.mrb[12].mxu1 %vm103_vm2, %v2991_v54  ;;  %v2611_v54 = vld [vmem:[%s8649_s5 + $0x1d8] sm:$0xff]  ;;  %5712 = vmatpush1.bf16.msra.mxu0 %v5711_v49 }
 0x34b   :  { %3087 = vmatprep.mubr.f32.mxu1 %v6898_v20  ;;  %5714 = vmatprep.subr.bf16.mxu0 %v5713_v50  ;;  %v5717_v6 = vpack.c.bf16 %v2611_v54, %v2609_v53 }
 0x34c   :  { %v6662_v54 = vpop.permute.xlu0 %6661 }
 0x34e   :  { %5448 = vmatmul.mubr.msk.f32.gmra.mrb[14].mxu1 %vm103_vm2, %v2992_v7  ;;  %v2608_v7 = vld [vmem:[%s8649_s5 + $0x1c0] sm:$0xff]  ;;  %5716 = vmatpush1.bf16.msra.mxu0 %v5715_v60 }
 0x34f   :  { %3206 = vmatprep.mubr.f32.mxu1 %v6898_v20  ;;  %v5719_v16 = vpack.c.bf16 %v2610_v4, %v2608_v7  ;;  %5718 = vmatprep.subr.bf16.mxu0 %v5717_v6 }
 0x352   :  { %5449 = vmatmul.mubr.msk.f32.vlgmr.msra.gmra.mrb[8].mxu1 %vm103_vm2, %v3126_v8  ;;  %5720 = vmatpush1.bf16.msra.mxu0 %v5719_v16  ;;  %v6637_v8 = vpop.permute.xlu1 %6636 }
 0x353   :  { %3212 = vmatprep.mubr.f32.mxu1 %v6898_v20  ;;  %5760 = vmatpush1.bf16.msra.mxu1 %v5759_v14  ;;  %v2615_v14 = vld [vmem:[%s8649_s5 + $0x1f8] sm:$0xff]  ;;  %v6639_v23 = vunpack.i.h.bf16 %v6637_v8  ;;  %v6638_v24 = vunpack.i.l.bf16 %v6637_v8 }
 0x354   :  { %5762 = vmatprep.subr.bf16.mxu1 %v5761_v18  ;;  %v5721_v57 = vpack.c.bf16 %v2615_v14, %v2613_v11  ;;  %v2614_v18 = vld [vmem:[%s8649_s5 + $0x1f0] sm:$0xff] }
 0x355   :  { %v5723_v21 = vpack.c.bf16 %v2614_v18, %v2612_v15  ;;  %v3535_v39 = vsel %vm878_vm6, %v6643_v26, %v6638_v24  ;;  %v3536_v40 = vsel %vm878_vm6, %v6644_v25, %v6639_v23  ;;  %v3531_v46 = vsel %vm878_vm6, %v6638_v24, %v6643_v26  ;;  %v3539_v11 = vld [vmem:[#allocation2 + $0xd0] sm:$0xff] }
 0x356   :  { %5450 = vmatmul.mubr.msk.f32.gmra.mrb[10].mxu1 %vm103_vm2, %v3127_v32  ;;  %5722 = vmatprep.subr.bf16.mxu0 %v5721_v57  ;;  %v6647_v30 = vpop.permute.xlu1 %6646  ;;  %v3530_v32 = vsel %vm878_vm6, %v6629_v3, %v6634_v0  ;;  %v5777_v47 = vpack.c.bf16 %v3536_v40, %v3535_v39  ;;  %v6663_v3 = vunpack.i.l.bf16 %v6662_v54  ;;  %v3812_v39 = vld [vmem:[#allocation2 + $0x108] sm:$0xff]  ;;  %v3813_v40 = vld [vmem:[#allocation2 + $0x110] sm:$0xff] }
 0x357   :  { %3218 = vmatprep.mubr.f32.mxu1 %v6898_v20  ;;  %5764 = vmatpush1.bf16.msra.mxu1 %v5763_v31  ;;  %v3266_v31 = vld [vmem:[#allocation2 + $0x98] sm:$0xff]  ;;  %v6649_v34 = vunpack.i.h.bf16 %v6647_v30  ;;  %v6648_v35 = vunpack.i.l.bf16 %v6647_v30  ;;  %v3674_v30 = vld [vmem:[#allocation2 + $0xe0] sm:$0xff] }
 0x358   :  { %5766 = vmatprep.subr.bf16.mxu1 %v5765_v33  ;;  %5724 = vmatpush1.bf16.msra.mxu0 %v5723_v21  ;;  %v3529_v33 = vsel %vm878_vm6, %v6628_v61, %v6633_v1  ;;  %v6672_v1 = vpop.permute.xlu0 %6671  ;;  %v3540_v21 = vld [vmem:[#allocation2 + $0xd8] sm:$0xff] }
 0x359   :  { %v5775_v41 = vpack.c.bf16 %v3530_v32, %v3529_v33  ;;  %v3670_v48 = vsel %vm1017_vm7, %v6653_v38, %v6648_v35  ;;  %v3671_v49 = vsel %vm1017_vm7, %v6654_v37, %v6649_v34  ;;  %v3667_v44 = vsel %vm1017_vm7, %v6649_v34, %v6654_v37  ;;  %v3677_v37 = vld [vmem:[#allocation2 + $0xf8] sm:$0xff] }
 0x35a   :  { %5451 = vmatmul.mubr.msk.f32.gmra.mrb[12].mxu1 %vm103_vm2, %v3128_v45  ;;  %v3532_v45 = vsel %vm878_vm6, %v6639_v23, %v6644_v25  ;;  %v5781_v52 = vpack.c.bf16 %v3671_v49, %v3670_v48  ;;  %v6657_v53 = vpop.permute.xlu1 %6656  ;;  %v3666_v60 = vsel %vm1017_vm7, %v6648_v35, %v6653_v38  ;;  %v6674_v6 = vunpack.i.h.bf16 %v6672_v1  ;;  %v3675_v35 = vld [vmem:[#allocation2 + $0xe8] sm:$0xff]  ;;  %v3811_v38 = vld [vmem:[#allocation2 + $0x100] sm:$0xff] }
 0x35b   :  { %3224 = vmatprep.mubr.f32.mxu1 %v6898_v20  ;;  %v5779_v50 = vpack.c.bf16 %v3532_v45, %v3531_v46  ;;  %v6659_v55 = vunpack.i.h.bf16 %v6657_v53  ;;  %v6658_v63 = vunpack.i.l.bf16 %v6657_v53  ;;  %v6673_v7 = vunpack.i.l.bf16 %v6672_v1 }
 0x35c   :  { %v6682_v8 = vpop.permute.xlu0 %6681 }
 0x35d   :  { %v3672_v4 = vsel %vm1017_vm7, %v6663_v3, %v6658_v63  ;;  %v6684_v18 = vunpack.i.h.bf16 %v6682_v8  ;;  %v6683_v19 = vunpack.i.l.bf16 %v6682_v8 }
 0x35e   :  { %5452 = vmatmul.mubr.msk.f32.gmra.mrb[14].mxu1 %vm103_vm2, %v3129_v2  ;;  %v6664_v2 = vunpack.i.h.bf16 %v6662_v54  ;;  %v6667_v56 = vpop.permute.xlu1 %6666 }
 0x35f   :  { %3343 = vmatprep.mubr.f32.mxu1 %v6898_v20  ;;  %v6669_v61 = vunpack.i.h.bf16 %v6667_v56  ;;  %v6668_v0 = vunpack.i.l.bf16 %v6667_v56 }
 0x360   :  { %v3669_v12 = vsel %vm1017_vm7, %v6659_v55, %v6664_v2  ;;  %v3936_v45 = vpop.permute.xlu0 %3935 }
 0x361   :  { %v3807_v17 = vsel %vm1156_vm8, %v6673_v7, %v6668_v0  ;;  %v3808_v42 = vsel %vm1156_vm8, %v6674_v6, %v6669_v61  ;;  %v3803_v23 = vsel %vm1156_vm8, %v6668_v0, %v6673_v7 }
 0x362   :  { %5453 = vmatmul.mubr.msk.f32.vlgmr.msra.gmra.mrb[8].mxu1 %vm103_vm2, %v3263_v9  ;;  %v5783_v9 = vpack.c.bf16 %v3667_v44, %v3666_v60  ;;  %v6677_v14 = vpop.permute.xlu1 %6676 }
 0x363   :  { %3349 = vmatprep.mubr.f32.mxu1 %v6898_v20  ;;  %5768 = vmatpush1.bf16.msra.mxu1 %v5767_v5  ;;  %v3673_v5 = vsel %vm1017_vm7, %v6664_v2, %v6659_v55  ;;  %v6679_v57 = vunpack.i.h.bf16 %v6677_v14  ;;  %v6678_v15 = vunpack.i.l.bf16 %v6677_v14 }
 0x364   :  { %5770 = vmatprep.subr.bf16.mxu1 %v5769_v13  ;;  %v3668_v13 = vsel %vm1017_vm7, %v6658_v63, %v6663_v3  ;;  %v5785_v16 = vpack.c.bf16 %v3673_v5, %v3672_v4 }
 0x365   :  { %v3809_v24 = vsel %vm1156_vm8, %v6683_v19, %v6678_v15  ;;  %v3810_v25 = vsel %vm1156_vm8, %v6684_v18, %v6679_v57  ;;  %v3805_v32 = vsel %vm1156_vm8, %v6678_v15, %v6683_v19 }
 0x366   :  { %5454 = vmatmul.mubr.msk.f32.gmra.mrb[10].mxu1 %vm103_vm2, %v3264_v28  ;;  %v3538_v28 = vld [vmem:[#allocation2 + $0xc8] sm:$0xff]  ;;  %v5793_v33 = vpack.c.bf16 %v3810_v25, %v3809_v24 }
 0x367   :  { %3355 = vmatprep.mubr.f32.mxu1 %v6898_v20  ;;  %5772 = vmatpush1.bf16.msra.mxu1 %v5771_v59  ;;  %v5787_v59 = vpack.c.bf16 %v3669_v12, %v3668_v13 }
 0x368   :  { %5774 = vmatprep.subr.bf16.mxu1 %v5773_v29  ;;  %v5789_v29 = vpack.c.bf16 %v3808_v42, %v3807_v17 }
 0x36a   :  { %5455 = vmatmul.mubr.msk.f32.gmra.mrb[12].mxu1 %vm103_vm2, %v3265_v22  ;;  %v3804_v22 = vsel %vm1156_vm8, %v6669_v61, %v6674_v6 }
 0x36b   :  { %3361 = vmatprep.mubr.f32.mxu1 %v6898_v20  ;;  %v5791_v26 = vpack.c.bf16 %v3804_v22, %v3803_v23 }
 0x36e   :  { %5456 = vmatmul.mubr.msk.f32.gmra.mrb[14].mxu1 %vm103_vm2, %v3266_v31  ;;  %v3806_v31 = vsel %vm1156_vm8, %v6679_v57, %v6684_v18 }
 0x36f   :  { %3480 = vmatprep.mubr.f32.mxu1 %v6898_v20  ;;  %v5795_v34 = vpack.c.bf16 %v3806_v31, %v3805_v32 }
 0x372   :  { %5457 = vmatmul.mubr.msk.f32.vlgmr.msra.gmra.mrb[8].mxu1 %vm103_vm2, %v3400_v43  ;;  %v3931_v43 = vpop.permute.xlu1 %3930 }
 0x373   :  { %3486 = vmatprep.mubr.f32.mxu1 %v6898_v20  ;;  %5776 = vmatpush1.bf16.msra.mxu1 %v5775_v41  ;;  %v3814_v41 = vld [vmem:[#allocation2 + $0x118] sm:$0xff] }
 0x374   :  { %5778 = vmatprep.subr.bf16.mxu1 %v5777_v47  ;;  %v3946_v47 = vpop.permute.xlu0 %3945 }
 0x376   :  { %5458 = vmatmul.mubr.msk.f32.gmra.mrb[10].mxu1 %vm103_vm2, %v3401_v51  ;;  %v3941_v46 = vpop.permute.xlu1 %3940 }
 0x377   :  { %3492 = vmatprep.mubr.f32.mxu1 %v6898_v20  ;;  %5780 = vmatpush1.bf16.msra.mxu1 %v5779_v50 }
 0x378   :  { %5782 = vmatprep.subr.bf16.mxu1 %v5781_v52  ;;  %v2532_v54 = vpop.permute.xlu0 %2531 }
 0x37a   :  { %5459 = vmatmul.mubr.msk.f32.gmra.mrb[12].mxu1 %vm103_vm2, %v3402_v62  ;;  %v2527_v49 = vpop.permute.xlu1 %2526 }
 0x37b   :  { %3498 = vmatprep.mubr.f32.mxu1 %v6898_v20 }
 0x37c   :  { %v2542_v61 = vpop.permute.xlu0 %2541 }
 0x37e   :  { %5460 = vmatmul.mubr.msk.f32.gmra.mrb[14].mxu1 %vm103_vm2, %v3403_v58  ;;  %v2537_v3 = vpop.permute.xlu1 %2536 }
 0x37f   :  { %3617 = vmatprep.mubr.f32.mxu1 %v6898_v20 }
 0x382   :  { %5461 = vmatmul.mubr.msk.f32.vlgmr.msra.gmra.mrb[8].mxu1 %vm103_vm2, %v3537_v10 }
 0x383   :  { %3623 = vmatprep.mubr.f32.mxu1 %v6898_v20  ;;  %5784 = vmatpush1.bf16.msra.mxu1 %v5783_v9 }
 0x384   :  { %5786 = vmatprep.subr.bf16.mxu1 %v5785_v16 }
 0x386   :  { %5462 = vmatmul.mubr.msk.f32.gmra.mrb[10].mxu1 %vm103_vm2, %v3538_v28 }
 0x387   :  { %3629 = vmatprep.mubr.f32.mxu1 %v6898_v20  ;;  %5788 = vmatpush1.bf16.msra.mxu1 %v5787_v59 }
 0x388   :  { %5790 = vmatprep.subr.bf16.mxu1 %v5789_v29 }
 0x38a   :  { %5463 = vmatmul.mubr.msk.f32.gmra.mrb[12].mxu1 %vm103_vm2, %v3539_v11 }
 0x38b   :  { %3635 = vmatprep.mubr.f32.mxu1 %v6898_v20 }
 0x38e   :  { %5464 = vmatmul.mubr.msk.f32.gmra.mrb[14].mxu1 %vm103_vm2, %v3540_v21 }
 0x38f   :  { %3754 = vmatprep.mubr.f32.mxu1 %v6898_v20 }
 0x392   :  { %5465 = vmatmul.mubr.msk.f32.vlgmr.msra.gmra.mrb[8].mxu1 %vm103_vm2, %v3674_v30 }
 0x393   :  { %3760 = vmatprep.mubr.f32.mxu1 %v6898_v20  ;;  %5792 = vmatpush1.bf16.msra.mxu1 %v5791_v26 }
 0x394   :  { %5794 = vmatprep.subr.bf16.mxu1 %v5793_v33 }
 0x396   :  { %5466 = vmatmul.mubr.msk.f32.gmra.mrb[10].mxu1 %vm103_vm2, %v3675_v35 }
 0x397   :  { %3766 = vmatprep.mubr.f32.mxu1 %v6898_v20  ;;  %5796 = vmatpush1.bf16.msra.mxu1 %v5795_v34 }
 0x39a   :  { %5467 = vmatmul.mubr.msk.f32.gmra.mrb[12].mxu1 %vm103_vm2, %v3676_v36 }
 0x39b   :  { %3772 = vmatprep.mubr.f32.mxu1 %v6898_v20 }
 0x39e   :  { %5468 = vmatmul.mubr.msk.f32.gmra.mrb[14].mxu1 %vm103_vm2, %v3677_v37 }
 0x39f   :  { %3891 = vmatprep.mubr.f32.mxu1 %v6898_v20 }
 0x3a2   :  { %5469 = vmatmul.mubr.msk.f32.vlgmr.msra.gmra.mrb[8].mxu1 %vm103_vm2, %v3811_v38 }
 0x3a3   :  { %3897 = vmatprep.mubr.f32.mxu1 %v6898_v20 }
 0x3a6   :  { %5470 = vmatmul.mubr.msk.f32.gmra.mrb[10].mxu1 %vm103_vm2, %v3812_v39  ;;  %v5157_v39 = vld [vmem:[%s8648_s4] sm:$0xff] }
 0x3a7   :  { %3903 = vmatprep.mubr.f32.mxu1 %v6898_v20 }
 0x3aa   :  { %5471 = vmatmul.mubr.msk.f32.gmra.mrb[12].mxu1 %vm103_vm2, %v3813_v40 }
 0x3ab   :  { %3909 = vmatprep.mubr.f32.mxu1 %v6898_v20 }
 0x3ae   :  { %5472 = vmatmul.mubr.msk.f32.gmra.mrb[14].mxu1 %vm103_vm2, %v3814_v41  ;;  %v5158_v41 = vld [vmem:[%s8648_s4 + $0x8] sm:$0xff] }
 0x3e5   :  { %v2489_v48 = vpop.f32.mrb[0].mxu1 }
 0x3e6   :  { %v2491_v50 = vpop.f32.mrb[1].mxu1  ;;  %v2544_v52 = vadd.f32 %v2527_v49, %v2489_v48 }
 0x3e7   :  { %v2545_v51 = vadd.f32 %v2527_v49, %v2491_v50 }
 0x3e9   :  { %v2495_v53 = vpop.f32.mrb[2].mxu1  ;;  %2680 = vmatprep.mubr.f32.mxu0 %v2545_v51 }
 0x3ea   :  { %v2497_v62 = vpop.f32.mrb[3].mxu1  ;;  %2681 = vmatmul.mubr.f32.vlgmr.msra.gmra.mrb[8].mxu0 %v2544_v52  ;;  %v2546_v63 = vadd.f32 %v2532_v54, %v2495_v53 }
 0x3eb   :  { %v2547_v55 = vadd.f32 %v2532_v54, %v2497_v62 }
 0x3ed   :  { %v2501_v2 = vpop.f32.mrb[4].mxu1  ;;  %2686 = vmatprep.mubr.f32.mxu0 %v2547_v55 }
 0x3ee   :  { %v2503_v56 = vpop.f32.mrb[5].mxu1  ;;  %2687 = vmatmul.mubr.f32.gmra.mrb[10].mxu0 %v2546_v63  ;;  %v2548_v44 = vadd.f32 %v2537_v3, %v2501_v2 }
 0x3ef   :  { %v2549_v58 = vadd.f32 %v2537_v3, %v2503_v56 }
 0x3f1   :  { %v2507_v60 = vpop.f32.mrb[6].mxu1  ;;  %2692 = vmatprep.mubr.f32.mxu0 %v2549_v58 }
 0x3f2   :  { %v2509_v0 = vpop.f32.mrb[7].mxu1  ;;  %2693 = vmatmul.mubr.f32.gmra.mrb[12].mxu0 %v2548_v44  ;;  %v2550_v6 = vadd.f32 %v2542_v61, %v2507_v60 }
 0x3f3   :  { %v2551_v1 = vadd.f32 %v2542_v61, %v2509_v0 }
 0x3f5   :  { %2698 = vmatprep.mubr.f32.mxu0 %v2551_v1 }
 0x3f6   :  { %2699 = vmatmul.mubr.f32.gmra.mrb[14].mxu0 %v2550_v6 }
 0x3f7   :  { %4072 = vmatprep.mubr.f32.mxu0 %v6898_v20 }
 0x475   :  { %v3893_v7 = vpop.f32.mrb[8].mxu1 }
 0x476   :  { %v3895_v4 = vpop.f32.mrb[9].mxu1  ;;  %v3948_v5 = vadd.f32 %v3931_v43, %v3893_v7 }
 0x477   :  { %v3949_v9 = vadd.f32 %v3931_v43, %v3895_v4 }
 0x478   :  { %v3956_v17 = vmax.f32 %v3948_v5, 0.0 }
 0x479   :  { %v3899_v10 = vpop.f32.mrb[10].mxu1  ;;  %v3957_v59 = vmax.f32 %v3949_v9, 0.0 }
 0x47a   :  { %v3950_v12 = vadd.f32 %v3936_v45, %v3899_v10  ;;  %v3901_v13 = vpop.f32.mrb[11].mxu1 }
 0x47b   :  { %v3951_v16 = vadd.f32 %v3936_v45, %v3901_v13  ;;  %v5159_v45 = vld [vmem:[%s8648_s4 + $0x10] sm:$0xff] }
 0x47c   :  { %v3958_v42 = vmax.f32 %v3950_v12, 0.0 }
 0x47d   :  { %v3959_v28 = vmax.f32 %v3951_v16, 0.0  ;;  %v3905_v29 = vpop.f32.mrb[12].mxu1 }
 0x47e   :  { %v3907_v11 = vpop.f32.mrb[13].mxu1  ;;  %v6685_v14 = vpack.i.bf16 %v3958_v42, %v3956_v17  ;;  %v8089_v8 = vpack.c.bf16 %v3958_v42, %v3956_v17  ;;  %v3952_v18 = vadd.f32 %v3941_v46, %v3905_v29  ;;  %v3992_v29 = vld [vmem:[#allocation4 + $0x20] sm:$0xff] }
 0x47f   :  { %v6690_v57 = vpack.i.bf16 %v3959_v28, %v3957_v59  ;;  %v8091_v15 = vpack.c.bf16 %v3959_v28, %v3957_v59  ;;  %v3953_v19 = vadd.f32 %v3941_v46, %v3907_v11  ;;  %v3993_v11 = vld [vmem:[#allocation4 + $0x28] sm:$0xff] }
 0x480   :  { %6686 = vrot.lane.b32.xlu1 %v6685_v14, %s6897_s13  ;;  %v3960_v25 = vmax.f32 %v3952_v18, 0.0 }
 0x481   :  { %6691 = vrot.lane.b32.xlu0 %v6690_v57, %s6897_s13  ;;  %v3911_v21 = vpop.f32.mrb[14].mxu1  ;;  %v3961_v30 = vmax.f32 %v3953_v19, 0.0 }
 0x482   :  { %v3954_v22 = vadd.f32 %v3946_v47, %v3911_v21  ;;  %v3913_v23 = vpop.f32.mrb[15].mxu1 }
 0x483   :  { %v3955_v24 = vadd.f32 %v3946_v47, %v3913_v23  ;;  %v5160_v47 = vld [vmem:[%s8648_s4 + $0x18] sm:$0xff] }
 0x484   :  { %v3962_v26 = vmax.f32 %v3954_v22, 0.0 }
 0x485   :  { %v3963_v31 = vmax.f32 %v3955_v24, 0.0 }
 0x486   :  { %v6695_v32 = vpack.i.bf16 %v3962_v26, %v3960_v25  ;;  %v8095_v33 = vpack.c.bf16 %v3962_v26, %v3960_v25  ;;  %v3995_v26 = vld [vmem:[#allocation4 + $0x38] sm:$0xff] }
 0x487   :  { %v6700_v34 = vpack.i.bf16 %v3963_v31, %v3961_v30  ;;  %v8097_v35 = vpack.c.bf16 %v3963_v31, %v3961_v30  ;;  %v3964_v31 = vld [vmem:[#allocation4] sm:$0xff] }
 0x488   :  { %6696 = vrot.lane.b32.xlu1 %v6695_v32, %s6897_s13 }
 0x489   :  { %6701 = vrot.lane.b32.xlu0 %v6700_v34, %s6897_s13 }
 0x48c   :  { %6706 = vrot.lane.b32.xlu1 %v6685_v14, %s6899_s14 }
 0x48d   :  { %6711 = vrot.lane.b32.xlu0 %v6690_v57, %s6899_s14 }
 0x490   :  { %6716 = vrot.lane.b32.xlu1 %v6695_v32, %s6899_s14 }
 0x491   :  { %6721 = vrot.lane.b32.xlu0 %v6700_v34, %s6899_s14 }
 0x494   :  { %6726 = vrot.lane.b32.xlu1 %v6685_v14, %s6900_s15 }
 0x495   :  { %6731 = vrot.lane.b32.xlu0 %v6690_v57, %s6900_s15 }
 0x498   :  { %6736 = vrot.lane.b32.xlu1 %v6695_v32, %s6900_s15 }
 0x499   :  { %6741 = vrot.lane.b32.xlu0 %v6700_v34, %s6900_s15 }
 0x49c   :  { %6746 = vrot.lane.b32.xlu1 %v6685_v14, %s6901_s16 }
 0x49d   :  { %6751 = vrot.lane.b32.xlu0 %v6690_v57, %s6901_s16 }
 0x4a0   :  { %6756 = vrot.lane.b32.xlu1 %v6695_v32, %s6901_s16 }
 0x4a1   :  { %6761 = vrot.lane.b32.xlu0 %v6700_v34, %s6901_s16 }
 0x4a4   :  { %6766 = vrot.lane.b32.xlu1 %v6685_v14, %s6902_s17 }
 0x4a5   :  { %6771 = vrot.lane.b32.xlu0 %v6690_v57, %s6902_s17 }
 0x4a8   :  { %6776 = vrot.lane.b32.xlu1 %v6695_v32, %s6902_s17 }
 0x4a9   :  { %6781 = vrot.lane.b32.xlu0 %v6700_v34, %s6902_s17 }
 0x4ac   :  { %6786 = vrot.lane.b32.xlu1 %v6685_v14, %s6903_s18 }
 0x4ad   :  { %6791 = vrot.lane.b32.xlu0 %v6690_v57, %s6903_s18 }
 0x4b0   :  { %6796 = vrot.lane.b32.xlu1 %v6695_v32, %s6903_s18 }
 0x4b1   :  { %6801 = vrot.lane.b32.xlu0 %v6700_v34, %s6903_s18 }
 0x4b4   :  { %6806 = vrot.lane.b32.xlu1 %v6685_v14, %s6904_s19 }
 0x4b5   :  { %6811 = vrot.lane.b32.xlu0 %v6690_v57, %s6904_s19 }
 0x4b8   :  { %6816 = vrot.lane.b32.xlu1 %v6695_v32, %s6904_s19 }
 0x4b9   :  { %6821 = vrot.lane.b32.xlu0 %v6700_v34, %s6904_s19 }
 0x4bc   :  { %6826 = vrot.lane.b32.xlu1 %v6685_v14, %s6905_s20 }
 0x4bd   :  { %v2682_v36 = vpop.f32.mrb[8].mxu0  ;;  %6831 = vrot.lane.b32.xlu0 %v6690_v57, %s6905_s20 }
 0x4be   :  { %2705 = vst [vmem:[%s8650_s6] sm:$0xff] %v2682_v36  ;;  %v2684_v37 = vpop.f32.mrb[9].mxu0  ;;  %v5190_v36 = vld [vmem:[%s8649_s5 + $0x8] sm:$0xff] }
 0x4bf   :  { %2707 = vst.msk [vmem:[%s8650_s6 + $0x8] sm:$0xff] %vm2706_vm9, %v2684_v37  ;;  %v5192_v37 = vld [vmem:[%s8649_s5 + $0x18] sm:$0xff] }
 0x4c0   :  { %6836 = vrot.lane.b32.xlu1 %v6695_v32, %s6905_s20 }
 0x4c1   :  { %v2688_v38 = vpop.f32.mrb[10].mxu0  ;;  %6841 = vrot.lane.b32.xlu0 %v6700_v34, %s6905_s20 }
 0x4c2   :  { %2708 = vst [vmem:[%s8650_s6 + $0x10] sm:$0xff] %v2688_v38  ;;  %v2690_v40 = vpop.f32.mrb[11].mxu0  ;;  %v5189_v38 = vld [vmem:[%s8649_s5] sm:$0xff] }
 0x4c3   :  { %2709 = vst.msk [vmem:[%s8650_s6 + $0x18] sm:$0xff] %vm2706_vm9, %v2690_v40 }
 0x4c4   :  { %5163 = vperm.xlu1 %6364, %v5157_v39  }
 0x4c5   :  { %v2694_v43 = vpop.f32.mrb[12].mxu0  ;;  %5168 = vperm.xlu0 %6363, %v5158_v41  }
 0x4c6   :  { %2710 = vst [vmem:[%s8650_s6 + $0x20] sm:$0xff] %v2694_v43  ;;  %v2696_v46 = vpop.f32.mrb[13].mxu0 }
 0x4c7   :  { %2711 = vst.msk [vmem:[%s8650_s6 + $0x28] sm:$0xff] %vm2706_vm9, %v2696_v46  ;;  %v5194_v46 = vld [vmem:[%s8649_s5 + $0x28] sm:$0xff] }
 0x4c8   :  { %5173 = vperm.xlu1 %6364, %v5159_v45   ;;  %v5191_v45 = vld [vmem:[%s8649_s5 + $0x10] sm:$0xff] }
 0x4c9   :  { %5178 = vperm.xlu0 %6363, %v5160_v47   ;;  %v2700_v48 = vpop.f32.mrb[14].mxu0  ;;  %v5196_v47 = vld [vmem:[%s8649_s5 + $0x38] sm:$0xff] }
 0x4ca   :  { %2712 = vst [vmem:[%s8650_s6 + $0x30] sm:$0xff] %v2700_v48  ;;  %v2702_v49 = vpop.f32.mrb[15].mxu0 }
 0x4cb   :  { %2713 = vst.msk [vmem:[%s8650_s6 + $0x38] sm:$0xff] %vm2706_vm9, %v2702_v49  ;;  %v5869_v49 = vpack.c.bf16 %v5192_v37, %v5190_v36  ;;  %v5212_v36 = vld [vmem:[%s8649_s5 + $0xb8] sm:$0xff] }
 0x4cd   :  { %5870 = vmatprep.subr.bf16.mxu1 %v5869_v49 }
 0x4f2   :  { %v6687_v50 = vpop.permute.xlu1 %6686 }
 0x4f3   :  { %v6689_v51 = vunpack.i.h.bf16 %v6687_v50  ;;  %v6688_v52 = vunpack.i.l.bf16 %v6687_v50  ;;  %v6692_v53 = vpop.permute.xlu0 %6691  ;;  %v5871_v50 = vpack.c.bf16 %v5191_v45, %v5189_v38  ;;  %v5209_v45 = vld [vmem:[%s8649_s5 + $0xa0] sm:$0xff] }
 0x4f4   :  { %v6694_v54 = vunpack.i.h.bf16 %v6692_v53  ;;  %v6693_v62 = vunpack.i.l.bf16 %v6692_v53 }
 0x4f5   :  { %5872 = vmatpush1.bf16.msra.mxu1 %v5871_v50  ;;  %v5214_v50 = vld [vmem:[%s8649_s5 + $0xc8] sm:$0xff] }
 0x4f6   :  { %v3985_v55 = vsel %vm89_vm0, %v6689_v51, %v6694_v54  ;;  %v3984_v63 = vsel %vm89_vm0, %v6688_v52, %v6693_v62  ;;  %v3988_v2 = vsel %vm89_vm0, %v6693_v62, %v6688_v52  ;;  %v3989_v3 = vsel %vm89_vm0, %v6694_v54, %v6689_v51  ;;  %v5193_v62 = vld [vmem:[%s8649_s5 + $0x20] sm:$0xff] }
 0x4f7   :  { %v5799_v56 = vpack.c.bf16 %v3985_v55, %v3984_v63  ;;  %v5797_v58 = vpack.c.bf16 %v3989_v3, %v3988_v2  ;;  %v5873_v54 = vpack.c.bf16 %v5196_v47, %v5194_v46  ;;  %v5195_v55 = vld [vmem:[%s8649_s5 + $0x30] sm:$0xff]  ;;  %v3965_v63 = vld [vmem:[#allocation4 + $0x8] sm:$0xff] }
 0x4f8   :  { %v5211_v46 = vld [vmem:[%s8649_s5 + $0xb0] sm:$0xff]  ;;  %v4223_v47 = vld [vmem:[#allocation4 + $0x48] sm:$0xff] }
 0x4f9   :  { %5798 = vmatprep.subr.bf16.mxu0 %v5797_v58  ;;  %v5200_v58 = vld [vmem:[%s8649_s5 + $0x58] sm:$0xff]  ;;  %5874 = vmatprep.subr.bf16.mxu1 %v5873_v54  ;;  %v5891_v54 = vpack.c.bf16 %v5211_v46, %v5209_v45 }
 0x4fa   :  { %5800 = vmatpush1.bf16.msra.mxu0 %v5799_v56  ;;  %v6697_v44 = vpop.permute.xlu1 %6696  ;;  %v5198_v56 = vld [vmem:[%s8649_s5 + $0x48] sm:$0xff] }
 0x4fb   :  { %v6699_v60 = vunpack.i.h.bf16 %v6697_v44  ;;  %v6698_v61 = vunpack.i.l.bf16 %v6697_v44  ;;  %v6702_v0 = vpop.permute.xlu0 %6701 }
 0x4fc   :  { %v6704_v1 = vunpack.i.h.bf16 %v6702_v0  ;;  %v6703_v6 = vunpack.i.l.bf16 %v6702_v0 }
 0x4fe   :  { %v3987_v7 = vsel %vm89_vm0, %v6699_v60, %v6704_v1  ;;  %v3986_v4 = vsel %vm89_vm0, %v6698_v61, %v6703_v6  ;;  %v3990_v5 = vsel %vm89_vm0, %v6703_v6, %v6698_v61  ;;  %v3991_v9 = vsel %vm89_vm0, %v6704_v1, %v6699_v60  ;;  %v6707_v12 = vpop.permute.xlu1 %6706 }
 0x4ff   :  { %v5803_v10 = vpack.c.bf16 %v3987_v7, %v3986_v4  ;;  %v6712_v13 = vpop.permute.xlu0 %6711  ;;  %v5801_v16 = vpack.c.bf16 %v3991_v9, %v3990_v5  ;;  %v6709_v17 = vunpack.i.h.bf16 %v6707_v12  ;;  %v6708_v42 = vunpack.i.l.bf16 %v6707_v12  ;;  %v5197_v7 = vld [vmem:[%s8649_s5 + $0x40] sm:$0xff]  ;;  %v5199_v4 = vld [vmem:[%s8649_s5 + $0x50] sm:$0xff]  ;;  %v5202_v9 = vld [vmem:[%s8649_s5 + $0x68] sm:$0xff] }
 0x500   :  { %v6714_v59 = vunpack.i.h.bf16 %v6712_v13  ;;  %v6713_v28 = vunpack.i.l.bf16 %v6712_v13  ;;  %v5875_v60 = vpack.c.bf16 %v5195_v55, %v5193_v62  ;;  %v5877_v6 = vpack.c.bf16 %v5200_v58, %v5198_v56  ;;  %v3966_v5 = vld [vmem:[#allocation4 + $0x10] sm:$0xff]  ;;  %v5218_v58 = vld [vmem:[%s8649_s5 + $0xe8] sm:$0xff] }
 0x501   :  { %5802 = vmatprep.subr.bf16.mxu0 %v5801_v16  ;;  %v5879_v13 = vpack.c.bf16 %v5199_v4, %v5197_v7  ;;  %v4224_v56 = vld [vmem:[#allocation4 + $0x50] sm:$0xff] }
 0x502   :  { %5804 = vmatpush1.bf16.msra.mxu0 %v5803_v10  ;;  %v4218_v14 = vsel %vm322_vm1, %v6713_v28, %v6708_v42  ;;  %v4219_v57 = vsel %vm322_vm1, %v6714_v59, %v6709_v17  ;;  %v6717_v18 = vpop.permute.xlu1 %6716  ;;  %v4215_v32 = vsel %vm322_vm1, %v6709_v17, %v6714_v59  ;;  %v5204_v10 = vld [vmem:[%s8649_s5 + $0x78] sm:$0xff]  ;;  %5876 = vmatpush1.bf16.msra.mxu1 %v5875_v60  ;;  %v5219_v7 = vld [vmem:[%s8649_s5 + $0xf0] sm:$0xff] }
 0x503   :  { %5806 = vmatprep.subr.bf16.mxu0 %v8091_v15  ;;  %v6722_v19 = vpop.permute.xlu0 %6721  ;;  %v5813_v15 = vpack.c.bf16 %v4219_v57, %v4218_v14  ;;  %v6718_v21 = vunpack.i.l.bf16 %v6717_v18  ;;  %v6719_v23 = vunpack.i.h.bf16 %v6717_v18  ;;  %5878 = vmatprep.subr.bf16.mxu1 %v5877_v6  ;;  %v5881_v59 = vpack.c.bf16 %v5204_v10, %v5202_v9  ;;  %v5206_v14 = vld [vmem:[%s8649_s5 + $0x88] sm:$0xff]  ;;  %v5208_v57 = vld [vmem:[%s8649_s5 + $0x98] sm:$0xff]  ;;  %v5217_v6 = vld [vmem:[%s8649_s5 + $0xe0] sm:$0xff] }
 0x504   :  { %v6723_v22 = vunpack.i.l.bf16 %v6722_v19  ;;  %v6724_v24 = vunpack.i.h.bf16 %v6722_v19  ;;  %v4225_v10 = vld [vmem:[#allocation4 + $0x58] sm:$0xff] }
 0x505   :  { %5473 = vmatmul.mubr.msk.f32.vlgmr.msra.gmra.mrb[16].mxu0 %vm103_vm2, %v3992_v29  ;;  %v5203_v29 = vld [vmem:[%s8649_s5 + $0x70] sm:$0xff] }
 0x506   :  { %5808 = vmatpush1.bf16.msra.mxu0 %v8089_v8  ;;  %4078 = vmatprep.mubr.f32.mxu0 %v6898_v20  ;;  %v3994_v8 = vld [vmem:[#allocation4 + $0x30] sm:$0xff]  ;;  %v8198_v25 = vpop.permute.xlu1 %6726  ;;  %v4221_v43 = vsel %vm322_vm1, %v6724_v24, %v6719_v23  ;;  %v4217_v51 = vsel %vm322_vm1, %v6719_v23, %v6724_v24  ;;  %v4216_v52 = vsel %vm322_vm1, %v6718_v21, %v6723_v22 }
 0x507   :  { %5810 = vmatprep.subr.bf16.mxu0 %v8097_v35  ;;  %v8201_v30 = vpop.permute.xlu0 %6731  ;;  %v6729_v34 = vunpack.i.h.bf16 %v8198_v25  ;;  %v4220_v35 = vsel %vm322_vm1, %v6723_v22, %v6718_v21  ;;  %v6728_v39 = vunpack.i.l.bf16 %v8198_v25  ;;  %v5819_v44 = vpack.c.bf16 %v4217_v51, %v4216_v52  ;;  %5880 = vmatpush1.bf16.msra.mxu1 %v5879_v13  ;;  %v5207_v25 = vld [vmem:[%s8649_s5 + $0x90] sm:$0xff]  ;;  %v5216_v51 = vld [vmem:[%s8649_s5 + $0xd8] sm:$0xff] }
 0x508   :  { %v6734_v40 = vunpack.i.h.bf16 %v8201_v30  ;;  %v6733_v41 = vunpack.i.l.bf16 %v8201_v30  ;;  %v5817_v53 = vpack.c.bf16 %v4221_v43, %v4220_v35  ;;  %5882 = vmatprep.subr.bf16.mxu1 %v5881_v59  ;;  %v5885_v24 = vpack.c.bf16 %v5208_v57, %v5206_v14  ;;  %v5210_v35 = vld [vmem:[%s8649_s5 + $0xa8] sm:$0xff]  ;;  %v5224_v13 = vld [vmem:[%s8649_s5 + $0x118] sm:$0xff]  ;;  %v5221_v14 = vld [vmem:[%s8649_s5 + $0x100] sm:$0xff] }
 0x509   :  { %5474 = vmatmul.mubr.msk.f32.gmra.mrb[18].mxu0 %vm103_vm2, %v3993_v11  ;;  %v3967_v11 = vld [vmem:[#allocation4 + $0x18] sm:$0xff]  ;;  %v5889_v43 = vpack.c.bf16 %v5212_v36, %v5210_v35  ;;  %v5223_v57 = vld [vmem:[%s8649_s5 + $0x110] sm:$0xff]  ;;  %v4360_v35 = vld [vmem:[#allocation4 + $0x68] sm:$0xff] }
 0x50a   :  { %5812 = vmatpush1.bf16.msra.mxu0 %v8095_v33  ;;  %4084 = vmatprep.mubr.f32.mxu0 %v6898_v20  ;;  %v4214_v33 = vsel %vm322_vm1, %v6708_v42, %v6713_v28  ;;  %v4355_v2 = vsel %vm461_vm3, %v6733_v41, %v6728_v39  ;;  %v4356_v3 = vsel %vm461_vm3, %v6734_v40, %v6729_v34  ;;  %v6737_v61 = vpop.permute.xlu1 %6736  ;;  %v5201_v28 = vld [vmem:[%s8649_s5 + $0x60] sm:$0xff] }
 0x50b   :  { %5814 = vmatprep.subr.bf16.mxu0 %v5813_v15  ;;  %v5815_v48 = vpack.c.bf16 %v4215_v32, %v4214_v33  ;;  %v6742_v0 = vpop.permute.xlu0 %6741  ;;  %v5821_v1 = vpack.c.bf16 %v4356_v3, %v4355_v2  ;;  %v6739_v12 = vunpack.i.h.bf16 %v6737_v61  ;;  %v6738_v16 = vunpack.i.l.bf16 %v6737_v61  ;;  %v5213_v2 = vld [vmem:[%s8649_s5 + $0xc0] sm:$0xff]  ;;  %v5215_v3 = vld [vmem:[%s8649_s5 + $0xd0] sm:$0xff] }
 0x50c   :  { %v6744_v17 = vunpack.i.h.bf16 %v6742_v0  ;;  %v6743_v42 = vunpack.i.l.bf16 %v6742_v0  ;;  %v4352_v15 = vsel %vm461_vm3, %v6729_v34, %v6734_v40  ;;  %v5883_v21 = vpack.c.bf16 %v5203_v29, %v5201_v28  ;;  %v4222_v34 = vld [vmem:[#allocation4 + $0x40] sm:$0xff] }
 0x50d   :  { %5475 = vmatmul.mubr.msk.f32.gmra.mrb[20].mxu0 %vm103_vm2, %v3994_v8  ;;  %v4351_v8 = vsel %vm461_vm3, %v6728_v39, %v6733_v41  ;;  %v5895_v60 = vpack.c.bf16 %v5215_v3, %v5213_v2  ;;  %v5233_v3 = vld [vmem:[%s8649_s5 + $0x160] sm:$0xff] }
 0x50e   :  { %4090 = vmatprep.mubr.f32.mxu0 %v6898_v20  ;;  %v8289_v18 = vpop.permute.xlu1 %6746  ;;  %v4357_v22 = vsel %vm461_vm3, %v6743_v42, %v6738_v16  ;;  %v4358_v23 = vsel %vm461_vm3, %v6744_v17, %v6739_v12  ;;  %v5823_v37 = vpack.c.bf16 %v4352_v15, %v4351_v8  ;;  %v4354_v38 = vsel %vm461_vm3, %v6739_v12, %v6744_v17  ;;  %v5222_v12 = vld [vmem:[%s8649_s5 + $0x108] sm:$0xff]  ;;  %v4359_v8 = vld [vmem:[#allocation4 + $0x60] sm:$0xff] }
 0x50f   :  { %v8291_v19 = vpop.permute.xlu0 %6751  ;;  %v6749_v30 = vunpack.i.h.bf16 %v8289_v18  ;;  %5884 = vmatpush1.bf16.msra.mxu1 %v5883_v21  ;;  %v4353_v40 = vsel %vm461_vm3, %v6738_v16, %v6743_v42  ;;  %v5825_v41 = vpack.c.bf16 %v4358_v23, %v4357_v22  ;;  %v5899_v42 = vpack.c.bf16 %v5219_v7, %v5217_v6  ;;  %v5226_v22 = vld [vmem:[%s8649_s5 + $0x128] sm:$0xff]  ;;  %v5228_v23 = vld [vmem:[%s8649_s5 + $0x138] sm:$0xff] }
 0x510   :  { %v6754_v32 = vunpack.i.h.bf16 %v8291_v19  ;;  %v6753_v33 = vunpack.i.l.bf16 %v8291_v19  ;;  %5886 = vmatprep.subr.bf16.mxu1 %v5885_v24  ;;  %v5827_v52 = vpack.c.bf16 %v4354_v38, %v4353_v40  ;;  %v5230_v38 = vld [vmem:[%s8649_s5 + $0x148] sm:$0xff] }
 0x511   :  { %5476 = vmatmul.mubr.msk.f32.gmra.mrb[22].mxu0 %vm103_vm2, %v3995_v26  ;;  %v5205_v26 = vld [vmem:[%s8649_s5 + $0x80] sm:$0xff] }
 0x512   :  { %4173 = vmatprep.mubr.f32.mxu0 %v6898_v20  ;;  %v5887_v39 = vpack.c.bf16 %v5207_v25, %v5205_v26  ;;  %v4493_v49 = vsel %vm600_vm4, %v6754_v32, %v6749_v30  ;;  %v4489_v17 = vsel %vm600_vm4, %v6749_v30, %v6754_v32  ;;  %v5903_v25 = vpack.c.bf16 %v5223_v57, %v5221_v14 }
 0x513   :  { %v6762_v62 = vpop.permute.xlu0 %6761  ;;  %v5905_v32 = vpack.c.bf16 %v5228_v23, %v5226_v22  ;;  %v4497_v22 = vld [vmem:[#allocation4 + $0x88] sm:$0xff] }
 0x514   :  { %5888 = vmatpush1.bf16.msra.mxu1 %v5887_v39  ;;  %v6763_v0 = vunpack.i.l.bf16 %v6762_v62  ;;  %v5232_v39 = vld [vmem:[%s8649_s5 + $0x158] sm:$0xff] }
 0x515   :  { %5477 = vmatmul.mubr.msk.f32.vlgmr.msra.gmra.mrb[16].mxu0 %vm103_vm2, %v3964_v31  ;;  %v6748_v31 = vunpack.i.l.bf16 %v8289_v18  ;;  %5890 = vmatprep.subr.bf16.mxu1 %v5889_v43 }
 0x516   :  { %5816 = vmatpush1.bf16.msra.mxu0 %v5815_v48  ;;  %4179 = vmatprep.mubr.f32.mxu0 %v6898_v20 }
 0x517   :  { %5818 = vmatprep.subr.bf16.mxu0 %v5817_v53  ;;  %v4492_v48 = vsel %vm600_vm4, %v6753_v33, %v6748_v31  ;;  %v6757_v53 = vpop.permute.xlu1 %6756  ;;  %v8377_v16 = vpop.permute.xlu0 %6771  ;;  %v4488_v59 = vsel %vm600_vm4, %v6748_v31, %v6753_v33  ;;  %v5225_v33 = vld [vmem:[%s8649_s5 + $0x120] sm:$0xff] }
 0x518   :  { %v5829_v55 = vpack.c.bf16 %v4493_v49, %v4492_v48  ;;  %5892 = vmatpush1.bf16.msra.mxu1 %v5891_v54  ;;  %v6758_v61 = vunpack.i.l.bf16 %v6757_v53  ;;  %v6759_v4 = vunpack.i.h.bf16 %v6757_v53  ;;  %v6774_v19 = vunpack.i.h.bf16 %v8377_v16  ;;  %v5229_v48 = vld [vmem:[%s8649_s5 + $0x140] sm:$0xff]  ;;  %v5231_v49 = vld [vmem:[%s8649_s5 + $0x150] sm:$0xff] }
 0x519   :  { %5478 = vmatmul.mubr.msk.f32.gmra.mrb[18].mxu0 %vm103_vm2, %v3965_v63  ;;  %v5893_v63 = vpack.c.bf16 %v5216_v51, %v5214_v50  ;;  %v6773_v15 = vunpack.i.l.bf16 %v8377_v16  ;;  %v5831_v24 = vpack.c.bf16 %v4489_v17, %v4488_v59  ;;  %v4361_v50 = vld [vmem:[#allocation4 + $0x70] sm:$0xff]  ;;  %v5234_v51 = vld [vmem:[%s8649_s5 + $0x168] sm:$0xff]  ;;  %v5911_v54 = vpack.c.bf16 %v5231_v49, %v5229_v48  ;;  %v4496_v59 = vld [vmem:[#allocation4 + $0x80] sm:$0xff] }
 0x51a   :  { %5820 = vmatpush1.bf16.msra.mxu0 %v5819_v44  ;;  %4185 = vmatprep.mubr.f32.mxu0 %v6898_v20  ;;  %v5220_v44 = vld [vmem:[%s8649_s5 + $0xf8] sm:$0xff]  ;;  %v4494_v29 = vsel %vm600_vm4, %v6763_v0, %v6758_v61  ;;  %v4490_v30 = vsel %vm600_vm4, %v6758_v61, %v6763_v0 }
 0x51b   :  { %5822 = vmatprep.subr.bf16.mxu0 %v5821_v1  ;;  %5894 = vmatprep.subr.bf16.mxu1 %v5893_v63  ;;  %v5897_v1 = vpack.c.bf16 %v5220_v44, %v5218_v58  ;;  %v8368_v9 = vpop.permute.xlu1 %6766  ;;  %v6782_v45 = vpop.permute.xlu0 %6781  ;;  %v4362_v58 = vld [vmem:[#allocation4 + $0x78] sm:$0xff]  ;;  %v5238_v44 = vld [vmem:[%s8649_s5 + $0x188] sm:$0xff] }
 0x51c   :  { %5896 = vmatpush1.bf16.msra.mxu1 %v5895_v60  ;;  %v6769_v28 = vunpack.i.h.bf16 %v8368_v9  ;;  %v6768_v18 = vunpack.i.l.bf16 %v8368_v9  ;;  %v6783_v63 = vunpack.i.l.bf16 %v6782_v45  ;;  %v5240_v60 = vld [vmem:[%s8649_s5 + $0x198] sm:$0xff]  ;;  %v5239_v9 = vld [vmem:[%s8649_s5 + $0x190] sm:$0xff] }
 0x51d   :  { %5479 = vmatmul.mubr.msk.f32.gmra.mrb[20].mxu0 %vm103_vm2, %v3966_v5  ;;  %v6764_v5 = vunpack.i.h.bf16 %v6762_v62  ;;  %5898 = vmatprep.subr.bf16.mxu1 %v5897_v1 }
 0x51e   :  { %4191 = vmatprep.mubr.f32.mxu0 %v6898_v20  ;;  %v4629_v36 = vsel %vm739_vm5, %v6773_v15, %v6768_v18  ;;  %v4626_v1 = vsel %vm739_vm5, %v6769_v28, %v6774_v19  ;;  %v4625_v6 = vsel %vm739_vm5, %v6768_v18, %v6773_v15 }
 0x51f   :  { %v4495_v21 = vsel %vm600_vm4, %v6764_v5, %v6759_v4  ;;  %v4491_v26 = vsel %vm600_vm4, %v6759_v4, %v6764_v5  ;;  %v6777_v43 = vpop.permute.xlu1 %6776  ;;  %v8463_v0 = vpop.permute.xlu0 %6791 }
 0x520   :  { %5900 = vmatpush1.bf16.msra.mxu1 %v5899_v42  ;;  %v5833_v31 = vpack.c.bf16 %v4495_v21, %v4494_v29  ;;  %v5835_v40 = vpack.c.bf16 %v4491_v26, %v4490_v30  ;;  %v6779_v53 = vunpack.i.h.bf16 %v6777_v43  ;;  %v6778_v62 = vunpack.i.l.bf16 %v6777_v43  ;;  %v5244_v29 = vld [vmem:[%s8649_s5 + $0x1b8] sm:$0xff]  ;;  %v5243_v21 = vld [vmem:[%s8649_s5 + $0x1b0] sm:$0xff]  ;;  %v5246_v26 = vld [vmem:[%s8649_s5 + $0x1c8] sm:$0xff] }
 0x521   :  { %5480 = vmatmul.mubr.msk.f32.gmra.mrb[22].mxu0 %vm103_vm2, %v3967_v11  ;;  %v5901_v11 = vpack.c.bf16 %v5224_v13, %v5222_v12  ;;  %v5237_v12 = vld [vmem:[%s8649_s5 + $0x180] sm:$0xff]  ;;  %v6794_v17 = vunpack.i.h.bf16 %v8463_v0  ;;  %v6793_v42 = vunpack.i.l.bf16 %v8463_v0 }
 0x522   :  { %4302 = vmatprep.mubr.f32.mxu0 %v6898_v20  ;;  %v4631_v4 = vsel %vm739_vm5, %v6783_v63, %v6778_v62  ;;  %v5919_v57 = vpack.c.bf16 %v5239_v9, %v5237_v12  ;;  %v4627_v18 = vsel %vm739_vm5, %v6778_v62, %v6783_v63 }
 0x523   :  { %5902 = vmatprep.subr.bf16.mxu1 %v5901_v11  ;;  %v8461_v61 = vpop.permute.xlu1 %6786  ;;  %v5839_v11 = vpack.c.bf16 %v4626_v1, %v4625_v6 }
 0x524   :  { %5904 = vmatpush1.bf16.msra.mxu1 %v5903_v25  ;;  %v6789_v13 = vunpack.i.h.bf16 %v8461_v61  ;;  %v6788_v16 = vunpack.i.l.bf16 %v8461_v61  ;;  %v5248_v25 = vld [vmem:[%s8649_s5 + $0x1d8] sm:$0xff] }
 0x525   :  { %5481 = vmatmul.mubr.msk.f32.vlgmr.msra.gmra.mrb[16].mxu0 %vm103_vm2, %v4222_v34  ;;  %v5227_v34 = vld [vmem:[%s8649_s5 + $0x130] sm:$0xff]  ;;  %5906 = vmatprep.subr.bf16.mxu1 %v5905_v32 }
 0x526   :  { %5824 = vmatpush1.bf16.msra.mxu0 %v5823_v37  ;;  %4308 = vmatprep.mubr.f32.mxu0 %v6898_v20  ;;  %v4630_v37 = vsel %vm739_vm5, %v6774_v19, %v6769_v28  ;;  %v5242_v28 = vld [vmem:[%s8649_s5 + $0x1a8] sm:$0xff]  ;;  %v4766_v23 = vsel %vm878_vm6, %v6793_v42, %v6788_v16  ;;  %v4763_v49 = vsel %vm878_vm6, %v6789_v13, %v6794_v17 }
 0x527   :  { %5826 = vmatprep.subr.bf16.mxu0 %v5825_v41  ;;  %v5907_v41 = vpack.c.bf16 %v5227_v34, %v5225_v33  ;;  %v5837_v46 = vpack.c.bf16 %v4630_v37, %v4629_v36  ;;  %v5921_v15 = vpack.c.bf16 %v5244_v29, %v5242_v28  ;;  %v6802_v33 = vpop.permute.xlu0 %6801  ;;  %v5245_v36 = vld [vmem:[%s8649_s5 + $0x1c0] sm:$0xff]  ;;  %v5247_v37 = vld [vmem:[%s8649_s5 + $0x1d0] sm:$0xff] }
 0x529   :  { %5482 = vmatmul.mubr.msk.f32.gmra.mrb[18].mxu0 %vm103_vm2, %v4223_v47  ;;  %v5909_v47 = vpack.c.bf16 %v5232_v39, %v5230_v38  ;;  %5908 = vmatpush1.bf16.msra.mxu1 %v5907_v41  ;;  %v4498_v38 = vld [vmem:[#allocation4 + $0x90] sm:$0xff]  ;;  %v5927_v39 = vpack.c.bf16 %v5247_v37, %v5245_v36  ;;  %v6803_v41 = vunpack.i.l.bf16 %v6802_v33 }
 0x52a   :  { %5828 = vmatpush1.bf16.msra.mxu0 %v5827_v52  ;;  %4314 = vmatprep.mubr.f32.mxu0 %v6898_v20  ;;  %v5236_v52 = vld [vmem:[%s8649_s5 + $0x178] sm:$0xff] }
 0x52b   :  { %5830 = vmatprep.subr.bf16.mxu0 %v5829_v55  ;;  %v6784_v55 = vunpack.i.h.bf16 %v6782_v45  ;;  %5910 = vmatprep.subr.bf16.mxu1 %v5909_v47  ;;  %v5913_v2 = vpack.c.bf16 %v5236_v52, %v5234_v51  ;;  %v6804_v45 = vunpack.i.h.bf16 %v6802_v33  ;;  %v4499_v47 = vld [vmem:[#allocation4 + $0x98] sm:$0xff]  ;;  %v6812_v48 = vpop.permute.xlu0 %6811 }
 0x52c   :  { %v6813_v62 = vunpack.i.l.bf16 %v6812_v48 }
 0x52d   :  { %5483 = vmatmul.mubr.msk.f32.gmra.mrb[20].mxu0 %vm103_vm2, %v4224_v56  ;;  %v5235_v56 = vld [vmem:[%s8649_s5 + $0x170] sm:$0xff]  ;;  %5912 = vmatpush1.bf16.msra.mxu1 %v5911_v54  ;;  %v4632_v5 = vsel %vm739_vm5, %v6784_v55, %v6779_v53  ;;  %v4628_v14 = vsel %vm739_vm5, %v6779_v53, %v6784_v55  ;;  %v6814_v54 = vunpack.i.h.bf16 %v6812_v48  ;;  %v4633_v55 = vld [vmem:[#allocation4 + $0xa0] sm:$0xff] }
 0x52e   :  { %4320 = vmatprep.mubr.f32.mxu0 %v6898_v20  ;;  %v5915_v7 = vpack.c.bf16 %v5235_v56, %v5233_v3  ;;  %5914 = vmatprep.subr.bf16.mxu1 %v5913_v2  ;;  %v5841_v19 = vpack.c.bf16 %v4632_v5, %v4631_v4  ;;  %v5843_v30 = vpack.c.bf16 %v4628_v14, %v4627_v18  ;;  %v4635_v4 = vld [vmem:[#allocation4 + $0xb0] sm:$0xff] }
 0x52f   :  { %v6822_v6 = vpop.permute.xlu0 %6821 }
 0x530   :  { %v6824_v12 = vunpack.i.h.bf16 %v6822_v6  ;;  %v6823_v9 = vunpack.i.l.bf16 %v6822_v6 }
 0x531   :  { %5484 = vmatmul.mubr.msk.f32.gmra.mrb[22].mxu0 %vm103_vm2, %v4225_v10  ;;  %v5917_v10 = vpack.c.bf16 %v5240_v60, %v5238_v44  ;;  %5916 = vmatpush1.bf16.msra.mxu1 %v5915_v7  ;;  %v4634_v44 = vld [vmem:[#allocation4 + $0xa8] sm:$0xff] }
 0x532   :  { %4439 = vmatprep.mubr.f32.mxu0 %v6898_v20 }
 0x533   :  { %5918 = vmatprep.subr.bf16.mxu1 %v5917_v10 }
 0x535   :  { %5485 = vmatmul.mubr.msk.f32.vlgmr.msra.gmra.mrb[16].mxu0 %vm103_vm2, %v4359_v8  ;;  %v5241_v8 = vld [vmem:[%s8649_s5 + $0x1a0] sm:$0xff]  ;;  %5920 = vmatpush1.bf16.msra.mxu1 %v5919_v57 }
 0x536   :  { %5832 = vmatpush1.bf16.msra.mxu0 %v5831_v24  ;;  %4445 = vmatprep.mubr.f32.mxu0 %v6898_v20  ;;  %v4767_v24 = vsel %vm878_vm6, %v6794_v17, %v6789_v13  ;;  %v5923_v32 = vpack.c.bf16 %v5243_v21, %v5241_v8  ;;  %v4636_v13 = vld [vmem:[#allocation4 + $0xb8] sm:$0xff]  ;;  %v6832_v17 = vpop.permute.xlu0 %6831 }
 0x537   :  { %5834 = vmatprep.subr.bf16.mxu0 %v5833_v31  ;;  %v6797_v31 = vpop.permute.xlu1 %6796  ;;  %v5845_v34 = vpack.c.bf16 %v4767_v24, %v4766_v23  ;;  %5922 = vmatprep.subr.bf16.mxu1 %v5921_v15  ;;  %v6834_v57 = vunpack.i.h.bf16 %v6832_v17  ;;  %v6833_v18 = vunpack.i.l.bf16 %v6832_v17  ;;  %v4771_v23 = vld [vmem:[#allocation4 + $0xc8] sm:$0xff] }
 0x538   :  { %v6799_v43 = vunpack.i.h.bf16 %v6797_v31 }
 0x539   :  { %5486 = vmatmul.mubr.msk.f32.gmra.mrb[18].mxu0 %vm103_vm2, %v4360_v35  ;;  %v5925_v35 = vpack.c.bf16 %v5248_v25, %v5246_v26  ;;  %5924 = vmatpush1.bf16.msra.mxu1 %v5923_v32 }
 0x53a   :  { %5836 = vmatpush1.bf16.msra.mxu0 %v5835_v40  ;;  %4451 = vmatprep.mubr.f32.mxu0 %v6898_v20  ;;  %v6798_v40 = vunpack.i.l.bf16 %v6797_v31  ;;  %v4769_v63 = vsel %vm878_vm6, %v6804_v45, %v6799_v43  ;;  %v4765_v3 = vsel %vm878_vm6, %v6799_v43, %v6804_v45  ;;  %v4772_v31 = vld [vmem:[#allocation4 + $0xd0] sm:$0xff]  ;;  %v6842_v33 = vpop.permute.xlu0 %6841 }
 0x53b   :  { %5838 = vmatprep.subr.bf16.mxu0 %v5837_v46  ;;  %5926 = vmatprep.subr.bf16.mxu1 %v5925_v35  ;;  %v6807_v46 = vpop.permute.xlu1 %6806  ;;  %v6844_v36 = vunpack.i.h.bf16 %v6842_v33  ;;  %v6843_v37 = vunpack.i.l.bf16 %v6842_v33 }
 0x53c   :  { %v6809_v51 = vunpack.i.h.bf16 %v6807_v46  ;;  %v4768_v52 = vsel %vm878_vm6, %v6803_v41, %v6798_v40  ;;  %v6808_v53 = vunpack.i.l.bf16 %v6807_v46  ;;  %v4764_v56 = vsel %vm878_vm6, %v6798_v40, %v6803_v41  ;;  %v4907_v41 = vld [vmem:[#allocation4 + $0xe0] sm:$0xff] }
 0x53d   :  { %5487 = vmatmul.mubr.msk.f32.gmra.mrb[20].mxu0 %vm103_vm2, %v4361_v50  ;;  %5928 = vmatpush1.bf16.msra.mxu1 %v5927_v39  ;;  %v4762_v50 = vsel %vm878_vm6, %v6788_v16, %v6793_v42  ;;  %v5851_v0 = vpack.c.bf16 %v4765_v3, %v4764_v56  ;;  %v5249_v56 = vld [vmem:[%s8649_s5 + $0x1e0] sm:$0xff] }
 0x53e   :  { %4457 = vmatprep.mubr.f32.mxu0 %v6898_v20  ;;  %v5847_v2 = vpack.c.bf16 %v4763_v49, %v4762_v50  ;;  %v4903_v60 = vsel %vm1017_vm7, %v6813_v62, %v6808_v53  ;;  %v4904_v61 = vsel %vm1017_vm7, %v6814_v54, %v6809_v51  ;;  %v4900_v42 = vsel %vm1017_vm7, %v6809_v51, %v6814_v54  ;;  %v4908_v50 = vld [vmem:[#allocation4 + $0xe8] sm:$0xff] }
 0x53f   :  { %v6817_v1 = vpop.permute.xlu1 %6816  ;;  %v5853_v7 = vpack.c.bf16 %v4904_v61, %v4903_v60  ;;  %v5045_v54 = vld [vmem:[#allocation4 + $0x108] sm:$0xff] }
 0x540   :  { %v6819_v5 = vunpack.i.h.bf16 %v6817_v1  ;;  %v6818_v10 = vunpack.i.l.bf16 %v6817_v1 }
 0x541   :  { %5488 = vmatmul.mubr.msk.f32.gmra.mrb[22].mxu0 %vm103_vm2, %v4362_v58  ;;  %v5849_v58 = vpack.c.bf16 %v4769_v63, %v4768_v52  ;;  %v4909_v52 = vld [vmem:[#allocation4 + $0xf0] sm:$0xff]  ;;  %v5250_v63 = vld [vmem:[%s8649_s5 + $0x1e8] sm:$0xff] }
 0x542   :  { %4576 = vmatprep.mubr.f32.mxu0 %v6898_v20  ;;  %v4905_v28 = vsel %vm1017_vm7, %v6823_v9, %v6818_v10  ;;  %v4906_v29 = vsel %vm1017_vm7, %v6824_v12, %v6819_v5  ;;  %v4902_v8 = vsel %vm1017_vm7, %v6819_v5, %v6824_v12  ;;  %v4901_v21 = vsel %vm1017_vm7, %v6818_v10, %v6823_v9 }
 0x543   :  { %v6827_v16 = vpop.permute.xlu1 %6826  ;;  %v5859_v25 = vpack.c.bf16 %v4902_v8, %v4901_v21 }
 0x544   :  { %v6828_v14 = vunpack.i.l.bf16 %v6827_v16 }
 0x545   :  { %5489 = vmatmul.mubr.msk.f32.vlgmr.msra.gmra.mrb[16].mxu0 %vm103_vm2, %v4496_v59  ;;  %v4899_v59 = vsel %vm1017_vm7, %v6808_v53, %v6813_v62  ;;  %v5044_v53 = vld [vmem:[#allocation4 + $0x100] sm:$0xff]  ;;  %v5046_v62 = vld [vmem:[#allocation4 + $0x110] sm:$0xff] }
 0x546   :  { %5840 = vmatpush1.bf16.msra.mxu0 %v5839_v11  ;;  %4582 = vmatprep.mubr.f32.mxu0 %v6898_v20  ;;  %v6829_v11 = vunpack.i.h.bf16 %v6827_v16  ;;  %v5855_v15 = vpack.c.bf16 %v4900_v42, %v4899_v59  ;;  %v5040_v24 = vsel %vm1156_vm8, %v6833_v18, %v6828_v14  ;;  %v5036_v40 = vsel %vm1156_vm8, %v6828_v14, %v6833_v18 }
 0x547   :  { %5842 = vmatprep.subr.bf16.mxu0 %v5841_v19  ;;  %v4770_v19 = vld [vmem:[#allocation4 + $0xc0] sm:$0xff]  ;;  %v6837_v32 = vpop.permute.xlu1 %6836 }
 0x548   :  { %v5041_v26 = vsel %vm1156_vm8, %v6834_v57, %v6829_v11  ;;  %v6838_v35 = vunpack.i.l.bf16 %v6837_v32  ;;  %v5037_v39 = vsel %vm1156_vm8, %v6829_v11, %v6834_v57 }
 0x549   :  { %5490 = vmatmul.mubr.msk.f32.gmra.mrb[18].mxu0 %vm103_vm2, %v4497_v22  ;;  %v5857_v22 = vpack.c.bf16 %v4906_v29, %v4905_v28  ;;  %v5863_v46 = vpack.c.bf16 %v5037_v39, %v5036_v40 }
 0x54a   :  { %5844 = vmatpush1.bf16.msra.mxu0 %v5843_v30  ;;  %4588 = vmatprep.mubr.f32.mxu0 %v6898_v20  ;;  %v5861_v30 = vpack.c.bf16 %v5041_v26, %v5040_v24  ;;  %v5042_v43 = vsel %vm1156_vm8, %v6843_v37, %v6838_v35  ;;  %v5038_v48 = vsel %vm1156_vm8, %v6838_v35, %v6843_v37 }
 0x54b   :  { %5846 = vmatprep.subr.bf16.mxu0 %v5845_v34  ;;  %v6839_v34 = vunpack.i.h.bf16 %v6837_v32  ;;  %v5164_v60 = vpop.permute.xlu1 %5163 }
 0x54d   :  { %5491 = vmatmul.mubr.msk.f32.gmra.mrb[20].mxu0 %vm103_vm2, %v4498_v38  ;;  %v4773_v38 = vld [vmem:[#allocation4 + $0xd8] sm:$0xff]  ;;  %v5043_v45 = vsel %vm1156_vm8, %v6844_v36, %v6839_v34 }
 0x54e   :  { %4594 = vmatprep.mubr.f32.mxu0 %v6898_v20  ;;  %v5865_v49 = vpack.c.bf16 %v5043_v45, %v5042_v43 }
 0x54f   :  { %v5174_v9 = vpop.permute.xlu1 %5173 }
 0x551   :  { %5492 = vmatmul.mubr.msk.f32.gmra.mrb[22].mxu0 %vm103_vm2, %v4499_v47  ;;  %v5039_v47 = vsel %vm1156_vm8, %v6839_v34, %v6844_v36 }
 0x552   :  { %4713 = vmatprep.mubr.f32.mxu0 %v6898_v20  ;;  %v5867_v51 = vpack.c.bf16 %v5039_v47, %v5038_v48 }
 0x555   :  { %5493 = vmatmul.mubr.msk.f32.vlgmr.msra.gmra.mrb[16].mxu0 %vm103_vm2, %v4633_v55  ;;  %v5047_v55 = vld [vmem:[#allocation4 + $0x118] sm:$0xff] }
 0x556   :  { %5848 = vmatpush1.bf16.msra.mxu0 %v5847_v2  ;;  %4719 = vmatprep.mubr.f32.mxu0 %v6898_v20  ;;  %v5252_v2 = vld [vmem:[%s8649_s5 + $0x1f8] sm:$0xff] }
 0x557   :  { %5850 = vmatprep.subr.bf16.mxu0 %v5849_v58  ;;  %v5929_v3 = vpack.c.bf16 %v5252_v2, %v5250_v63 }
 0x559   :  { %5494 = vmatmul.mubr.msk.f32.gmra.mrb[18].mxu0 %vm103_vm2, %v4634_v44  ;;  %5930 = vmatprep.subr.bf16.mxu1 %v5929_v3 }
 0x55a   :  { %5852 = vmatpush1.bf16.msra.mxu0 %v5851_v0  ;;  %4725 = vmatprep.mubr.f32.mxu0 %v6898_v20 }
 0x55b   :  { %5854 = vmatprep.subr.bf16.mxu0 %v5853_v7  ;;  %v5169_v7 = vpop.permute.xlu0 %5168 }
 0x55d   :  { %5495 = vmatmul.mubr.msk.f32.gmra.mrb[20].mxu0 %vm103_vm2, %v4635_v4 }
 0x55e   :  { %4731 = vmatprep.mubr.f32.mxu0 %v6898_v20 }
 0x55f   :  { %v5179_v59 = vpop.permute.xlu0 %5178 }
 0x561   :  { %5496 = vmatmul.mubr.msk.f32.gmra.mrb[22].mxu0 %vm103_vm2, %v4636_v13 }
 0x562   :  { %4850 = vmatprep.mubr.f32.mxu0 %v6898_v20 }
 0x565   :  { %5497 = vmatmul.mubr.msk.f32.vlgmr.msra.gmra.mrb[16].mxu0 %vm103_vm2, %v4770_v19 }
 0x566   :  { %5856 = vmatpush1.bf16.msra.mxu0 %v5855_v15  ;;  %4856 = vmatprep.mubr.f32.mxu0 %v6898_v20 }
 0x567   :  { %5858 = vmatprep.subr.bf16.mxu0 %v5857_v22 }
 0x569   :  { %5498 = vmatmul.mubr.msk.f32.gmra.mrb[18].mxu0 %vm103_vm2, %v4771_v23 }
 0x56a   :  { %5860 = vmatpush1.bf16.msra.mxu0 %v5859_v25  ;;  %4862 = vmatprep.mubr.f32.mxu0 %v6898_v20 }
 0x56b   :  { %5862 = vmatprep.subr.bf16.mxu0 %v5861_v30 }
 0x56d   :  { %5499 = vmatmul.mubr.msk.f32.gmra.mrb[20].mxu0 %vm103_vm2, %v4772_v31 }
 0x56e   :  { %4868 = vmatprep.mubr.f32.mxu0 %v6898_v20 }
 0x571   :  { %5500 = vmatmul.mubr.msk.f32.gmra.mrb[22].mxu0 %vm103_vm2, %v4773_v38 }
 0x572   :  { %4987 = vmatprep.mubr.f32.mxu0 %v6898_v20 }
 0x575   :  { %5501 = vmatmul.mubr.msk.f32.vlgmr.msra.gmra.mrb[16].mxu0 %vm103_vm2, %v4907_v41 }
 0x576   :  { %5864 = vmatpush1.bf16.msra.mxu0 %v5863_v46  ;;  %4993 = vmatprep.mubr.f32.mxu0 %v6898_v20 }
 0x577   :  { %5866 = vmatprep.subr.bf16.mxu0 %v5865_v49 }
 0x579   :  { %5502 = vmatmul.mubr.msk.f32.gmra.mrb[18].mxu0 %vm103_vm2, %v4908_v50 }
 0x57a   :  { %5868 = vmatpush1.bf16.msra.mxu0 %v5867_v51  ;;  %4999 = vmatprep.mubr.f32.mxu0 %v6898_v20 }
 0x57d   :  { %5503 = vmatmul.mubr.msk.f32.gmra.mrb[20].mxu0 %vm103_vm2, %v4909_v52 }
 0x57e   :  { %5005 = vmatprep.mubr.f32.mxu0 %v6898_v20 }
 0x581   :  { %5504 = vmatmul.mubr.msk.f32.gmra.mrb[22].mxu0 %vm103_vm2, %v4910_v27 }
 0x582   :  { %5124 = vmatprep.mubr.f32.mxu0 %v6898_v20 }
 0x585   :  { %5505 = vmatmul.mubr.msk.f32.vlgmr.msra.gmra.mrb[16].mxu0 %vm103_vm2, %v5044_v53 }
 0x586   :  { %5130 = vmatprep.mubr.f32.mxu0 %v6898_v20 }
 0x589   :  { %5506 = vmatmul.mubr.msk.f32.gmra.mrb[18].mxu0 %vm103_vm2, %v5045_v54 }
 0x58a   :  { %5136 = vmatprep.mubr.f32.mxu0 %v6898_v20 }
 0x58d   :  { %5507 = vmatmul.mubr.msk.f32.gmra.mrb[20].mxu0 %vm103_vm2, %v5046_v62 }
 0x58e   :  { %5142 = vmatprep.mubr.f32.mxu0 %v6898_v20  ;;  %v5251_v20 = vld [vmem:[%s8649_s5 + $0x1f0] sm:$0xff] }
 0x58f   :  { %v5931_v58 = vpack.c.bf16 %v5251_v20, %v5249_v56 }
 0x591   :  { %5508 = vmatmul.mubr.msk.f32.gmra.mrb[22].mxu0 %vm103_vm2, %v5047_v55  ;;  %5932 = vmatpush1.bf16.msra.mxu1 %v5931_v58 }
 0x658   :  { %v5126_v44 = vpop.f32.mrb[16].mxu0 }
 0x659   :  { %v5128_v61 = vpop.f32.mrb[17].mxu0  ;;  %v5181_v1 = vadd.f32 %v5164_v60, %v5126_v44 }
 0x65a   :  { %v5182_v0 = vadd.f32 %v5164_v60, %v5128_v61 }
 0x65c   :  { %v5132_v6 = vpop.f32.mrb[18].mxu0  ;;  %5317 = vmatprep.mubr.f32.mxu1 %v5182_v0 }
 0x65d   :  { %v5134_v4 = vpop.f32.mrb[19].mxu0  ;;  %5318 = vmatmul.mubr.f32.vlgmr.msra.gmra.mrb[16].mxu1 %v5181_v1  ;;  %v5183_v10 = vadd.f32 %v5169_v7, %v5132_v6 }
 0x65e   :  { %v5184_v5 = vadd.f32 %v5169_v7, %v5134_v4 }
 0x660   :  { %v5138_v12 = vpop.f32.mrb[20].mxu0  ;;  %5323 = vmatprep.mubr.f32.mxu1 %v5184_v5 }
 0x661   :  { %v5140_v13 = vpop.f32.mrb[21].mxu0  ;;  %5324 = vmatmul.mubr.f32.gmra.mrb[18].mxu1 %v5183_v10  ;;  %v5185_v17 = vadd.f32 %v5174_v9, %v5138_v12 }
 0x662   :  { %v5186_v16 = vadd.f32 %v5174_v9, %v5140_v13 }
 0x664   :  { %v5144_v42 = vpop.f32.mrb[22].mxu0  ;;  %5329 = vmatprep.mubr.f32.mxu1 %v5186_v16 }
 0x665   :  { %v5146_v28 = vpop.f32.mrb[23].mxu0  ;;  %5330 = vmatmul.mubr.f32.gmra.mrb[20].mxu1 %v5185_v17  ;;  %v5187_v11 = vadd.f32 %v5179_v59, %v5144_v42 }
 0x666   :  { %v5188_v29 = vadd.f32 %v5179_v59, %v5146_v28 }
 0x668   :  { %5335 = vmatprep.mubr.f32.mxu1 %v5188_v29 }
 0x669   :  { %5336 = vmatmul.mubr.f32.gmra.mrb[22].mxu1 %v5187_v11 }
 0x730   :  { %v5319_v14 = vpop.f32.mrb[16].mxu1 }
 0x731   :  { %5509 = vst [vmem:[%s8650_s6 + $0x40] sm:$0xff] %v5319_v14  ;;  %v5321_v57 = vpop.f32.mrb[17].mxu1 }
 0x732   :  { %5510 = vst.msk [vmem:[%s8650_s6 + $0x48] sm:$0xff] %vm2706_vm9, %v5321_v57 }
 0x734   :  { %v5325_v18 = vpop.f32.mrb[18].mxu1 }
 0x735   :  { %5511 = vst [vmem:[%s8650_s6 + $0x50] sm:$0xff] %v5325_v18  ;;  %v5327_v19 = vpop.f32.mrb[19].mxu1 }
 0x736   :  { %5512 = vst.msk [vmem:[%s8650_s6 + $0x58] sm:$0xff] %vm2706_vm9, %v5327_v19 }
 0x738   :  { %v5331_v15 = vpop.f32.mrb[20].mxu1 }
 0x739   :  { %5513 = vst [vmem:[%s8650_s6 + $0x60] sm:$0xff] %v5331_v15  ;;  %v5333_v8 = vpop.f32.mrb[21].mxu1 }
 0x73a   :  { %5514 = vst.msk [vmem:[%s8650_s6 + $0x68] sm:$0xff] %vm2706_vm9, %v5333_v8 }
 0x73c   :  { %v5337_v21 = vpop.f32.mrb[22].mxu1 }
 0x73d   :  { %5515 = vst [vmem:[%s8650_s6 + $0x70] sm:$0xff] %v5337_v21  ;;  %v5339_v22 = vpop.f32.mrb[23].mxu1 }
 0x73e   :  { %5516 = vst.msk [vmem:[%s8650_s6 + $0x78] sm:$0xff] %vm2706_vm9, %v5339_v22 }
 0x73f   :  { %5355 = vsyncpa [#allocation3], 1 }
 0x740   :  { %5356 = vsyncpa [#allocation5], 1 }

</bundles_post_ra>
